<compile_context>
chip_gen: v6e
topology: v6e:2x2x1
jax: 0.10.0
libtpu: 0.0.40
codegen_flags: <defaults>
</compile_context>

<pallas_src>
import functools

import jax
import jax.numpy as jnp
import numpy as np
from jax.experimental import pallas as pl
from jax.experimental.pallas import tpu as pltpu

LANES = 128


# --------------------------------------------------------------------------
# Parameter packing: all weight matrices -> one lane-dense bf16 buffer,
# all bias/vector params -> one lane-dense f32 buffer.  Static (offset, rows,
# cols) metadata is baked into the kernel.
# --------------------------------------------------------------------------
def _pack_rows(named_mats, dtype):
    meta, pieces, off = {}, [], 0
    for name, m in named_mats:
        r, c = int(m.shape[0]), int(m.shape[1])
        assert c <= LANES
        rp = -(-r // 8) * 8                       # pad rows to sublane multiple
        pieces.append(jnp.pad(m.astype(dtype), ((0, rp - r), (0, LANES - c))))
        meta[name] = (off, r, c)
        off += rp
    return jnp.concatenate(pieces, axis=0), meta


def _pack_vecs(named_vecs, dtype):
    meta, rows = {}, []
    for i, (name, v) in enumerate(named_vecs):
        n = int(v.shape[0])
        assert n <= LANES
        rows.append(jnp.pad(v.astype(dtype), (0, LANES - n))[None, :])
        meta[name] = (i, n)
    return jnp.concatenate(rows, axis=0), meta


def _pack_params(params, *, n_gcn, n_heads, n_hid, n_nums):
    H = n_hid
    Nn = n_nums
    watt = params['watt']                                        # (heads, F, H)
    watt_stk = jnp.concatenate([watt[h] for h in range(n_heads)], axis=1)
    a_stk = jnp.zeros((n_heads * H, 2 * n_heads), jnp.float32)
    for h in range(n_heads):
        a_stk = a_stk.at[h * H:(h + 1) * H, 2 * h].set(params['a1'][h])
        a_stk = a_stk.at[h * H:(h + 1) * H, 2 * h + 1].set(params['a2'][h])

    # Fused degree/distance Linear: block-diag(wdegT, wdistT), concat'd bias.
    wds = jnp.zeros((2 * Nn, 2 * Nn), jnp.float32)
    wds = wds.at[:Nn, :Nn].set(params['wdegT'])
    wds = wds.at[Nn:, Nn:].set(params['wdistT'])
    bds = jnp.concatenate([params['bdeg'], params['bdist']])

    # Classifier head zero-padded to 128 output lanes -> lane-dense final store.
    wc2T_pad = jnp.pad(params['wc2T'],
                       ((0, 0), (0, LANES - params['wc2T'].shape[1])))
    bc2_pad = jnp.pad(params['bc2'], (0, LANES - params['bc2'].shape[0]))

    wmats = [(f'wgcn{g}', params['wgcn'][g]) for g in range(n_gcn)]
    wmats += [('wds', wds), ('watt', watt_stk), ('a_stk', a_stk),
              ('wil1T', params['wil1T']), ('wc1T', params['wc1T']),
              ('wc2T', wc2T_pad)]
    wpk, wmeta = _pack_rows(wmats, jnp.bfloat16)

    bvecs = [(f'bgcn{g}', params['bgcn'][g]) for g in range(n_gcn)]
    bvecs += [('bds', bds), ('bil1', params['bil1']), ('wil2', params['wil2']),
              ('bil2', params['bil2']), ('bc1', params['bc1']),
              ('bc2', bc2_pad)]
    bpk, bmeta = _pack_vecs(bvecs, jnp.float32)
    return wpk, wmeta, bpk, bmeta


# --------------------------------------------------------------------------
# Pallas kernel: NMA forward for TB samples (M = TB*C*N flattened node rows)
# per grid step.
# --------------------------------------------------------------------------
def _nma_kernel(x_ref, adjbd_ref, ds_ref, wpk_ref, bpk_ref, out_ref,
                *, n_gcn, n_heads, n_hid, alpha, tb, C, N, F, wmeta, bmeta):
    G = tb * C                 # graphs in this step
    M = G * N                  # flattened node-row dimension
    H = n_hid
    L = 2 * n_heads * H
    bf = jnp.bfloat16

    def wget(name):            # bf16 weight slice from the lane-dense slab
        off, r, c = wmeta[name]
        return wpk_ref[off:off + r, 0:c]

    def bget(name):            # f32 bias / vector row
        row, n = bmeta[name]
        return bpk_ref[row, 0:n]

    def mxu(a, b):             # MXU matmul, f32 accumulation (operands pre-cast)
        return jnp.dot(a, b, preferred_element_type=jnp.float32)

    adj_bd = adjbd_ref[0]      # (M, M) bf16 block-diag adjacency (wrapper-built)
    adj_pos = adj_bd > 0       # (M, M) mask, reused across heads

    # ---- GCN stack: x <- relu(adj @ (x @ W_g) + b_g) as block-diag matmuls ----
    xb = x_ref[0]                                  # (M, F) bf16 (cast in wrapper)
    x = xb.astype(jnp.float32)
    for g in range(n_gcn):
        support = mxu(xb, wget(f'wgcn{g}'))        # (M, F)
        agg = mxu(adj_bd, support.astype(bf))      # single (M,M)@(M,F) pass
        x = jnp.maximum(agg + bget(f'bgcn{g}')[None, :], 0.0)
        xb = x.astype(bf)

    # ---- fused degree/distance node weights: one (G,2N)@(2N,2N) matmul ----
    ds = ds_ref[0]                                 # (G, 2N) f32
    dsw = jnp.maximum(mxu(ds.astype(bf), wget('wds')) + bget('bds')[None, :],
                      0.0)
    nw = dsw[:, :N] * dsw[:, N:]                   # (G, N)
    x = (x.reshape(G, N, F) * nw[:, :, None]).reshape(M, F)

    # ---- multi-head GAT: stacked projection, softmax in block-diag layout ----
    wh_all = mxu(x.astype(bf), wget('watt'))       # (M, heads*H) f32
    wh_b = wh_all.astype(bf)                       # hoisted cast, sliced per head
    f_all = mxu(wh_b, wget('a_stk'))               # (M, 2*heads) f32
    f_rows = f_all.T                               # (2*heads, M): one tiny relayout

    neg = jnp.float32(-9e15)
    head_outs = []
    for h in range(n_heads):
        f1 = f_all[:, 2 * h:2 * h + 1]             # (M, 1)
        f2 = f_rows[2 * h + 1:2 * h + 2, :]        # (1, M)
        e = f1 + f2                                # (M, M)
        e = jnp.where(e > 0, e, alpha * e)         # LeakyReLU
        sc = jnp.where(adj_pos, e, neg)            # cross-graph entries masked
        m = jnp.max(sc, axis=-1, keepdims=True)    # lane-dense 128-wide reduce
        p = jnp.exp(sc - m)                        # masked entries underflow to 0
        att = p * pl.reciprocal(jnp.sum(p, axis=-1, keepdims=True), approx=True)
        hp = mxu(att.astype(bf), wh_b[:, h * H:(h + 1) * H])     # (M, H)
        # ELU (clamped arg so the untaken branch never overflows)
        head_outs.append(jnp.where(hp > 0.0, hp,
                                   jnp.exp(jnp.minimum(hp, 0.0)) - 1.0))
    xcat = jnp.concatenate(head_outs, axis=-1)     # (M, heads*H)

    # ---- keep nodes 0:2 per graph and flatten -> (G, L) ----
    xg = xcat.reshape(G, N, n_heads * H)
    xv = jnp.concatenate([xg[:, 0, :], xg[:, 1, :]], axis=-1)    # (G, L)

    # ---- interlayer attention over the C axis (Linear-Tanh-Linear + softmax) --
    t = jnp.tanh(mxu(xv.astype(bf), wget('wil1T')) + bget('bil1')[None, :])
    s = jnp.sum(t * bget('wil2')[None, :], axis=-1, keepdims=True) \
        + bget('bil2')[None, :]                                   # (G, 1)
    s3 = s.reshape(tb, C, 1)
    sm = jnp.max(s3, axis=1, keepdims=True)
    ps = jnp.exp(s3 - sm)
    a3 = ps * pl.reciprocal(jnp.sum(ps, axis=1, keepdims=True), approx=True)
    xw = jnp.sum(a3 * xv.reshape(tb, C, L), axis=1)               # (tb, L)

    # ---- classifier; wc2T/bc2 zero-padded to 128 lanes -> lane-dense store ----
    h1 = jnp.maximum(mxu(xw.astype(bf), wget('wc1T')) + bget('bc1')[None, :],
                     0.0)
    out_ref[0] = mxu(h1.astype(bf), wget('wc2T')) + bget('bc2')[None, :]


# --------------------------------------------------------------------------
# Wrapper: grid over batch tiles of TB samples.  All layout work (flattening,
# block-diagonal adjacency, deg/dist fusion) is done here in plain XLA.
# --------------------------------------------------------------------------
def nma_forward(params, x, adj, degs_w, dist_w, *,
                n_gcn, n_heads, n_hid, alpha, tb=None):
    B, C, N, F = x.shape
    if tb is None:
        divs = [d for d in range(1, B + 1) if B % d == 0]
        fits = [d for d in divs if d * C * N <= 256]   # cap M at 256 (MXU fill)
        multi = [d for d in fits if B // d >= 2]       # >=2 steps (v7x megacore)
        tb = max(multi or fits or [1])
    assert B % tb == 0, "batch must be divisible by the batch tile"
    nsteps = B // tb
    G = tb * C
    M = G * N

    wpk, wmeta, bpk, bmeta = _pack_params(params, n_gcn=n_gcn, n_heads=n_heads,
                                          n_hid=n_hid, n_nums=N)

    # Pre-flattened, lane-dense inputs.
    x_flat = x.reshape(nsteps, M, F).astype(jnp.bfloat16)  # first use is bf16 matmul
    adj4 = adj.reshape(nsteps, G, N, N)
    eye = jnp.eye(G, dtype=adj.dtype)
    adj_bd = (adj4[:, :, :, None, :] * eye[None, :, None, :, None]) \
        .reshape(nsteps, M, M).astype(jnp.bfloat16)         # 0/1 exact in bf16
    ds = jnp.concatenate([degs_w.reshape(nsteps, G, N),
                          dist_w.reshape(nsteps, G, N)], axis=-1)  # (nsteps,G,2N)

    kernel = functools.partial(_nma_kernel, n_gcn=n_gcn, n_heads=n_heads,
                               n_hid=n_hid, alpha=float(alpha), tb=tb,
                               C=C, N=N, F=F, wmeta=wmeta, bmeta=bmeta)

    out = pl.pallas_call(
        kernel,
        grid=(nsteps,),
        in_specs=[
            pl.BlockSpec((1, M, F), lambda b: (b, 0, 0)),
            pl.BlockSpec((1, M, M), lambda b: (b, 0, 0)),
            pl.BlockSpec((1, G, 2 * N), lambda b: (b, 0, 0)),
            pl.BlockSpec(wpk.shape, lambda b: (0, 0)),
            pl.BlockSpec(bpk.shape, lambda b: (0, 0)),
        ],
        out_specs=pl.BlockSpec((1, tb, LANES), lambda b: (b, 0, 0)),
        out_shape=jax.ShapeDtypeStruct((nsteps, tb, LANES), jnp.float32),
        compiler_params=pltpu.CompilerParams(
            dimension_semantics=("parallel",),
            vmem_limit_bytes=32 * 1024 * 1024),
    )(x_flat, adj_bd, ds, wpk, bpk)
    return out.reshape(B, LANES)[:, :2]


# --------------------------------------------------------------------------
# Deterministic parameter init (torch Linear weights stored pre-transposed so
# that y = x @ W_T + b; biases are 1-D).
# --------------------------------------------------------------------------
def init_params(key, *, n_feat, n_hid, n_nums, n_heads, n_gcn):
    L = 2 * n_heads * n_hid
    D = n_feat
    ks = jax.random.split(key, 17)

    def nrm(k, shape, scale=0.2):
        return jax.random.normal(k, shape, dtype=jnp.float32) * scale

    return dict(
        wgcn=nrm(ks[0], (n_gcn, n_feat, n_feat)),
        bgcn=nrm(ks[1], (n_gcn, n_feat), 0.1),
        wdegT=nrm(ks[2], (n_nums, n_nums)),
        bdeg=nrm(ks[3], (n_nums,), 0.1),
        wdistT=nrm(ks[4], (n_nums, n_nums)),
        bdist=nrm(ks[5], (n_nums,), 0.1),
        watt=nrm(ks[6], (n_heads, n_feat, n_hid)),
        a1=nrm(ks[7], (n_heads, n_hid)),
        a2=nrm(ks[8], (n_heads, n_hid)),
        wil1T=nrm(ks[9], (L, D)),
        bil1=nrm(ks[10], (D,), 0.1),
        wil2=nrm(ks[11], (D,)),
        bil2=nrm(ks[12], (1,), 0.1),
        wc1T=nrm(ks[13], (L, L)),
        bc1=nrm(ks[14], (L,), 0.1),
        wc2T=nrm(ks[15], (L, 2)),
        bc2=nrm(ks[16], (2,), 0.1),
    )


# --------------------------------------------------------------------------
# Pure-JAX reference (same math incl. bf16 MXU operand rounding) to validate.
# --------------------------------------------------------------------------
def nma_reference(params, x, adj, degs_w, dist_w, *, n_gcn, n_heads, alpha):
    bf, f32 = jnp.bfloat16, jnp.float32
    adj_b = adj.astype(bf)
    for g in range(n_gcn):
        support = jnp.einsum('bcnf,fk->bcnk', x.astype(bf),
                             params['wgcn'][g].astype(bf),
                             preferred_element_type=f32)
        agg = jnp.einsum('bcnm,bcmk->bcnk', adj_b, support.astype(bf),
                         preferred_element_type=f32)
        x = jax.nn.relu(agg + params['bgcn'][g])
    dw = jax.nn.relu(jnp.einsum('bcon,nm->bcom', degs_w.astype(bf),
                                params['wdegT'].astype(bf),
                                preferred_element_type=f32) + params['bdeg'])
    sw = jax.nn.relu(jnp.einsum('bcon,nm->bcom', dist_w.astype(bf),
                                params['wdistT'].astype(bf),
                                preferred_element_type=f32) + params['bdist'])
    nw = jnp.swapaxes(dw * sw, 3, 2)                   # (B, C, N, 1)
    x = x * nw
    outs = []
    for h in range(n_heads):
        Wh = jnp.einsum('bcnf,fk->bcnk', x.astype(bf),
                        params['watt'][h].astype(bf), preferred_element_type=f32)
        f1 = jnp.einsum('bcnk,k->bcn', Wh.astype(bf), params['a1'][h].astype(bf),
                        preferred_element_type=f32)
        f2 = jnp.einsum('bcnk,k->bcn', Wh.astype(bf), params['a2'][h].astype(bf),
                        preferred_element_type=f32)
        e = f1[..., :, None] + f2[..., None, :]
        e = jnp.where(e > 0, e, alpha * e)
        sc = jnp.where(adj > 0, e, -9e15)
        att = jax.nn.softmax(sc, axis=-1)
        hp = jnp.einsum('bcnm,bcmk->bcnk', att.astype(bf), Wh.astype(bf),
                        preferred_element_type=f32)
        outs.append(jnp.where(hp > 0.0, hp, jnp.exp(jnp.minimum(hp, 0.0)) - 1.0))
    xc = jnp.concatenate(outs, axis=-1)
    B, C = x.shape[0], x.shape[1]
    xv = xc[:, :, 0:2, :].reshape(B, C, -1)            # (B, C, L)
    t = jnp.tanh(jnp.einsum('bcl,ld->bcd', xv.astype(bf),
                            params['wil1T'].astype(bf),
                            preferred_element_type=f32) + params['bil1'])
    s = jnp.sum(t * params['wil2'], axis=-1) + params['bil2']     # (B, C)
    a = jax.nn.softmax(s, axis=-1)
    xw = jnp.einsum('bc,bcl->bl', a, xv)
    h1 = jax.nn.relu(jnp.einsum('bl,lk->bk', xw.astype(bf),
                                params['wc1T'].astype(bf),
                                preferred_element_type=f32) + params['bc1'])
    return jnp.einsum('bk,ko->bo', h1.astype(bf), params['wc2T'].astype(bf),
                      preferred_element_type=f32) + params['bc2']  # (B, 2)


# --------------------------------------------------------------------------
if __name__ == "__main__":
    B, C = 8, 4
    n_feat, n_hid, n_nums, n_heads, n_gcn = 16, 8, 8, 2, 2
    alpha = 0.2                    # dropout: eval mode -> identity

    key = jax.random.PRNGKey(0)
    kx, kadj, kdeg, kdist, kparam = jax.random.split(key, 5)

    x = jax.random.normal(kx, (B, C, n_nums, n_feat), dtype=jnp.float32)
    adj = (jax.random.uniform(kadj, (B, C, n_nums, n_nums)) > 0.5).astype(jnp.float32)
    # self-loops: every row of adj has >= 1 nonzero (masked-softmax assumption)
    adj = jnp.clip(adj + jnp.eye(n_nums, dtype=jnp.float32)[None, None], 0.0, 1.0)
    degs_w = jax.random.normal(kdeg, (B, C, 1, n_nums), dtype=jnp.float32)
    dist_w = jax.random.normal(kdist, (B, C, 1, n_nums), dtype=jnp.float32)

    params = init_params(kparam, n_feat=n_feat, n_hid=n_hid, n_nums=n_nums,
                         n_heads=n_heads, n_gcn=n_gcn)

    logits = nma_forward(params, x, adj, degs_w, dist_w,
                         n_gcn=n_gcn, n_heads=n_heads, n_hid=n_hid, alpha=alpha)
    logits = jax.block_until_ready(logits)

    ref = nma_reference(params, x, adj, degs_w, dist_w,
                        n_gcn=n_gcn, n_heads=n_heads, alpha=alpha)
    np.testing.assert_allclose(np.asarray(logits), np.asarray(ref),
                               rtol=2e-2, atol=1e-3)
    print("KERNEL_OK")
</pallas_src>

<mosaic_0001>
module attributes {stable_mosaic.version = 11 : i64} {
  func.func @_nma_kernel(%arg0: i32, %arg1: memref<1x128x16xbf16, #tpu.memory_space<vmem>>, %arg2: memref<1x128x128xbf16, #tpu.memory_space<vmem>>, %arg3: memref<1x16x16xf32, #tpu.memory_space<vmem>>, %arg4: memref<176x128xbf16, #tpu.memory_space<vmem>>, %arg5: memref<8x128xf32, #tpu.memory_space<vmem>>, %arg6: memref<1x4x128xf32, #tpu.memory_space<vmem>>) attributes {dimension_semantics = [#tpu.dimension_semantics<parallel>], iteration_bounds = array<i64: 2>, scalar_prefetch = 0 : i64, scratch_operands = 0 : i64, tpu.core_type = #tpu.core_type<tc>, window_params = [{transform_indices = @transform_0, window_bounds = array<i64: 1, 128, 16>}, {transform_indices = @transform_1, window_bounds = array<i64: 1, 128, 128>}, {transform_indices = @transform_2, window_bounds = array<i64: 1, 16, 16>}, {pipeline_mode = #tpu.pipeline_mode<synchronous>, transform_indices = @transform_3, window_bounds = array<i64: 176, 128>}, {pipeline_mode = #tpu.pipeline_mode<synchronous>, transform_indices = @transform_4, window_bounds = array<i64: 8, 128>}, {transform_indices = @transform_5, window_bounds = array<i64: 1, 4, 128>}]} {
    %c0 = arith.constant 0 : index
    %c0_0 = arith.constant 0 : index
    %c0_1 = arith.constant 0 : index
    %0 = vector.load %arg2[%c0, %c0_0, %c0_1] : memref<1x128x128xbf16, #tpu.memory_space<vmem>>, vector<1x128x128xbf16>
    %1 = vector.shape_cast %0 : vector<1x128x128xbf16> to vector<128x128xbf16>
    %cst = arith.constant 0.000000e+00 : bf16
    %2 = vector.broadcast %cst : bf16 to vector<128x128xbf16>
    %3 = arith.cmpf ogt, %1, %2 : vector<128x128xbf16>
    %c0_2 = arith.constant 0 : index
    %c0_3 = arith.constant 0 : index
    %c0_4 = arith.constant 0 : index
    %4 = vector.load %arg1[%c0_2, %c0_3, %c0_4] : memref<1x128x16xbf16, #tpu.memory_space<vmem>>, vector<1x128x16xbf16>
    %5 = vector.shape_cast %4 : vector<1x128x16xbf16> to vector<128x16xbf16>
    %c0_5 = arith.constant 0 : index
    %c0_6 = arith.constant 0 : index
    %6 = vector.load %arg4[%c0_5, %c0_6] : memref<176x128xbf16, #tpu.memory_space<vmem>>, vector<16x16xbf16>
    %cst_7 = arith.constant dense<0.000000e+00> : vector<128x16xf32>
    %7 = tpu.matmul %5, %6, %cst_7 {dimension_numbers = #tpu.dot_dimension_numbers<[1], [0], [0], [1], [0, 0, 1, 1], [], []>} : vector<128x16xbf16>, vector<16x16xbf16>, vector<128x16xf32> -> vector<128x16xf32>
    %8 = arith.truncf %7 : vector<128x16xf32> to vector<128x16xbf16>
    %cst_8 = arith.constant dense<0.000000e+00> : vector<128x16xf32>
    %9 = tpu.matmul %1, %8, %cst_8 {dimension_numbers = #tpu.dot_dimension_numbers<[1], [0], [0], [1], [0, 0, 1, 1], [], []>} : vector<128x128xbf16>, vector<128x16xbf16>, vector<128x16xf32> -> vector<128x16xf32>
    %c0_9 = arith.constant 0 : index
    %c0_10 = arith.constant 0 : index
    %10 = vector.load %arg5[%c0_9, %c0_10] : memref<8x128xf32, #tpu.memory_space<vmem>>, vector<1x16xf32>
    %11 = vector.shape_cast %10 : vector<1x16xf32> to vector<16xf32>
    %12 = vector.shape_cast %11 : vector<16xf32> to vector<1x16xf32>
    %13 = vector.broadcast %12 : vector<1x16xf32> to vector<128x16xf32>
    %14 = arith.addf %9, %13 : vector<128x16xf32>
    %cst_11 = arith.constant 0.000000e+00 : f32
    %15 = vector.broadcast %cst_11 : f32 to vector<128x16xf32>
    %16 = arith.maximumf %14, %15 : vector<128x16xf32>
    %17 = arith.truncf %16 : vector<128x16xf32> to vector<128x16xbf16>
    %c16 = arith.constant 16 : index
    %c0_12 = arith.constant 0 : index
    %18 = vector.load %arg4[%c16, %c0_12] : memref<176x128xbf16, #tpu.memory_space<vmem>>, vector<16x16xbf16>
    %cst_13 = arith.constant dense<0.000000e+00> : vector<128x16xf32>
    %19 = tpu.matmul %17, %18, %cst_13 {dimension_numbers = #tpu.dot_dimension_numbers<[1], [0], [0], [1], [0, 0, 1, 1], [], []>} : vector<128x16xbf16>, vector<16x16xbf16>, vector<128x16xf32> -> vector<128x16xf32>
    %20 = arith.truncf %19 : vector<128x16xf32> to vector<128x16xbf16>
    %cst_14 = arith.constant dense<0.000000e+00> : vector<128x16xf32>
    %21 = tpu.matmul %1, %20, %cst_14 {dimension_numbers = #tpu.dot_dimension_numbers<[1], [0], [0], [1], [0, 0, 1, 1], [], []>} : vector<128x128xbf16>, vector<128x16xbf16>, vector<128x16xf32> -> vector<128x16xf32>
    %c1 = arith.constant 1 : index
    %c0_15 = arith.constant 0 : index
    %22 = vector.load %arg5[%c1, %c0_15] : memref<8x128xf32, #tpu.memory_space<vmem>>, vector<1x16xf32>
    %23 = vector.shape_cast %22 : vector<1x16xf32> to vector<16xf32>
    %24 = vector.shape_cast %23 : vector<16xf32> to vector<1x16xf32>
    %25 = vector.broadcast %24 : vector<1x16xf32> to vector<128x16xf32>
    %26 = arith.addf %21, %25 : vector<128x16xf32>
    %cst_16 = arith.constant 0.000000e+00 : f32
    %27 = vector.broadcast %cst_16 : f32 to vector<128x16xf32>
    %28 = arith.maximumf %26, %27 : vector<128x16xf32>
    %c0_17 = arith.constant 0 : index
    %c0_18 = arith.constant 0 : index
    %c0_19 = arith.constant 0 : index
    %29 = vector.load %arg3[%c0_17, %c0_18, %c0_19] : memref<1x16x16xf32, #tpu.memory_space<vmem>>, vector<1x16x16xf32>
    %30 = vector.shape_cast %29 : vector<1x16x16xf32> to vector<16x16xf32>
    %31 = arith.truncf %30 : vector<16x16xf32> to vector<16x16xbf16>
    %c32 = arith.constant 32 : index
    %c0_20 = arith.constant 0 : index
    %32 = vector.load %arg4[%c32, %c0_20] : memref<176x128xbf16, #tpu.memory_space<vmem>>, vector<16x16xbf16>
    %cst_21 = arith.constant dense<0.000000e+00> : vector<16x16xf32>
    %33 = tpu.matmul %31, %32, %cst_21 {dimension_numbers = #tpu.dot_dimension_numbers<[1], [0], [0], [1], [0, 0, 1, 1], [], []>} : vector<16x16xbf16>, vector<16x16xbf16>, vector<16x16xf32> -> vector<16x16xf32>
    %c2 = arith.constant 2 : index
    %c0_22 = arith.constant 0 : index
    %34 = vector.load %arg5[%c2, %c0_22] : memref<8x128xf32, #tpu.memory_space<vmem>>, vector<1x16xf32>
    %35 = vector.shape_cast %34 : vector<1x16xf32> to vector<16xf32>
    %36 = vector.shape_cast %35 : vector<16xf32> to vector<1x16xf32>
    %37 = vector.broadcast %36 : vector<1x16xf32> to vector<16x16xf32>
    %38 = arith.addf %33, %37 : vector<16x16xf32>
    %cst_23 = arith.constant 0.000000e+00 : f32
    %39 = vector.broadcast %cst_23 : f32 to vector<16x16xf32>
    %40 = arith.maximumf %38, %39 : vector<16x16xf32>
    %41 = vector.extract_strided_slice %40 {offsets = [0, 0], sizes = [16, 8], strides = [1, 1]} : vector<16x16xf32> to vector<16x8xf32>
    %42 = vector.extract_strided_slice %40 {offsets = [0, 8], sizes = [16, 8], strides = [1, 1]} : vector<16x16xf32> to vector<16x8xf32>
    %43 = arith.mulf %41, %42 : vector<16x8xf32>
    %44 = vector.shape_cast %28 : vector<128x16xf32> to vector<16x8x16xf32>
    %45 = vector.shape_cast %43 : vector<16x8xf32> to vector<16x8x1xf32>
    %46 = vector.broadcast %45 : vector<16x8x1xf32> to vector<16x8x16xf32>
    %47 = arith.mulf %44, %46 : vector<16x8x16xf32>
    %48 = vector.shape_cast %47 : vector<16x8x16xf32> to vector<128x16xf32>
    %49 = arith.truncf %48 : vector<128x16xf32> to vector<128x16xbf16>
    %c48 = arith.constant 48 : index
    %c0_24 = arith.constant 0 : index
    %50 = vector.load %arg4[%c48, %c0_24] : memref<176x128xbf16, #tpu.memory_space<vmem>>, vector<16x16xbf16>
    %cst_25 = arith.constant dense<0.000000e+00> : vector<128x16xf32>
    %51 = tpu.matmul %49, %50, %cst_25 {dimension_numbers = #tpu.dot_dimension_numbers<[1], [0], [0], [1], [0, 0, 1, 1], [], []>} : vector<128x16xbf16>, vector<16x16xbf16>, vector<128x16xf32> -> vector<128x16xf32>
    %52 = arith.truncf %51 : vector<128x16xf32> to vector<128x16xbf16>
    %c64 = arith.constant 64 : index
    %c0_26 = arith.constant 0 : index
    %53 = vector.load %arg4[%c64, %c0_26] : memref<176x128xbf16, #tpu.memory_space<vmem>>, vector<16x4xbf16>
    %cst_27 = arith.constant dense<0.000000e+00> : vector<128x4xf32>
    %54 = tpu.matmul %52, %53, %cst_27 {dimension_numbers = #tpu.dot_dimension_numbers<[1], [0], [0], [1], [0, 0, 1, 1], [], []>} : vector<128x16xbf16>, vector<16x4xbf16>, vector<128x4xf32> -> vector<128x4xf32>
    %55 = tpu.transpose %54, [1, 0] : vector<128x4xf32> -> vector<4x128xf32>
    %56 = vector.extract_strided_slice %54 {offsets = [0, 0], sizes = [128, 1], strides = [1, 1]} : vector<128x4xf32> to vector<128x1xf32>
    %57 = vector.extract_strided_slice %55 {offsets = [1, 0], sizes = [1, 128], strides = [1, 1]} : vector<4x128xf32> to vector<1x128xf32>
    %58 = vector.broadcast %56 : vector<128x1xf32> to vector<128x128xf32>
    %59 = vector.broadcast %57 : vector<1x128xf32> to vector<128x128xf32>
    %60 = arith.addf %58, %59 : vector<128x128xf32>
    %cst_28 = arith.constant 0.000000e+00 : f32
    %61 = vector.broadcast %cst_28 : f32 to vector<128x128xf32>
    %62 = arith.cmpf ogt, %60, %61 : vector<128x128xf32>
    %cst_29 = arith.constant 2.000000e-01 : f32
    %63 = vector.broadcast %cst_29 : f32 to vector<128x128xf32>
    %64 = arith.mulf %63, %60 : vector<128x128xf32>
    %65 = arith.select %62, %60, %64 : vector<128x128xi1>, vector<128x128xf32>
    %cst_30 = arith.constant -9.000000e+15 : f32
    %66 = vector.broadcast %cst_30 : f32 to vector<128x128xf32>
    %67 = arith.select %3, %65, %66 : vector<128x128xi1>, vector<128x128xf32>
    %cst_31 = arith.constant dense<0xFF800000> : vector<128xf32>
    %68 = vector.multi_reduction <maximumf>, %67, %cst_31 [1] : vector<128x128xf32> to vector<128xf32>
    %69 = vector.shape_cast %68 : vector<128xf32> to vector<128x1xf32>
    %70 = vector.broadcast %69 : vector<128x1xf32> to vector<128x128xf32>
    %71 = arith.subf %67, %70 : vector<128x128xf32>
    %72 = math.exp %71 : vector<128x128xf32>
    %cst_32 = arith.constant dense<0.000000e+00> : vector<128xf32>
    %73 = vector.multi_reduction <add>, %72, %cst_32 [1] : vector<128x128xf32> to vector<128xf32>
    %74 = vector.shape_cast %73 : vector<128xf32> to vector<128x1xf32>
    %75 = tpu.reciprocal %74 {approx = true} : vector<128x1xf32> -> vector<128x1xf32>
    %76 = vector.broadcast %75 : vector<128x1xf32> to vector<128x128xf32>
    %77 = arith.mulf %72, %76 : vector<128x128xf32>
    %78 = arith.truncf %77 : vector<128x128xf32> to vector<128x128xbf16>
    %79 = vector.extract_strided_slice %52 {offsets = [0, 0], sizes = [128, 8], strides = [1, 1]} : vector<128x16xbf16> to vector<128x8xbf16>
    %cst_33 = arith.constant dense<0.000000e+00> : vector<128x8xf32>
    %80 = tpu.matmul %78, %79, %cst_33 {dimension_numbers = #tpu.dot_dimension_numbers<[1], [0], [0], [1], [0, 0, 1, 1], [], []>} : vector<128x128xbf16>, vector<128x8xbf16>, vector<128x8xf32> -> vector<128x8xf32>
    %cst_34 = arith.constant 0.000000e+00 : f32
    %81 = vector.broadcast %cst_34 : f32 to vector<128x8xf32>
    %82 = arith.cmpf ogt, %80, %81 : vector<128x8xf32>
    %cst_35 = arith.constant 0.000000e+00 : f32
    %83 = vector.broadcast %cst_35 : f32 to vector<128x8xf32>
    %84 = arith.minimumf %80, %83 : vector<128x8xf32>
    %85 = math.exp %84 : vector<128x8xf32>
    %cst_36 = arith.constant 1.000000e+00 : f32
    %86 = vector.broadcast %cst_36 : f32 to vector<128x8xf32>
    %87 = arith.subf %85, %86 : vector<128x8xf32>
    %88 = arith.select %82, %80, %87 : vector<128x8xi1>, vector<128x8xf32>
    %89 = vector.extract_strided_slice %54 {offsets = [0, 2], sizes = [128, 1], strides = [1, 1]} : vector<128x4xf32> to vector<128x1xf32>
    %90 = vector.extract_strided_slice %55 {offsets = [3, 0], sizes = [1, 128], strides = [1, 1]} : vector<4x128xf32> to vector<1x128xf32>
    %91 = vector.broadcast %89 : vector<128x1xf32> to vector<128x128xf32>
    %92 = vector.broadcast %90 : vector<1x128xf32> to vector<128x128xf32>
    %93 = arith.addf %91, %92 : vector<128x128xf32>
    %cst_37 = arith.constant 0.000000e+00 : f32
    %94 = vector.broadcast %cst_37 : f32 to vector<128x128xf32>
    %95 = arith.cmpf ogt, %93, %94 : vector<128x128xf32>
    %cst_38 = arith.constant 2.000000e-01 : f32
    %96 = vector.broadcast %cst_38 : f32 to vector<128x128xf32>
    %97 = arith.mulf %96, %93 : vector<128x128xf32>
    %98 = arith.select %95, %93, %97 : vector<128x128xi1>, vector<128x128xf32>
    %cst_39 = arith.constant -9.000000e+15 : f32
    %99 = vector.broadcast %cst_39 : f32 to vector<128x128xf32>
    %100 = arith.select %3, %98, %99 : vector<128x128xi1>, vector<128x128xf32>
    %cst_40 = arith.constant dense<0xFF800000> : vector<128xf32>
    %101 = vector.multi_reduction <maximumf>, %100, %cst_40 [1] : vector<128x128xf32> to vector<128xf32>
    %102 = vector.shape_cast %101 : vector<128xf32> to vector<128x1xf32>
    %103 = vector.broadcast %102 : vector<128x1xf32> to vector<128x128xf32>
    %104 = arith.subf %100, %103 : vector<128x128xf32>
    %105 = math.exp %104 : vector<128x128xf32>
    %cst_41 = arith.constant dense<0.000000e+00> : vector<128xf32>
    %106 = vector.multi_reduction <add>, %105, %cst_41 [1] : vector<128x128xf32> to vector<128xf32>
    %107 = vector.shape_cast %106 : vector<128xf32> to vector<128x1xf32>
    %108 = tpu.reciprocal %107 {approx = true} : vector<128x1xf32> -> vector<128x1xf32>
    %109 = vector.broadcast %108 : vector<128x1xf32> to vector<128x128xf32>
    %110 = arith.mulf %105, %109 : vector<128x128xf32>
    %111 = arith.truncf %110 : vector<128x128xf32> to vector<128x128xbf16>
    %112 = vector.extract_strided_slice %52 {offsets = [0, 8], sizes = [128, 8], strides = [1, 1]} : vector<128x16xbf16> to vector<128x8xbf16>
    %cst_42 = arith.constant dense<0.000000e+00> : vector<128x8xf32>
    %113 = tpu.matmul %111, %112, %cst_42 {dimension_numbers = #tpu.dot_dimension_numbers<[1], [0], [0], [1], [0, 0, 1, 1], [], []>} : vector<128x128xbf16>, vector<128x8xbf16>, vector<128x8xf32> -> vector<128x8xf32>
    %cst_43 = arith.constant 0.000000e+00 : f32
    %114 = vector.broadcast %cst_43 : f32 to vector<128x8xf32>
    %115 = arith.cmpf ogt, %113, %114 : vector<128x8xf32>
    %cst_44 = arith.constant 0.000000e+00 : f32
    %116 = vector.broadcast %cst_44 : f32 to vector<128x8xf32>
    %117 = arith.minimumf %113, %116 : vector<128x8xf32>
    %118 = math.exp %117 : vector<128x8xf32>
    %cst_45 = arith.constant 1.000000e+00 : f32
    %119 = vector.broadcast %cst_45 : f32 to vector<128x8xf32>
    %120 = arith.subf %118, %119 : vector<128x8xf32>
    %121 = arith.select %115, %113, %120 : vector<128x8xi1>, vector<128x8xf32>
    %122 = tpu.concatenate %88, %121 in 1 : vector<128x8xf32>, vector<128x8xf32> -> vector<128x16xf32>
    %123 = vector.shape_cast %122 : vector<128x16xf32> to vector<16x8x16xf32>
    %124 = vector.extract_strided_slice %123 {offsets = [0, 0, 0], sizes = [16, 1, 16], strides = [1, 1, 1]} : vector<16x8x16xf32> to vector<16x1x16xf32>
    %125 = vector.shape_cast %124 : vector<16x1x16xf32> to vector<16x16xf32>
    %126 = vector.extract_strided_slice %123 {offsets = [0, 1, 0], sizes = [16, 1, 16], strides = [1, 1, 1]} : vector<16x8x16xf32> to vector<16x1x16xf32>
    %127 = vector.shape_cast %126 : vector<16x1x16xf32> to vector<16x16xf32>
    %128 = tpu.concatenate %125, %127 in 1 : vector<16x16xf32>, vector<16x16xf32> -> vector<16x32xf32>
    %129 = arith.truncf %128 : vector<16x32xf32> to vector<16x32xbf16>
    %c80 = arith.constant 80 : index
    %c0_46 = arith.constant 0 : index
    %130 = vector.load %arg4[%c80, %c0_46] : memref<176x128xbf16, #tpu.memory_space<vmem>>, vector<32x16xbf16>
    %cst_47 = arith.constant dense<0.000000e+00> : vector<16x16xf32>
    %131 = tpu.matmul %129, %130, %cst_47 {dimension_numbers = #tpu.dot_dimension_numbers<[1], [0], [0], [1], [0, 0, 1, 1], [], []>} : vector<16x32xbf16>, vector<32x16xbf16>, vector<16x16xf32> -> vector<16x16xf32>
    %c3 = arith.constant 3 : index
    %c0_48 = arith.constant 0 : index
    %132 = vector.load %arg5[%c3, %c0_48] : memref<8x128xf32, #tpu.memory_space<vmem>>, vector<1x16xf32>
    %133 = vector.shape_cast %132 : vector<1x16xf32> to vector<16xf32>
    %134 = vector.shape_cast %133 : vector<16xf32> to vector<1x16xf32>
    %135 = vector.broadcast %134 : vector<1x16xf32> to vector<16x16xf32>
    %136 = arith.addf %131, %135 : vector<16x16xf32>
    %137 = math.tanh %136 : vector<16x16xf32>
    %c4 = arith.constant 4 : index
    %c0_49 = arith.constant 0 : index
    %138 = vector.load %arg5[%c4, %c0_49] : memref<8x128xf32, #tpu.memory_space<vmem>>, vector<1x16xf32>
    %139 = vector.shape_cast %138 : vector<1x16xf32> to vector<16xf32>
    %140 = vector.shape_cast %139 : vector<16xf32> to vector<1x16xf32>
    %141 = vector.broadcast %140 : vector<1x16xf32> to vector<16x16xf32>
    %142 = arith.mulf %137, %141 : vector<16x16xf32>
    %cst_50 = arith.constant dense<0.000000e+00> : vector<16xf32>
    %143 = vector.multi_reduction <add>, %142, %cst_50 [1] : vector<16x16xf32> to vector<16xf32>
    %144 = vector.shape_cast %143 : vector<16xf32> to vector<16x1xf32>
    %c5 = arith.constant 5 : index
    %c0_51 = arith.constant 0 : index
    %145 = vector.load %arg5[%c5, %c0_51] : memref<8x128xf32, #tpu.memory_space<vmem>>, vector<1x1xf32>
    %146 = vector.shape_cast %145 : vector<1x1xf32> to vector<1xf32>
    %147 = vector.shape_cast %146 : vector<1xf32> to vector<1x1xf32>
    %148 = vector.broadcast %147 : vector<1x1xf32> to vector<16x1xf32>
    %149 = arith.addf %144, %148 : vector<16x1xf32>
    %150 = vector.shape_cast %149 : vector<16x1xf32> to vector<4x4x1xf32>
    %cst_52 = arith.constant dense<0xFF800000> : vector<4x1xf32>
    %151 = vector.multi_reduction <maximumf>, %150, %cst_52 [1] : vector<4x4x1xf32> to vector<4x1xf32>
    %152 = vector.shape_cast %151 : vector<4x1xf32> to vector<4x1x1xf32>
    %153 = vector.broadcast %152 : vector<4x1x1xf32> to vector<4x4x1xf32>
    %154 = arith.subf %150, %153 : vector<4x4x1xf32>
    %155 = math.exp %154 : vector<4x4x1xf32>
    %cst_53 = arith.constant dense<0.000000e+00> : vector<4x1xf32>
    %156 = vector.multi_reduction <add>, %155, %cst_53 [1] : vector<4x4x1xf32> to vector<4x1xf32>
    %157 = vector.shape_cast %156 : vector<4x1xf32> to vector<4x1x1xf32>
    %158 = tpu.reciprocal %157 {approx = true} : vector<4x1x1xf32> -> vector<4x1x1xf32>
    %159 = vector.broadcast %158 : vector<4x1x1xf32> to vector<4x4x1xf32>
    %160 = arith.mulf %155, %159 : vector<4x4x1xf32>
    %161 = vector.shape_cast %128 : vector<16x32xf32> to vector<4x4x32xf32>
    %162 = vector.broadcast %160 : vector<4x4x1xf32> to vector<4x4x32xf32>
    %163 = arith.mulf %162, %161 : vector<4x4x32xf32>
    %cst_54 = arith.constant dense<0.000000e+00> : vector<4x32xf32>
    %164 = vector.multi_reduction <add>, %163, %cst_54 [1] : vector<4x4x32xf32> to vector<4x32xf32>
    %165 = arith.truncf %164 : vector<4x32xf32> to vector<4x32xbf16>
    %c112 = arith.constant 112 : index
    %c0_55 = arith.constant 0 : index
    %166 = vector.load %arg4[%c112, %c0_55] : memref<176x128xbf16, #tpu.memory_space<vmem>>, vector<32x32xbf16>
    %cst_56 = arith.constant dense<0.000000e+00> : vector<4x32xf32>
    %167 = tpu.matmul %165, %166, %cst_56 {dimension_numbers = #tpu.dot_dimension_numbers<[1], [0], [0], [1], [0, 0, 1, 1], [], []>} : vector<4x32xbf16>, vector<32x32xbf16>, vector<4x32xf32> -> vector<4x32xf32>
    %c6 = arith.constant 6 : index
    %c0_57 = arith.constant 0 : index
    %168 = vector.load %arg5[%c6, %c0_57] : memref<8x128xf32, #tpu.memory_space<vmem>>, vector<1x32xf32>
    %169 = vector.shape_cast %168 : vector<1x32xf32> to vector<32xf32>
    %170 = vector.shape_cast %169 : vector<32xf32> to vector<1x32xf32>
    %171 = vector.broadcast %170 : vector<1x32xf32> to vector<4x32xf32>
    %172 = arith.addf %167, %171 : vector<4x32xf32>
    %cst_58 = arith.constant 0.000000e+00 : f32
    %173 = vector.broadcast %cst_58 : f32 to vector<4x32xf32>
    %174 = arith.maximumf %172, %173 : vector<4x32xf32>
    %175 = arith.truncf %174 : vector<4x32xf32> to vector<4x32xbf16>
    %c144 = arith.constant 144 : index
    %c0_59 = arith.constant 0 : index
    %176 = vector.load %arg4[%c144, %c0_59] : memref<176x128xbf16, #tpu.memory_space<vmem>>, vector<32x128xbf16>
    %cst_60 = arith.constant dense<0.000000e+00> : vector<4x128xf32>
    %177 = tpu.matmul %175, %176, %cst_60 {dimension_numbers = #tpu.dot_dimension_numbers<[1], [0], [0], [1], [0, 0, 1, 1], [], []>} : vector<4x32xbf16>, vector<32x128xbf16>, vector<4x128xf32> -> vector<4x128xf32>
    %c7 = arith.constant 7 : index
    %c0_61 = arith.constant 0 : index
    %178 = vector.load %arg5[%c7, %c0_61] : memref<8x128xf32, #tpu.memory_space<vmem>>, vector<1x128xf32>
    %179 = vector.shape_cast %178 : vector<1x128xf32> to vector<128xf32>
    %180 = vector.shape_cast %179 : vector<128xf32> to vector<1x128xf32>
    %181 = vector.broadcast %180 : vector<1x128xf32> to vector<4x128xf32>
    %182 = arith.addf %177, %181 : vector<4x128xf32>
    %c0_62 = arith.constant 0 : index
    %c0_63 = arith.constant 0 : index
    %c0_64 = arith.constant 0 : index
    %183 = vector.load %arg6[%c0_62, %c0_63, %c0_64] : memref<1x4x128xf32, #tpu.memory_space<vmem>>, vector<1x4x128xf32>
    %184 = vector.shape_cast %183 : vector<1x4x128xf32> to vector<4x128xf32>
    %185 = vector.shape_cast %182 : vector<4x128xf32> to vector<1x4x128xf32>
    tpu.vector_store %arg6[%c0_62, %c0_63, %c0_64], %185 {strides = array<i32>} : memref<1x4x128xf32, #tpu.memory_space<vmem>>, vector<1x4x128xf32>,
    return
  }
  func.func @transform_0(%arg0: i32) -> (i32, i32, i32) {
    %c0_i32 = arith.constant 0 : i32
    %c0_i32_0 = arith.constant 0 : i32
    %c0_i32_1 = arith.constant 0 : i32
    return %arg0, %c0_i32, %c0_i32_0 : i32, i32, i32
  }
  func.func @transform_1(%arg0: i32) -> (i32, i32, i32) {
    %c0_i32 = arith.constant 0 : i32
    %c0_i32_0 = arith.constant 0 : i32
    %c0_i32_1 = arith.constant 0 : i32
    return %arg0, %c0_i32, %c0_i32_0 : i32, i32, i32
  }
  func.func @transform_2(%arg0: i32) -> (i32, i32, i32) {
    %c0_i32 = arith.constant 0 : i32
    %c0_i32_0 = arith.constant 0 : i32
    %c0_i32_1 = arith.constant 0 : i32
    return %arg0, %c0_i32, %c0_i32_0 : i32, i32, i32
  }
  func.func @transform_3(%arg0: i32) -> (i32, i32) {
    %c0_i32 = arith.constant 0 : i32
    %c0_i32_0 = arith.constant 0 : i32
    %c0_i32_1 = arith.constant 0 : i32
    return %c0_i32, %c0_i32_0 : i32, i32
  }
  func.func @transform_4(%arg0: i32) -> (i32, i32) {
    %c0_i32 = arith.constant 0 : i32
    %c0_i32_0 = arith.constant 0 : i32
    %c0_i32_1 = arith.constant 0 : i32
    return %c0_i32, %c0_i32_0 : i32, i32
  }
  func.func @transform_5(%arg0: i32) -> (i32, i32, i32) {
    %c0_i32 = arith.constant 0 : i32
    %c0_i32_0 = arith.constant 0 : i32
    %c0_i32_1 = arith.constant 0 : i32
    return %arg0, %c0_i32, %c0_i32_0 : i32, i32, i32
  }
}

</mosaic_0001>

<bundles_post_ra>
// kernel: tpu_custom_call.1
= control target key start
LH: loop header
LB: loop body
LE: loop exit
PB: predicated region body
PF: predicated region fallthrough
CT: control target
= control target key end

     0   :  { %10 = vsyncpa [#allocation3], 0  ;;  %s5475_s0 = inlined_call_operand.vmem [shape: bf16[2,128,16], index: 0, kind: input, shape index: {}]   ;;  %s5476_s1 = inlined_call_operand.vmem [shape: bf16[2,128,128], index: 1, kind: input, shape index: {}]   ;;  %s5477_s2 = inlined_call_operand.hbm [shape: f32[2,16,16], index: 2, kind: input, shape index: {}]   ;;  %s5478_s3 = inlined_call_operand.hbm [shape: bf16[176,128], index: 3, kind: input, shape index: {}]   ;;  %s5479_s4 = inlined_call_operand.vmem [shape: f32[8,128], index: 4, kind: input, shape index: {}]   ;;  %s5480_s5 = inlined_call_operand.hbm [shape: f32[2,4,128], index: 5, kind: output, shape index: {}]  }
   0x1   :  { %12 = vsyncpa [#allocation3 + $0x1], 0 }
   0x2   :  { %13 = vsyncpa [#allocation6], 0 }
   0x3   :  { %14 = vsyncpa [#allocation4], 0 }
   0x4   :  { %16 = vsyncpa [#allocation4 + $0x1], 0  ;;  %s4214_s18 = smov 0   ;;  %s4216_s19 = smov 0  }
   0x5   :  { %s4218_s20 = smov 0   ;;  %s4220_s21 = smov 0  }
   0x6 LB: > { %s4235_s22 = sadd.s32 4294967295, %s4167_s21   ;;  %s3238_s23 = sadd.s32 4294967294, %s4167_s21   ;;  %s4167_s21 = sphi %s4220_s21, %s5544_s21   ;;  %s4163_s20 = sphi %s4218_s20, %s5543_s20   ;;  %s4159_s19 = sphi %s4216_s19, %s5542_s19   ;;  %s4155_s18 = sphi %s4214_s18, %s5541_s18  }
   0x7   : > { %p94_p0 = scmp.ne.s32.totalorder %s4159_s19, %s4155_s18  ;;  %p5481_p1 = scmp.eq.s32.totalorder %s4235_s22, 0 }
   0x8   : > { %p166_p3 = scmp.eq.s32.totalorder %s3238_s23, 1  ;;  %p3239_p5 = scmp.ge.s32.totalorder %s4167_s21, 1 }
   0x9   : > { %p4244_p4 = por %p5481_p1, %p94_p0  ;;  %p173_p7 = scmp.lt.s32.totalorder %s4167_s21, 3 }
   0xa   : > { %p4249_p6 = por %p166_p3, %p94_p0  ;;  %s4169_s27 = smov [#allocation5]  }
   0xb   : > { %s5489_s24 = scalar_select %p4244_p4, 1, 0 }
   0xc   : > { %s5490_s25 = scalar_select %p4249_p6, 1, 0 }
   0xd   : > { %p4254_p8 = pnand %p3239_p5, %p173_p7  ;;  %s185_s28 = sshll.u32 %s4169_s27, 4  ;;  %s186_s28 = int_to_ptr.vmem [resolvable:$true] %s185_s28 }
   0xe   : > { %s4268_s30 = sadd.s32 1, %s4167_s21   ;;  %s81_s6 = sadd.s32 1, %s4163_s20 }
   0xf   : > { %s5491_s26 = scalar_select %p4254_p8, 1, 0 }
  0x10   : > { %p3712_p9 = pneg %p4254_p8  ;;  %s78_s7 = ssub.s32 %s4167_s21, %s4268_s30 }
  0x11   : > { %s4056_s8 = scalar_lea.vmem %s186_s28, 1408  ;;  %p4064_p5 = scmp.lt.s32.totalorder %s186_s28, %s186_s28 }
  0x12   : > { %p4263_p11 = pnand %p3712_p9, %p5481_p1  ;;  %p4057_p13 = scmp.ne.s32.totalorder %s186_s28, %s4056_s8 }
  0x13   : > { %p4065_p7 = scmp.lt.s32.totalorder %s4056_s8, %s4056_s8 }
  0x14   : > { %p4047_p12 = pneg %p4263_p11 }
  0x15   : > { %p4066_p10 = por %p4065_p7, %p4064_p5 }
  0x16   : > { %p4059_p0 = pnand %p4057_p13, %p4047_p12 }
  0x18   : > { %p4060_p3 = pneg %p4059_p0 }
  0x1a   : > { %p4067_p2 = pnand %p4066_p10, %p4060_p3 }
  0x1c   : > { %4070 = shalt.err (!%p4067_p2)
}
  0x1d   : > { %s4170_s9 = smov 64   ;;  %s4171_s10 = smov 4  }
  0x1e   : > { %3715 = dma.hbm_to_vmem [thread:$0]  (!%p4263_p11), %s5478_s3, 1408, %s186_s28, [#allocation6], %s4170_s9, %s4170_s9, %s4171_s10  }
  0x1f   : > { %p79_p9 = scmp.eq.s32.totalorder %s78_s7, 0  ;;  %p88_p12 = scmp.ne.s32.totalorder %s4163_s20, %s4159_s19 }
  0x20   : > { %p89_p10 = scmp.eq.s32.totalorder %s4167_s21, 0  ;;  %p3725_p2 = scmp.lt.s32.totalorder %s4167_s21, 2 }
  0x21   : > { %s4285_s13 = scalar_select %p79_p9, %s4163_s20, %s81_s6  }
  0x22   : > { %p90_p13 = por %p89_p10, %p88_p12  ;;  %p5493_p0 = scmp.eq.s32.totalorder %s4235_s22, 1 }
  0x23   : > { %s218_s15 = sand.u32 1, %s4163_s20   ;;  %s3360_s16 = sshll.u32 %s4167_s21, 8 }
  0x24   : > { %p4289_p3 = por %p5493_p0, %p88_p12  ;;  %s3242_s17 = sshll.u32 %s218_s15, 4 }
  0x25   : > { %s4298_s29 = scalar_lea.hbm %s5477_s2, %s3360_s16  ;;  %s222_s28 = scalar_lea.vmem [#allocation2], %s3242_s17 }
  0x26   : > { %s5494_s14 = scalar_select %p4289_p3, 1, 0 }
  0x27   : > { %s229_s6 = sshll.u32 %s222_s28, 4  ;;  %p4300_p11 = pnand %p3725_p2, %p90_p13  ;;  %s4304_s6 = int_to_ptr.vmem [resolvable:$true] %s229_s6 }
  0x28   : > { %s4306_s8 = scalar_lea.sflag [#allocation3], %s218_s15  ;;  %s4071_s9 = scalar_lea.hbm %s4298_s29, 256 }
  0x29   : > { %p4072_p5 = scmp.ne.s32.totalorder %s4298_s29, %s4071_s9  ;;  %p4073_p7 = pneg %p4300_p11 }
  0x2a   : > { %s4076_s12 = scalar_lea.hbm %s5477_s2, 512  ;;  %p4077_p10 = scmp.lt.s32.totalorder %s4298_s29, %s5477_s2 }
  0x2b   : > { %p4074_p9 = pnand %p4073_p7, %p4072_p5  ;;  %p4078_p2 = scmp.lt.s32.totalorder %s4076_s12, %s4071_s9 }
  0x2d   : > { %p4075_p12 = pneg %p4074_p9  ;;  %p4079_p13 = por %p4078_p2, %p4077_p10 }
  0x2f   : > { %p4080_p0 = pnand %p4079_p13, %p4075_p12 }
  0x31   : > { %4083 = shalt.err (!%p4080_p0)
}
  0x32   : > { %s4084_s15 = scalar_lea.vmem %s4304_s6, 256  ;;  %s4172_s23 = smov [#allocation2]  }
  0x33   : > { %p4085_p1 = scmp.ne.s32.totalorder %s4304_s6, %s4084_s15  ;;  %s4089_s27 = sshll.u32 %s4172_s23, 4  ;;  %s4090_s27 = int_to_ptr.vmem [resolvable:$false] %s4089_s27 }
  0x34   : > { %s4091_s28 = scalar_lea.vmem %s4090_s27, 512  ;;  %p4092_p9 = scmp.lt.s32.totalorder %s4304_s6, %s4090_s27 }
  0x35   : > { %p4087_p6 = pnand %p4085_p1, %p4073_p7  ;;  %p4093_p3 = scmp.lt.s32.totalorder %s4091_s28, %s4084_s15 }
  0x37   : > { %p4088_p5 = pneg %p4087_p6  ;;  %p4094_p4 = por %p4093_p3, %p4092_p9 }
  0x39   : > { %p4095_p8 = pnand %p4094_p4, %p4088_p5 }
  0x3b   : > { %4098 = shalt.err (!%p4095_p8)
}
  0x3c   : > { %s4173_s9 = smov 128   ;;  %s4174_s10 = smov 8  }
  0x3d   : > { %3719 = dma.hbm_to_vmem [thread:$0]  (!%p4300_p11), %s4298_s29, 256, %s4304_s6, %s4306_s8, %s4173_s9, %s4173_s9, %s4174_s10  }
  0x3e   : > { %p5496_p1 = scmp.ne.s32.totalorder %s5491_s26, 0 }
  0x3f   : > { %s4330_s11 = sand.u32 (!%p5496_p1), 1, %s4159_s19   ;;  %p5497_p4 = scmp.ne.s32.totalorder (!%p5496_p1), %s5489_s24, 0 }
  0x40   : > { %241 = sbr.rel (%p5496_p1) target bundleno = 3512 (0xdb8), region = 40  ;;  %s3246_s12 = sshll.u32 (!%p5496_p1), %s4330_s11, 4 }
  0x41   : > { %s244_s16 = scalar_lea.sflag (!%p5496_p1), [#allocation3], %s4330_s11  ;;  %s4334_s17 = scalar_lea.vmem (!%p5496_p1), [#allocation2], %s3246_s12 }
  0x45   : > { %4142 = dma.done.wait (%p5497_p4), %s244_s16, 256  }
  0x46   : > { %4144 = vsyncadd (%p5497_p4), %s244_s16, 4294967040  ;;  %p5498_p6 = scmp.eq.s32.totalorder %s4235_s22, 0 }
  0x48   : > { %4146 = dma.done.wait (%p5498_p6), [#allocation6], 1408   ;;  %p5499_p8 = pmov %p5498_p6 }
  0x49   : > { %p288_p3 = scmp.lt.s32.totalorder %s4235_s22, 1  ;;  %v3794_v0 = vld [vmem:[#allocation5] sm:$0xff]   ;;  %vm5487_vm0 = vcmask 130048   ;;  %v3811_v12 = vld [vmem:[#allocation5 + $0x8] sm:$0xff]   ;;  %v4175_v58 = vmov 0.0   ;;  %vm5485_vm1 = vmmov 0  }
  0x4a   : > { %4148 = vsyncadd (%p5499_p8), [#allocation6], 4294965888  ;;  %3474 = vmatprep.subr.bf16.mxu0 %v3794_v0  ;;  %v3270_v61 = vld [vmem:[%s5479_s4] ss:$0 sm:$0xff]  ;;  %s4177_s12 = smov 120   ;;  %s3248_s9 = sshll.u32 %s4330_s11, 2 }
  0x4b   : > { %s289_s26 = scalar_select %p288_p3, %s4235_s22, 1  ;;  %3475 = vmatpush3.bf16.msra.mxu0 %v3794_v0 }
  0x4c   : > { %3524 = vmatprep.subr.bf16.mxu0 %v3811_v12  ;;  %s3357_s16 = sshll.u32 %s4235_s22, 6  ;;  %p5538_p7 = scmp.ne.s32.totalorder %s5494_s14, 0 }
  0x4d   : > { %s3361_s29 = sshll.u32 %s289_s26, 6  ;;  %s4180_s26 = smov 8  }
  0x4e   : > { %s292_s8 = scalar_lea.vmem %s5475_s0, %s3361_s29  ;;  %s4360_s23 = scalar_lea.vmem %s5476_s1, %s3361_s29 }
  0x4f   : > { %v3795_v1 = vld [vmem:[%s292_s8] sm:$0xff]   ;;  %v3796_v2 = vld [vmem:[%s292_s8 + $0x8] sm:$0xff]   ;;  %v3797_v3 = vld [vmem:[%s292_s8 + $0x10] sm:$0xff]   ;;  %s4181_s29 = smov 16   ;;  %s5432_s7 = scalar_lea.hbm %s5480_s5, %s3357_s16 }
  0x50   : > { %3476 = vmatprep.mubr.msk.bf16.mxu0 %vm5487_vm0, %v3795_v1  ;;  %v3798_v4 = vld [vmem:[%s292_s8 + $0x18] sm:$0xff]   ;;  %v3799_v5 = vld [vmem:[%s292_s8 + $0x20] sm:$0xff]   ;;  %v3800_v6 = vld [vmem:[%s292_s8 + $0x28] sm:$0xff]   ;;  %s4183_s22 = smov [#allocation7]  }
  0x51   : > { %3477 = vmatmul.mubr.msk.bf16.vlgmr.msra.gmra.mxu0 %vm5487_vm0, %v3796_v2  ;;  %v3801_v7 = vld [vmem:[%s292_s8 + $0x30] sm:$0xff]   ;;  %v3802_v8 = vld [vmem:[%s292_s8 + $0x38] sm:$0xff]   ;;  %v301_v9 = vld [vmem:[%s4360_s23] sm:$0xf]  ;;  %s3121_s8 = scalar_lea.sflag [#allocation4], %s4330_s11  ;;  %s4103_s15 = sshll.u32 %s4183_s22, 4  ;;  %s4104_s15 = int_to_ptr.vmem [resolvable:$false] %s4103_s15 }
  0x52   : > { %3480 = vmatprep.mubr.msk.bf16.mxu0 %vm5487_vm0, %v3797_v3  ;;  %v302_v10 = vld [vmem:[%s4360_s23 + $0x4] sm:$0xf]  ;;  %3525 = vmatpush3.bf16.msra.mxu0 %v3811_v12  ;;  %v4368_v37 = vld [vmem:[%s4360_s23 + $0x8] sm:$0xf]  ;;  %v4371_v38 = vld [vmem:[%s4360_s23 + $0xc] sm:$0xf] }
  0x53   : > { %v4364_v11 = vcombine.low %v301_v9, %v302_v10  ;;  %v4374_v39 = vld [vmem:[%s4360_s23 + $0x10] sm:$0xf]  ;;  %v306_v40 = vld [vmem:[%s4360_s23 + $0x14] sm:$0xf]  ;;  %v4379_v41 = vcombine.low %v4368_v37, %v4371_v38  ;;  %v4387_v43 = vld [vmem:[%s4360_s23 + $0x18] sm:$0xf]  ;;  %3574 = vmatprep.subr.bf16.mxu0 %v4175_v58 }
  0x54   : > { %v4382_v42 = vcombine.low %v4374_v39, %v306_v40  ;;  %v308_v44 = vld [vmem:[%s4360_s23 + $0x1c] sm:$0xf]  ;;  %v309_v45 = vld [vmem:[%s4360_s23 + $0x20] sm:$0xf]  ;;  %v310_v46 = vld [vmem:[%s4360_s23 + $0x24] sm:$0xf] }
  0x55   : > { %3508 = vmatprep.mubr.bf16.mxu1 %v4364_v11  ;;  %v4393_v47 = vcombine.low %v4387_v43, %v308_v44  ;;  %v4395_v48 = vcombine.low %v309_v45, %v310_v46  ;;  %v311_v49 = vld [vmem:[%s4360_s23 + $0x28] sm:$0xf]  ;;  %v312_v50 = vld [vmem:[%s4360_s23 + $0x2c] sm:$0xf]  ;;  %v313_v51 = vld [vmem:[%s4360_s23 + $0x30] sm:$0xf] }
  0x56   : > { %v314_v52 = vld [vmem:[%s4360_s23 + $0x34] sm:$0xf]  ;;  %v4403_v53 = vcombine.low %v311_v49, %v312_v50  ;;  %v315_v55 = vld [vmem:[%s4360_s23 + $0x38] sm:$0xf]  ;;  %v316_v56 = vld [vmem:[%s4360_s23 + $0x3c] sm:$0xf] }
  0x57   : > { %v4405_v54 = vcombine.low %v313_v51, %v314_v52  ;;  %v4411_v57 = vcombine.low %v315_v55, %v316_v56  ;;  %vm319_vm3 = vcmp.gt.bf16.partialorder %v4368_v37, 0  ;;  %vm320_vm4 = vcmp.gt.bf16.partialorder %v4371_v38, 0 }
  0x58   : > { %vm323_vm5 = vcmp.gt.bf16.partialorder %v4387_v43, 0  ;;  %vm321_vm8 = vcmp.gt.bf16.partialorder %v4374_v39, 0 }
  0x59   : > { %3481 = vmatmul.mubr.msk.bf16.gmra.mxu0 %vm5487_vm0, %v3798_v4 }
  0x5a   : > { %3484 = vmatprep.mubr.msk.bf16.mxu0 %vm5487_vm0, %v3799_v5 }
  0x61   : > { %3485 = vmatmul.mubr.msk.bf16.gmra.mxu0 %vm5487_vm0, %v3800_v6 }
  0x62   : > { %3488 = vmatprep.mubr.msk.bf16.mxu0 %vm5487_vm0, %v3801_v7 }
  0x69   : > { %3489 = vmatmul.mubr.msk.bf16.gmra.mxu0 %vm5487_vm0, %v3802_v8 }
 0x111   : > { %v3478_v13 = vpop.f32.mrf.mxu0 }
 0x113   : > { %v456_v14 = vpop.f32.mrf.mxu0 }
 0x115   : > { %v3479_v15 = vpop.f32.mrf.mxu0 }
 0x116   : > { %v520_v35 = vpack.c.bf16 %v3479_v15, %v3478_v13 }
 0x117   : > { %v459_v16 = vpop.f32.mrf.mxu0 }
 0x118   : > { %v519_v36 = vpack.c.bf16 %v459_v16, %v456_v14 }
 0x119   : > { %v3482_v17 = vpop.f32.mrf.mxu0 }
 0x11b   : > { %v472_v18 = vpop.f32.mrf.mxu0 }
 0x11d   : > { %v3483_v19 = vpop.f32.mrf.mxu0 }
 0x11e   : > { %v522_v33 = vpack.c.bf16 %v3483_v19, %v3482_v17 }
 0x11f   : > { %v475_v20 = vpop.f32.mrf.mxu0 }
 0x120   : > { %v521_v34 = vpack.c.bf16 %v475_v20, %v472_v18 }
 0x121   : > { %v3486_v21 = vpop.f32.mrf.mxu0 }
 0x123   : > { %v488_v22 = vpop.f32.mrf.mxu0 }
 0x125   : > { %v3487_v23 = vpop.f32.mrf.mxu0 }
 0x126   : > { %v524_v31 = vpack.c.bf16 %v3487_v23, %v3486_v21 }
 0x127   : > { %v491_v24 = vpop.f32.mrf.mxu0 }
 0x128   : > { %v523_v32 = vpack.c.bf16 %v491_v24, %v488_v22 }
 0x129   : > { %v3490_v25 = vpop.f32.mrf.mxu0 }
 0x12b   : > { %v504_v26 = vpop.f32.mrf.mxu0 }
 0x12d   : > { %v3491_v27 = vpop.f32.mrf.mxu0 }
 0x12e   : > { %v526_v28 = vpack.c.bf16 %v3491_v27, %v3490_v25 }
 0x12f   : > { %v507_v29 = vpop.f32.mrf.mxu0 }
 0x130   : > { %v525_v30 = vpack.c.bf16 %v507_v29, %v504_v26  ;;  %3492 = vmatprep.subr.bf16.mxu1 %v526_v28 }
 0x131   : > { %3493 = vmatpush3.bf16.msra.mxu1 %v526_v28 }
 0x132   : > { %3494 = vmatprep.subr.bf16.mxu1 %v525_v30 }
 0x135   : > { %3495 = vmatpush3.bf16.msra.mxu1 %v525_v30 }
 0x136   : > { %3496 = vmatprep.subr.bf16.mxu1 %v524_v31 }
 0x139   : > { %3497 = vmatpush3.bf16.msra.mxu1 %v524_v31 }
 0x13a   : > { %3498 = vmatprep.subr.bf16.mxu1 %v523_v32 }
 0x13d   : > { %3499 = vmatpush3.bf16.msra.mxu1 %v523_v32 }
 0x13e   : > { %3500 = vmatprep.subr.bf16.mxu1 %v522_v33 }
 0x141   : > { %3501 = vmatpush3.bf16.msra.mxu1 %v522_v33 }
 0x142   : > { %3502 = vmatprep.subr.bf16.mxu1 %v521_v34 }
 0x145   : > { %3503 = vmatpush3.bf16.msra.mxu1 %v521_v34 }
 0x146   : > { %3504 = vmatprep.subr.bf16.mxu1 %v520_v35 }
 0x149   : > { %3505 = vmatpush3.bf16.msra.mxu1 %v520_v35 }
 0x14a   : > { %3506 = vmatprep.subr.bf16.mxu1 %v519_v36 }
 0x14d   : > { %3507 = vmatpush3.bf16.msra.mxu1 %v519_v36 }
 0x150   : > { %3509 = vmatmul.mubr.bf16.vlgmr.msra.gmra.mxu1 %v4379_v41 }
 0x151   : > { %3512 = vmatprep.mubr.bf16.mxu1 %v4382_v42 }
 0x158   : > { %3513 = vmatmul.mubr.bf16.gmra.mxu1 %v4393_v47 }
 0x159   : > { %3516 = vmatprep.mubr.bf16.mxu1 %v4395_v48 }
 0x160   : > { %3517 = vmatmul.mubr.bf16.gmra.mxu1 %v4403_v53 }
 0x161   : > { %3520 = vmatprep.mubr.bf16.mxu1 %v4405_v54 }
 0x168   : > { %3521 = vmatmul.mubr.bf16.gmra.mxu1 %v4411_v57 }
 0x169   : > { %3558 = vmatprep.mubr.bf16.mxu1 %v4364_v11  ;;  %v3812_v11 = vld [vmem:[#allocation5 + $0x10] sm:$0xff]  }
 0x210   : > { %v3510_v59 = vpop.f32.mrf.mxu1 }
 0x211   : > { %v623_v1 = vadd.f32 %v3510_v59, %v3270_v61 }
 0x212   : > { %v614_v60 = vpop.f32.mrf.mxu1 }
 0x213   : > { %v615_v63 = vadd.f32 %v3270_v61, %v614_v60  ;;  %v679_v8 = vmax.f32 %v623_v1, 0.0 }
 0x214   : > { %v3511_v62 = vpop.f32.mrf.mxu1 }
 0x215   : > { %v626_v0 = vadd.f32 %v3511_v62, %v3270_v61  ;;  %v677_v6 = vmax.f32 %v615_v63, 0.0 }
 0x216   : > { %v617_v2 = vpop.f32.mrf.mxu1 }
 0x217   : > { %v618_v3 = vadd.f32 %v3270_v61, %v617_v2  ;;  %v680_v4 = vmax.f32 %v626_v0, 0.0  ;;  %v956_v2 = vld [vmem:[%s4334_s17] sm:$0xff] }
 0x218   : > { %v3514_v5 = vpop.f32.mrf.mxu1 }
 0x219   : > { %v678_v7 = vmax.f32 %v618_v3, 0.0  ;;  %v694_v12 = vpack.c.bf16 %v680_v4, %v679_v8  ;;  %v639_v16 = vadd.f32 %v3514_v5, %v3270_v61  ;;  %v957_v3 = vld [vmem:[%s4334_s17 + $0x8] sm:$0xff]  ;;  %s287_s17 = scalar_lea.vmem [#allocation7], %s3248_s9 }
 0x21a   : > { %v630_v9 = vpop.f32.mrf.mxu1  ;;  %v958_v4 = vpack.c.bf16 %v957_v3, %v956_v2 }
 0x21b   : > { %v693_v10 = vpack.c.bf16 %v678_v7, %v677_v6  ;;  %v631_v14 = vadd.f32 %v3270_v61, %v630_v9  ;;  %v683_v23 = vmax.f32 %v639_v16, 0.0 }
 0x21c   : > { %v3515_v13 = vpop.f32.mrf.mxu1 }
 0x21d   : > { %v642_v15 = vadd.f32 %v3515_v13, %v3270_v61  ;;  %3526 = vmatprep.mubr.msk.bf16.mxu0 %vm5487_vm0, %v693_v10  ;;  %v681_v21 = vmax.f32 %v631_v14, 0.0 }
 0x21e   : > { %v633_v17 = vpop.f32.mrf.mxu1  ;;  %3527 = vmatmul.mubr.msk.bf16.vlgmr.msra.gmra.mxu0 %vm5487_vm0, %v694_v12 }
 0x21f   : > { %v634_v18 = vadd.f32 %v3270_v61, %v633_v17  ;;  %3575 = vmatpush3.bf16.msra.mxu0 %v3812_v11  ;;  %v684_v19 = vmax.f32 %v642_v15, 0.0 }
 0x220   : > { %v3518_v20 = vpop.f32.mrf.mxu1 }
 0x221   : > { %v682_v22 = vmax.f32 %v634_v18, 0.0  ;;  %v696_v26 = vpack.c.bf16 %v684_v19, %v683_v23  ;;  %v655_v30 = vadd.f32 %v3518_v20, %v3270_v61 }
 0x222   : > { %v646_v24 = vpop.f32.mrf.mxu1 }
 0x223   : > { %v695_v25 = vpack.c.bf16 %v682_v22, %v681_v21  ;;  %v647_v28 = vadd.f32 %v3270_v61, %v646_v24  ;;  %v687_v40 = vmax.f32 %v655_v30, 0.0  ;;  %v3289_v21 = vld [vmem:[%s5479_s4 + $0x2] ss:$0 sm:$0xff] }
 0x224   : > { %v3519_v27 = vpop.f32.mrf.mxu1 }
 0x225   : > { %v658_v29 = vadd.f32 %v3519_v27, %v3270_v61  ;;  %3530 = vmatprep.mubr.msk.bf16.mxu0 %vm5487_vm0, %v695_v25  ;;  %v685_v35 = vmax.f32 %v647_v28, 0.0 }
 0x226   : > { %v649_v31 = vpop.f32.mrf.mxu1  ;;  %3531 = vmatmul.mubr.msk.bf16.gmra.mxu0 %vm5487_vm0, %v696_v26 }
 0x227   : > { %v650_v32 = vadd.f32 %v3270_v61, %v649_v31  ;;  %v688_v33 = vmax.f32 %v658_v29, 0.0 }
 0x228   : > { %v3522_v34 = vpop.f32.mrf.mxu1 }
 0x229   : > { %v686_v36 = vmax.f32 %v650_v32, 0.0  ;;  %v698_v46 = vpack.c.bf16 %v688_v33, %v687_v40  ;;  %v671_v52 = vadd.f32 %v3522_v34, %v3270_v61  ;;  %v1028_v40 = vlaneseq }
 0x22a   : > { %v662_v44 = vpop.f32.mrf.mxu1 }
 0x22b   : > { %v697_v45 = vpack.c.bf16 %v686_v36, %v685_v35  ;;  %v663_v50 = vadd.f32 %v3270_v61, %v662_v44  ;;  %v691_v63 = vmax.f32 %v671_v52, 0.0  ;;  %v4444_v44 = vshrl.u32 %v1028_v40, 7 }
 0x22c   : > { %v3523_v49 = vpop.f32.mrf.mxu1 }
 0x22d   : > { %v674_v51 = vadd.f32 %v3523_v49, %v3270_v61  ;;  %3534 = vmatprep.mubr.msk.bf16.mxu0 %vm5487_vm0, %v697_v45  ;;  %v689_v60 = vmax.f32 %v663_v50, 0.0  ;;  %v3813_v45 = vld [vmem:[#allocation5 + $0x18] sm:$0xff]   ;;  %v1072_v52 = vsub.s32 6, %v4444_v44 }
 0x22e   : > { %v665_v55 = vpop.f32.mrf.mxu1  ;;  %3535 = vmatmul.mubr.msk.bf16.gmra.mxu0 %vm5487_vm0, %v698_v46  ;;  %v1030_v46 = vsub.s32 0, %v4444_v44  ;;  %3580 = vmatprep.subr.bf16.mxu0 %v3813_v45 }
 0x22f   : > { %v666_v56 = vadd.f32 %v3270_v61, %v665_v55  ;;  %v692_v59 = vmax.f32 %v674_v51, 0.0  ;;  %v4454_v51 = vsub.s32 3, %v4444_v44 }
 0x231   : > { %v690_v62 = vmax.f32 %v666_v56, 0.0  ;;  %v700_v1 = vpack.c.bf16 %v692_v59, %v691_v63 }
 0x233   : > { %v699_v0 = vpack.c.bf16 %v690_v62, %v689_v60  ;;  %v1065_v62 = vsub.s32 5, %v4444_v44 }
 0x235   : > { %3538 = vmatprep.mubr.msk.bf16.mxu0 %vm5487_vm0, %v699_v0 }
 0x236   : > { %3539 = vmatmul.mubr.msk.bf16.gmra.mxu0 %vm5487_vm0, %v700_v1  ;;  %v1079_v1 = vsub.s32 7, %v4444_v44 }
 0x237   : > { %3576 = vmatprep.mubr.msk.bf16.mxu0 %vm5485_vm1, %v4175_v58 }
 0x23e   : > { %3577 = vmatmul.mubr.msk.bf16.vlgmr.msra.gmra.mxu0 %vm5487_vm0, %v958_v4 }
 0x23f   : > { %3581 = vmatpush3.bf16.msra.mxu0 %v3813_v45 }
 0x2de   : > { %v3528_v61 = vpop.f32.mrf.mxu0 }
 0x2e0   : > { %v767_v5 = vpop.f32.mrf.mxu0 }
 0x2e2   : > { %v3529_v6 = vpop.f32.mrf.mxu0 }
 0x2e3   : > { %v831_v35 = vpack.c.bf16 %v3529_v6, %v3528_v61 }
 0x2e4   : > { %v770_v7 = vpop.f32.mrf.mxu0 }
 0x2e5   : > { %v830_v36 = vpack.c.bf16 %v770_v7, %v767_v5  ;;  %v3814_v7 = vld [vmem:[#allocation5 + $0x20] sm:$0xff]  }
 0x2e6   : > { %v3532_v8 = vpop.f32.mrf.mxu0 }
 0x2e8   : > { %v783_v9 = vpop.f32.mrf.mxu0 }
 0x2ea   : > { %v3533_v10 = vpop.f32.mrf.mxu0 }
 0x2eb   : > { %v833_v33 = vpack.c.bf16 %v3533_v10, %v3532_v8 }
 0x2ec   : > { %v786_v11 = vpop.f32.mrf.mxu0 }
 0x2ed   : > { %v832_v34 = vpack.c.bf16 %v786_v11, %v783_v9 }
 0x2ee   : > { %v3536_v12 = vpop.f32.mrf.mxu0 }
 0x2f0   : > { %v799_v13 = vpop.f32.mrf.mxu0 }
 0x2f2   : > { %v3537_v14 = vpop.f32.mrf.mxu0 }
 0x2f3   : > { %v835_v26 = vpack.c.bf16 %v3537_v14, %v3536_v12 }
 0x2f4   : > { %v802_v15 = vpop.f32.mrf.mxu0 }
 0x2f5   : > { %v834_v31 = vpack.c.bf16 %v802_v15, %v799_v13  ;;  %v4465_v15 = vld [vmem:[%s5479_s4 + $0x1] ss:$0 sm:$0xff] }
 0x2f6   : > { %v3540_v16 = vpop.f32.mrf.mxu0 }
 0x2f8   : > { %v815_v17 = vpop.f32.mrf.mxu0 }
 0x2fa   : > { %v3541_v18 = vpop.f32.mrf.mxu0 }
 0x2fb   : > { %v837_v19 = vpack.c.bf16 %v3541_v18, %v3540_v16 }
 0x2fc   : > { %v818_v20 = vpop.f32.mrf.mxu0 }
 0x2fd   : > { %v836_v22 = vpack.c.bf16 %v818_v20, %v815_v17  ;;  %3542 = vmatprep.subr.bf16.mxu1 %v837_v19 }
 0x2fe   : > { %3543 = vmatpush3.bf16.msra.mxu1 %v837_v19  ;;  %v1009_v23 = vpop.f32.mrf.mxu0 }
 0x2ff   : > { %v1010_v24 = vadd.f32 %v3289_v21, %v1009_v23  ;;  %3544 = vmatprep.subr.bf16.mxu1 %v836_v22 }
 0x300   : > { %v3578_v25 = vpop.f32.mrf.mxu0 }
 0x301   : > { %v1016_v27 = vmax.f32 %v1010_v24, 0.0 }
 0x302   : > { %3545 = vmatpush3.bf16.msra.mxu1 %v836_v22  ;;  %v1012_v28 = vpop.f32.mrf.mxu0 }
 0x303   : > { %v1013_v29 = vadd.f32 %v3289_v21, %v1012_v28  ;;  %1020 = vrot.lane.b32.xlu0 %v1016_v27, %s4177_s12  ;;  %3546 = vmatprep.subr.bf16.mxu1 %v835_v26 }
 0x304   : > { %v3579_v30 = vpop.f32.mrf.mxu0 }
 0x305   : > { %v1017_v32 = vmax.f32 %v1013_v29, 0.0 }
 0x306   : > { %3547 = vmatpush3.bf16.msra.mxu1 %v835_v26 }
 0x307   : > { %1022 = vrot.lane.b32.xlu0 %v1017_v32, %s4177_s12  ;;  %3548 = vmatprep.subr.bf16.mxu1 %v834_v31 }
 0x30a   : > { %3549 = vmatpush3.bf16.msra.mxu1 %v834_v31 }
 0x30b   : > { %3550 = vmatprep.subr.bf16.mxu1 %v833_v33 }
 0x30e   : > { %3551 = vmatpush3.bf16.msra.mxu1 %v833_v33 }
 0x30f   : > { %3552 = vmatprep.subr.bf16.mxu1 %v832_v34 }
 0x312   : > { %3553 = vmatpush3.bf16.msra.mxu1 %v832_v34 }
 0x313   : > { %3554 = vmatprep.subr.bf16.mxu1 %v831_v35 }
 0x316   : > { %3555 = vmatpush3.bf16.msra.mxu1 %v831_v35 }
 0x317   : > { %3556 = vmatprep.subr.bf16.mxu1 %v830_v36 }
 0x31a   : > { %3557 = vmatpush3.bf16.msra.mxu1 %v830_v36 }
 0x31b   : > { %3598 = vmatprep.subr.bf16.mxu1 %v3814_v7 }
 0x31d   : > { %3559 = vmatmul.mubr.bf16.vlgmr.msra.gmra.mxu1 %v4379_v41  ;;  %v1044_v41 = vsub.s32 2, %v4444_v44 }
 0x31e   : > { %3562 = vmatprep.mubr.bf16.mxu1 %v4382_v42  ;;  %3599 = vmatpush3.bf16.msra.mxu1 %v3814_v7 }
 0x325   : > { %3563 = vmatmul.mubr.bf16.gmra.mxu1 %v4393_v47 }
 0x326   : > { %3566 = vmatprep.mubr.bf16.mxu1 %v4395_v48 }
 0x32d   : > { %3567 = vmatmul.mubr.bf16.gmra.mxu1 %v4403_v53  ;;  %v4449_v53 = vsub.s32 1, %v4444_v44 }
 0x32e   : > { %3570 = vmatprep.mubr.bf16.mxu1 %v4405_v54  ;;  %v1058_v54 = vsub.s32 4, %v4444_v44 }
 0x335   : > { %3571 = vmatmul.mubr.bf16.gmra.mxu1 %v4411_v57 }
 0x375   : > { %v1021_v49 = vpop.permute.xlu0 %1020 }
 0x376   : > { %v1026_v42 = vmul.f32 %v1021_v49, %v1016_v27 }
 0x378   : > { %v1031_v47 = vrot.slane %v1026_v42, %v1030_v46  ;;  %v1045_v48 = vrot.slane %v1026_v42, %v1044_v41  ;;  %v1038_v57 = vrot.slane %v1026_v42, %v4449_v53  ;;  %v1059_v50 = vrot.slane %v1026_v42, %v1058_v54 }
 0x379   : > { %v1023_v55 = vpop.permute.xlu0 %1022  ;;  %v1052_v59 = vrot.slane %v1026_v42, %v4454_v51  ;;  %v1073_v60 = vrot.slane %v1026_v42, %v1072_v52  ;;  %v1066_v63 = vrot.slane %v1026_v42, %v1065_v62  ;;  %v1080_v2 = vrot.slane %v1026_v42, %v1079_v1 }
 0x37a   : > { %1033 = vbcast.lane.b32.xlu1 %v1031_v47, 256  ;;  %1047 = vbcast.lane.b32.xlu0 %v1045_v48, 256  ;;  %v1027_v56 = vmul.f32 %v1023_v55, %v1017_v32 }
 0x37c   : > { %v1087_v0 = vrot.slane %v1027_v56, %v1030_v46  ;;  %v1101_v3 = vrot.slane %v1027_v56, %v1044_v41  ;;  %v1094_v4 = vrot.slane %v1027_v56, %v4449_v53  ;;  %v1115_v61 = vrot.slane %v1027_v56, %v1058_v54 }
 0x37d   : > { %v1108_v5 = vrot.slane %v1027_v56, %v4454_v51  ;;  %v1129_v6 = vrot.slane %v1027_v56, %v1072_v52  ;;  %v1122_v8 = vrot.slane %v1027_v56, %v1065_v62  ;;  %v1136_v9 = vrot.slane %v1027_v56, %v1079_v1 }
 0x37e   : > { %1040 = vbcast.lane.b32.xlu1 %v1038_v57, 256  ;;  %1061 = vbcast.lane.b32.xlu0 %v1059_v50, 256 }
 0x382   : > { %1054 = vbcast.lane.b32.xlu1 %v1052_v59, 256  ;;  %1075 = vbcast.lane.b32.xlu0 %v1073_v60, 256 }
 0x386   : > { %1068 = vbcast.lane.b32.xlu1 %v1066_v63, 256  ;;  %1089 = vbcast.lane.b32.xlu0 %v1087_v0, 256 }
 0x38a   : > { %1082 = vbcast.lane.b32.xlu1 %v1080_v2, 256  ;;  %1103 = vbcast.lane.b32.xlu0 %v1101_v3, 256 }
 0x38e   : > { %1096 = vbcast.lane.b32.xlu1 %v1094_v4, 256  ;;  %1117 = vbcast.lane.b32.xlu0 %v1115_v61, 256 }
 0x392   : > { %1110 = vbcast.lane.b32.xlu1 %v1108_v5, 256  ;;  %1131 = vbcast.lane.b32.xlu0 %v1129_v6, 256 }
 0x396   : > { %1124 = vbcast.lane.b32.xlu1 %v1122_v8, 256 }
 0x39a   : > { %1138 = vbcast.lane.b32.xlu1 %v1136_v9, 256 }
 0x3dd   : > { %v3560_v10 = vpop.f32.mrf.mxu1 }
 0x3de   : > { %v886_v21 = vadd.f32 %v3560_v10, %v4465_v15 }
 0x3df   : > { %v877_v11 = vpop.f32.mrf.mxu1 }
 0x3e0   : > { %v878_v17 = vadd.f32 %v4465_v15, %v877_v11  ;;  %v942_v29 = vmax.f32 %v886_v21, 0.0 }
 0x3e1   : > { %v3561_v12 = vpop.f32.mrf.mxu1 }
 0x3e2   : > { %v940_v24 = vmax.f32 %v878_v17, 0.0  ;;  %v889_v26 = vadd.f32 %v3561_v12, %v4465_v15 }
 0x3e3   : > { %v880_v13 = vpop.f32.mrf.mxu1 }
 0x3e4   : > { %v881_v19 = vadd.f32 %v4465_v15, %v880_v13  ;;  %v943_v40 = vmax.f32 %v889_v26, 0.0 }
 0x3e5   : > { %v3564_v14 = vpop.f32.mrf.mxu1 }
 0x3e6   : > { %v941_v27 = vmax.f32 %v881_v19, 0.0  ;;  %v902_v41 = vadd.f32 %v3564_v14, %v4465_v15 }
 0x3e7   : > { %v893_v16 = vpop.f32.mrf.mxu1 }
 0x3e8   : > { %v894_v33 = vadd.f32 %v4465_v15, %v893_v16  ;;  %v946_v59 = vmax.f32 %v902_v41, 0.0 }
 0x3e9   : > { %v3565_v18 = vpop.f32.mrf.mxu1 }
 0x3ea   : > { %v944_v48 = vmax.f32 %v894_v33, 0.0  ;;  %v905_v52 = vadd.f32 %v3565_v18, %v4465_v15 }
 0x3eb   : > { %v896_v20 = vpop.f32.mrf.mxu1 }
 0x3ec   : > { %v1034_v22 = vpop.permute.xlu1 %1033  ;;  %v1048_v23 = vpop.permute.xlu0 %1047  ;;  %v897_v35 = vadd.f32 %v4465_v15, %v896_v20  ;;  %v947_v4 = vmax.f32 %v905_v52, 0.0 }
 0x3ed   : > { %v3568_v25 = vpop.f32.mrf.mxu1  ;;  %v1140_v32 = vmul.f32 %v1034_v22, %v940_v24  ;;  %v1142_v47 = vmul.f32 %v1048_v23, %v942_v29 }
 0x3ee   : > { %v945_v54 = vmax.f32 %v897_v35, 0.0  ;;  %v918_v5 = vadd.f32 %v3568_v25, %v4465_v15 }
 0x3ef   : > { %v909_v28 = vpop.f32.mrf.mxu1 }
 0x3f0   : > { %v1041_v30 = vpop.permute.xlu1 %1040  ;;  %v1062_v31 = vpop.permute.xlu0 %1061  ;;  %v910_v0 = vadd.f32 %v4465_v15, %v909_v28  ;;  %v950_v18 = vmax.f32 %v918_v5, 0.0 }
 0x3f1   : > { %v1141_v34 = vmul.f32 %v1041_v30, %v941_v27  ;;  %v3569_v36 = vpop.f32.mrf.mxu1  ;;  %v1144_v63 = vmul.f32 %v1062_v31, %v944_v48 }
 0x3f2   : > { %v948_v8 = vmax.f32 %v910_v0, 0.0  ;;  %v921_v13 = vadd.f32 %v3569_v36, %v4465_v15 }
 0x3f3   : > { %v1156_v45 = vpack.c.bf16 %v1141_v34, %v1140_v32  ;;  %v912_v46 = vpop.f32.mrf.mxu1 }
 0x3f4   : > { %v1055_v49 = vpop.permute.xlu1 %1054  ;;  %v1076_v42 = vpop.permute.xlu0 %1075  ;;  %v913_v2 = vadd.f32 %v4465_v15, %v912_v46  ;;  %v951_v22 = vmax.f32 %v921_v13, 0.0 }
 0x3f5   : > { %v1143_v57 = vmul.f32 %v1055_v49, %v943_v40  ;;  %3582 = vmatprep.mubr.msk.bf16.mxu0 %vm5487_vm0, %v1156_v45  ;;  %v3572_v50 = vpop.f32.mrf.mxu1  ;;  %v1146_v7 = vmul.f32 %v1076_v42, %v946_v59 }
 0x3f6   : > { %v949_v9 = vmax.f32 %v913_v2, 0.0  ;;  %v934_v24 = vadd.f32 %v3572_v50, %v4465_v15 }
 0x3f7   : > { %v1157_v55 = vpack.c.bf16 %v1143_v57, %v1142_v47  ;;  %v925_v56 = vpop.f32.mrf.mxu1 }
 0x3f8   : > { %v1069_v60 = vpop.permute.xlu1 %1068  ;;  %v1090_v62 = vpop.permute.xlu0 %1089  ;;  %v926_v16 = vadd.f32 %v4465_v15, %v925_v56  ;;  %v954_v34 = vmax.f32 %v934_v24, 0.0 }
 0x3f9   : > { %v1145_v1 = vmul.f32 %v1069_v60, %v945_v54  ;;  %3583 = vmatmul.mubr.msk.bf16.vlgmr.msra.gmra.mxu0 %vm5487_vm0, %v1157_v55  ;;  %v3573_v3 = vpop.f32.mrf.mxu1  ;;  %v1148_v19 = vmul.f32 %v1090_v62, %v948_v8  ;;  %v4178_v8 = vmov 2  }
 0x3fa   : > { %v952_v25 = vmax.f32 %v926_v16, 0.0  ;;  %v937_v29 = vadd.f32 %v3573_v3, %v4465_v15  ;;  %3773 = vset.pattern.permute.xlu1 %v4178_v8 }
 0x3fb   : > { %v1158_v61 = vpack.c.bf16 %v1145_v1, %v1144_v63  ;;  %v928_v12 = vpop.f32.mrf.mxu1 }
 0x3fc   : > { %v1083_v6 = vpop.permute.xlu1 %1082  ;;  %v1104_v11 = vpop.permute.xlu0 %1103  ;;  %v929_v21 = vadd.f32 %v4465_v15, %v928_v12  ;;  %v955_v36 = vmax.f32 %v937_v29, 0.0 }
 0x3fd   : > { %v1147_v10 = vmul.f32 %v1083_v6, %v947_v4  ;;  %3586 = vmatprep.mubr.msk.bf16.mxu0 %vm5487_vm0, %v1158_v61  ;;  %v1150_v28 = vmul.f32 %v1104_v11, %v950_v18 }
 0x3fe   : > { %v953_v31 = vmax.f32 %v929_v21, 0.0 }
 0x3ff   : > { %v1159_v14 = vpack.c.bf16 %v1147_v10, %v1146_v7 }
 0x400   : > { %v1097_v17 = vpop.permute.xlu1 %1096  ;;  %v1118_v26 = vpop.permute.xlu0 %1117 }
 0x401   : > { %v1149_v20 = vmul.f32 %v1097_v17, %v949_v9  ;;  %3587 = vmatmul.mubr.msk.bf16.gmra.mxu0 %vm5487_vm0, %v1159_v14  ;;  %v1152_v35 = vmul.f32 %v1118_v26, %v952_v25  ;;  %v4179_v9 = vmov 0  }
 0x402   : > { %3774 = vset.pattern.permute.xlu0 %v4179_v9 }
 0x403   : > { %v1160_v23 = vpack.c.bf16 %v1149_v20, %v1148_v19 }
 0x404   : > { %v1111_v27 = vpop.permute.xlu1 %1110  ;;  %v1132_v45 = vpop.permute.xlu0 %1131 }
 0x405   : > { %v1151_v30 = vmul.f32 %v1111_v27, %v951_v22  ;;  %3590 = vmatprep.mubr.msk.bf16.mxu0 %vm5487_vm0, %v1160_v23  ;;  %v1154_v49 = vmul.f32 %v1132_v45, %v954_v34 }
 0x407   : > { %v1161_v32 = vpack.c.bf16 %v1151_v30, %v1150_v28 }
 0x408   : > { %v1125_v33 = vpop.permute.xlu1 %1124 }
 0x409   : > { %v1153_v40 = vmul.f32 %v1125_v33, %v953_v31  ;;  %3591 = vmatmul.mubr.msk.bf16.gmra.mxu0 %vm5487_vm0, %v1161_v32 }
 0x40b   : > { %v1162_v46 = vpack.c.bf16 %v1153_v40, %v1152_v35 }
 0x40c   : > { %v1139_v41 = vpop.permute.xlu1 %1138 }
 0x40d   : > { %v1155_v42 = vmul.f32 %v1139_v41, %v955_v36  ;;  %3594 = vmatprep.mubr.msk.bf16.mxu0 %vm5487_vm0, %v1162_v46 }
 0x40f   : > { %v1163_v15 = vpack.c.bf16 %v1155_v42, %v1154_v49 }
 0x411   : > { %3595 = vmatmul.mubr.msk.bf16.gmra.mxu0 %vm5487_vm0, %v1163_v15 }
 0x4b9   : > { %v3584_v47 = vpop.f32.mrf.mxu0 }
 0x4bb   : > { %v1230_v48 = vpop.f32.mrf.mxu0 }
 0x4bd   : > { %v3585_v54 = vpop.f32.mrf.mxu0 }
 0x4be   : > { %v4493_v52 = vpack.c.bf16 %v3585_v54, %v3584_v47 }
 0x4bf   : > { %v1233_v57 = vpop.f32.mrf.mxu0 }
 0x4c0   : > { %v4491_v50 = vpack.c.bf16 %v1233_v57, %v1230_v48 }
 0x4c1   : > { %v3588_v55 = vpop.f32.mrf.mxu0 }
 0x4c2   : > { %3600 = vmatprep.mubr.msk.bf16.mxu1 %vm5487_vm0, %v4491_v50 }
 0x4c3   : > { %v1246_v56 = vpop.f32.mrf.mxu0  ;;  %3601 = vmatmul.mubr.msk.bf16.vlgmr.msra.gmra.mxu1 %vm5487_vm0, %v4493_v52 }
 0x4c5   : > { %v3589_v59 = vpop.f32.mrf.mxu0 }
 0x4c6   : > { %v4501_v63 = vpack.c.bf16 %v3589_v59, %v3588_v55 }
 0x4c7   : > { %v1249_v60 = vpop.f32.mrf.mxu0 }
 0x4c8   : > { %v4499_v62 = vpack.c.bf16 %v1249_v60, %v1246_v56 }
 0x4c9   : > { %v3592_v0 = vpop.f32.mrf.mxu0 }
 0x4ca   : > { %3604 = vmatprep.mubr.msk.bf16.mxu1 %vm5487_vm0, %v4499_v62 }
 0x4cb   : > { %v1262_v1 = vpop.f32.mrf.mxu0  ;;  %3605 = vmatmul.mubr.msk.bf16.gmra.mxu1 %vm5487_vm0, %v4501_v63 }
 0x4cd   : > { %v3593_v2 = vpop.f32.mrf.mxu0 }
 0x4ce   : > { %v1298_v3 = vpack.c.bf16 %v3593_v2, %v3592_v0 }
 0x4cf   : > { %v1265_v4 = vpop.f32.mrf.mxu0 }
 0x4d0   : > { %v4507_v61 = vpack.c.bf16 %v1265_v4, %v1262_v1  ;;  %2337 = vrot.lane.b32.xlu1 %v1298_v3, %s4177_s12  ;;  %v4033_v1 = vld [vmem:[%s4360_s23] sm:$0xf] }
 0x4d1   : > { %v3596_v5 = vpop.f32.mrf.mxu0  ;;  %vm317_vm2 = vcmp.gt.bf16.partialorder %v4033_v1, 0 }
 0x4d2   : > { %3608 = vmatprep.mubr.msk.bf16.mxu1 %vm5487_vm0, %v4507_v61  ;;  %v1610_v4 = vsel %vm317_vm2, 65537, %v4179_v9 }
 0x4d3   : > { %v1278_v6 = vpop.f32.mrf.mxu0  ;;  %3609 = vmatmul.mubr.msk.bf16.gmra.mxu1 %vm5487_vm0, %v1298_v3 }
 0x4d5   : > { %v3597_v7 = vpop.f32.mrf.mxu0 }
 0x4d6   : > { %v1300_v10 = vpack.c.bf16 %v3597_v7, %v3596_v5  ;;  %v1612_v5 = vsel %vm319_vm3, 65537, %v4179_v9  ;;  %v1613_v7 = vsel %vm320_vm4, 65537, %v4179_v9 }
 0x4d7   : > { %v1281_v11 = vpop.f32.mrf.mxu0  ;;  %v1629_v38 = vunpack.c.l.b16 %v1613_v7  ;;  %v4036_v7 = vld [vmem:[%s4360_s23 + $0x28] sm:$0xf] }
 0x4d8   : > { %v1299_v12 = vpack.c.bf16 %v1281_v11, %v1278_v6  ;;  %2341 = vrot.lane.b32.xlu1 %v1300_v10, %s4177_s12  ;;  %3616 = vmatprep.subr.bf16.mxu0 %v1300_v10  ;;  %v1626_v6 = vunpack.c.l.b16 %v1610_v4 }
 0x4d9   : > { %3617 = vmatpush3.bf16.msra.mxu0 %v1300_v10  ;;  %vm4642_vm15 = vcmp.ne.s32.totalorder %v1629_v38, 0 }
 0x4da   : > { %2339 = vrot.lane.b32.xlu0 %v1299_v12, %s4177_s12  ;;  %3612 = vmatprep.mubr.msk.bf16.mxu1 %vm5487_vm0, %v1299_v12  ;;  %vm4607_vm6 = vcmp.ne.s32.totalorder %v1626_v6, 0 }
 0x4db   : > { %3618 = vmatprep.subr.bf16.mxu0 %v1299_v12  ;;  %3613 = vmatmul.mubr.msk.bf16.gmra.mxu1 %vm5487_vm0, %v1300_v10  ;;  %v1628_v10 = vunpack.c.l.b16 %v1612_v5 }
 0x4dd   : > { %3619 = vmatpush3.bf16.msra.mxu0 %v1299_v12  ;;  %vm4614_vm7 = vcmp.ne.s32.totalorder %v1628_v10, 0 }
 0x4de   : > { %3620 = vmatprep.subr.bf16.mxu0 %v1298_v3 }
 0x4e1   : > { %3621 = vmatpush3.bf16.msra.mxu0 %v1298_v3 }
 0x4e2   : > { %3622 = vmatprep.subr.bf16.mxu0 %v4507_v61 }
 0x4e5   : > { %3623 = vmatpush3.bf16.msra.mxu0 %v4507_v61 }
 0x4e6   : > { %3624 = vmatprep.subr.bf16.mxu0 %v4501_v63 }
 0x4e9   : > { %3625 = vmatpush3.bf16.msra.mxu0 %v4501_v63 }
 0x4ea   : > { %3626 = vmatprep.subr.bf16.mxu0 %v4499_v62 }
 0x4ed   : > { %3627 = vmatpush3.bf16.msra.mxu0 %v4499_v62 }
 0x4ee   : > { %3628 = vmatprep.subr.bf16.mxu0 %v4493_v52 }
 0x4f1   : > { %3629 = vmatpush3.bf16.msra.mxu0 %v4493_v52 }
 0x4f2   : > { %3630 = vmatprep.subr.bf16.mxu0 %v4491_v50 }
 0x4f5   : > { %3631 = vmatpush3.bf16.msra.mxu0 %v4491_v50 }
 0x4f6   : > { %3680 = vmatprep.subr.bf16.mxu0 %v4175_v58 }
 0x542   : > { %v2338_v13 = vpop.permute.xlu1 %2337 }
 0x54a   : > { %v2342_v14 = vpop.permute.xlu1 %2341 }
 0x54b   : > { %3648 = vmatprep.subr.bf16.mxu1 %v2342_v14 }
 0x54c   : > { %3649 = vmatpush3.bf16.msra.mxu1 %v2342_v14  ;;  %v2340_v16 = vpop.permute.xlu0 %2339 }
 0x54d   : > { %3650 = vmatprep.subr.bf16.mxu1 %v2340_v16 }
 0x550   : > { %3651 = vmatpush3.bf16.msra.mxu1 %v2340_v16 }
 0x551   : > { %3652 = vmatprep.subr.bf16.mxu1 %v2338_v13 }
 0x554   : > { %3653 = vmatpush3.bf16.msra.mxu1 %v2338_v13  ;;  %v1616_v13 = vsel %vm323_vm5, 65537, %v4179_v9  ;;  %vm327_vm5 = vcmp.gt.bf16.partialorder %v4036_v7, 0 }
 0x583   : > { %v4530_v17 = vpop.f32.mrf.mxu1 }
 0x584   : > { %2028 = vperm.xlu1 %3773, %v4530_v17   ;;  %1474 = vperm.xlu0 %3774, %v4530_v17  }
 0x585   : > { %v1367_v18 = vpop.f32.mrf.mxu1 }
 0x587   : > { %v3603_v19 = vpop.f32.mrf.mxu1 }
 0x588   : > { %3775 = vset.pattern.permute.xlu0 %v4178_v8 }
 0x589   : > { %v1370_v20 = vpop.f32.mrf.mxu1  ;;  %2020 = vperm.xlu0 %3775, %v1367_v18  }
 0x58a   : > { %2024 = vperm.xlu1 %3773, %v1370_v20  }
 0x58b   : > { %v4535_v21 = vpop.f32.mrf.mxu1 }
 0x58d   : > { %v1383_v22 = vpop.f32.mrf.mxu1  ;;  %3776 = vset.pattern.permute.xlu0 %v4179_v9 }
 0x58e   : > { %2044 = vperm.xlu1 %3773, %v4535_v21   ;;  %1464 = vperm.xlu0 %3776, %v1367_v18  }
 0x58f   : > { %v3607_v23 = vpop.f32.mrf.mxu1 }
 0x591   : > { %v1386_v24 = vpop.f32.mrf.mxu1 }
 0x592   : > { %2036 = vperm.xlu1 %3773, %v1383_v22   ;;  %3777 = vset.pattern.permute.xlu0 %v4178_v8 }
 0x593   : > { %v3610_v25 = vpop.f32.mrf.mxu1  ;;  %2032 = vperm.xlu0 %3777, %v3603_v19  }
 0x595   : > { %v1399_v26 = vpop.f32.mrf.mxu1 }
 0x596   : > { %2060 = vperm.xlu1 %3773, %v3610_v25  }
 0x597   : > { %3778 = vset.pattern.permute.xlu0 %v4179_v9  ;;  %v3611_v27 = vpop.f32.mrf.mxu1 }
 0x598   : > { %1479 = vperm.xlu0 %3778, %v3603_v19  }
 0x599   : > { %v1402_v28 = vpop.f32.mrf.mxu1 }
 0x59a   : > { %2052 = vperm.xlu1 %3773, %v1399_v26  }
 0x59b   : > { %v3614_v29 = vpop.f32.mrf.mxu1 }
 0x59c   : > { %1469 = vperm.xlu0 %3778, %v1370_v20  }
 0x59d   : > { %v1415_v30 = vpop.f32.mrf.mxu1 }
 0x59e   : > { %3786 = vset.pattern.permute.xlu1 %v4179_v9 }
 0x59f   : > { %1509 = vperm.xlu1 %3786, %v1402_v28   ;;  %v3615_v31 = vpop.f32.mrf.mxu1 }
 0x5a0   : > { %1494 = vperm.xlu0 %3778, %v4535_v21  }
 0x5a1   : > { %v1418_v32 = vpop.f32.mrf.mxu1 }
 0x5a3   : > { %3787 = vset.pattern.permute.xlu1 %v4178_v8 }
 0x5a4   : > { %1484 = vperm.xlu0 %3778, %v1383_v22   ;;  %2076 = vperm.xlu1 %3787, %v3614_v29  }
 0x5a8   : > { %3779 = vset.pattern.permute.xlu0 %v4178_v8  ;;  %2068 = vperm.xlu1 %3787, %v1415_v30  }
 0x5a9   : > { %2048 = vperm.xlu0 %3779, %v3607_v23  }
 0x5ac   : > { %3792 = vset.pattern.permute.xlu1 %v4179_v9 }
 0x5ad   : > { %3780 = vset.pattern.permute.xlu0 %v4179_v9  ;;  %1529 = vperm.xlu1 %3792, %v1418_v32  }
 0x5ae   : > { %1499 = vperm.xlu0 %3780, %v3607_v23  }
 0x5b2   : > { %3781 = vset.pattern.permute.xlu0 %v4178_v8 }
 0x5b3   : > { %2040 = vperm.xlu0 %3781, %v1386_v24  }
 0x5b7   : > { %3782 = vset.pattern.permute.xlu0 %v4179_v9 }
 0x5b8   : > { %1489 = vperm.xlu0 %3782, %v1386_v24  }
 0x5bc   : > { %1514 = vperm.xlu0 %3782, %v3610_v25  }
 0x5c0   : > { %1504 = vperm.xlu0 %3782, %v1399_v26  }
 0x5c4   : > { %3783 = vset.pattern.permute.xlu0 %v4178_v8 }
 0x5c5   : > { %2064 = vperm.xlu0 %3783, %v3611_v27  }
 0x5c9   : > { %3784 = vset.pattern.permute.xlu0 %v4179_v9 }
 0x5ca   : > { %1519 = vperm.xlu0 %3784, %v3611_v27  }
 0x5ce   : > { %3785 = vset.pattern.permute.xlu0 %v4178_v8 }
 0x5cf   : > { %2056 = vperm.xlu0 %3785, %v1402_v28  }
 0x5d3   : > { %3788 = vset.pattern.permute.xlu0 %v4179_v9 }
 0x5d4   : > { %1534 = vperm.xlu0 %3788, %v3614_v29  }
 0x5d6   : > { %1430 = vxpose.xlu1.b32.start [1/16] (narrow) %v1367_v18, 8 }
 0x5d8   : > { %1524 = vperm.xlu0 %3788, %v1415_v30  }
 0x5da   : > { %1431 = vxpose.xlu1.b32.cont [2/16] (narrow) %v1370_v20, 8 }
 0x5dc   : > { %3789 = vset.pattern.permute.xlu0 %v4178_v8 }
 0x5dd   : > { %2080 = vperm.xlu0 %3789, %v3615_v31  }
 0x5de   : > { %1432 = vxpose.xlu1.b32.cont [3/16] (narrow) %v4530_v17, 8 }
 0x5e1   : > { %3790 = vset.pattern.permute.xlu0 %v4179_v9 }
 0x5e2   : > { %1539 = vperm.xlu0 %3790, %v3615_v31   ;;  %1433 = vxpose.xlu1.b32.cont [4/16] (narrow) %v3603_v19, 8 }
 0x5e6   : > { %3791 = vset.pattern.permute.xlu0 %v4178_v8  ;;  %1434 = vxpose.xlu1.b32.cont [5/16] (narrow) %v1383_v22, 8 }
 0x5e7   : > { %2072 = vperm.xlu0 %3791, %v1418_v32  }
 0x5ea   : > { %1435 = vxpose.xlu1.b32.cont [6/16] (narrow) %v1386_v24, 8 }
 0x5eb   : > { %3793 = vset.pattern.permute.xlu0 %v4179_v9 }
 0x5ee   : > { %1436 = vxpose.xlu1.b32.cont [7/16] (narrow) %v4535_v21, 8 }
 0x5f2   : > { %1437 = vxpose.xlu1.b32.cont [8/16] (narrow) %v3607_v23, 8 }
 0x5f6   : > { %1438 = vxpose.xlu1.b32.cont [9/16] (narrow) %v1399_v26, 8 }
 0x5fa   : > { %1439 = vxpose.xlu1.b32.cont [10/16] (narrow) %v1402_v28, 8 }
 0x5fe   : > { %1440 = vxpose.xlu1.b32.cont [11/16] (narrow) %v3610_v25, 8 }
 0x5ff   : > { %v1475_v33 = vpop.permute.xlu0 %1474  ;;  %v2029_v36 = vpop.permute.xlu1 %2028 }
 0x602   : > { %1441 = vxpose.xlu1.b32.cont [12/16] (narrow) %v3611_v27, 8  ;;  %v4034_v27 = vld [vmem:[%s4360_s23 + $0x4] sm:$0xf] }
 0x603   : > { %vm318_vm13 = vcmp.gt.bf16.partialorder %v4034_v27, 0 }
 0x604   : > { %v2021_v34 = vpop.permute.xlu0 %2020 }
 0x605   : > { %v4559_v45 = vpop.permute.xlu1 %2024 }
 0x606   : > { %1442 = vxpose.xlu1.b32.cont [13/16] (narrow) %v1415_v30, 8  ;;  %v1614_v30 = vsel %vm321_vm8, 65537, %v4179_v9 }
 0x607   : > { %v1630_v5 = vunpack.c.l.b16 %v1614_v30 }
 0x609   : > { %v1465_v35 = vpop.permute.xlu0 %1464  ;;  %v4563_v41 = vpop.permute.xlu1 %2044 }
 0x60a   : > { %1443 = vxpose.xlu1.b32.cont [14/16] (narrow) %v1418_v32, 8 }
 0x60d   : > { %v4567_v42 = vpop.permute.xlu1 %2036 }
 0x60e   : > { %1444 = vxpose.xlu1.b32.cont [15/16] (narrow) %v3614_v29, 8  ;;  %v2033_v40 = vpop.permute.xlu0 %2032 }
 0x611   : > { %v4569_v47 = vpop.permute.xlu1 %2060 }
 0x612   : > { %1445 = vxpose.xlu1.b32.end [16/16] (narrow) %v3615_v31, 8  ;;  %v4035_v31 = vld [vmem:[%s4360_s23 + $0x14] sm:$0xf] }
 0x613   : > { %v4561_v46 = vpop.permute.xlu0 %1479  ;;  %vm322_vm14 = vcmp.gt.bf16.partialorder %v4035_v31, 0 }
 0x614   : > { %v1615_v6 = vsel %vm322_vm14, 65537, %v4179_v9 }
 0x615   : > { %v4573_v54 = vpop.permute.xlu1 %2052  ;;  %v1631_v18 = vunpack.c.l.b16 %v1615_v6 }
 0x617   : > { %v4565_v49 = vpop.permute.xlu0 %1469 }
 0x61a   : > { %v4577_v55 = vpop.permute.xlu1 %1509 }
 0x61b   : > { %v1495_v15 = vpop.permute.xlu0 %1494 }
 0x61f   : > { %v4571_v48 = vpop.permute.xlu0 %1484  ;;  %v4581_v59 = vpop.permute.xlu1 %2076 }
 0x623   : > { %v4585_v0 = vpop.permute.xlu1 %2068 }
 0x624   : > { %v4575_v57 = vpop.permute.xlu0 %2048 }
 0x628   : > { %v4591_v3 = vpop.permute.xlu1 %1529 }
 0x629   : > { %v4579_v56 = vpop.permute.xlu0 %1499 }
 0x62e   : > { %v4583_v60 = vpop.permute.xlu0 %2040 }
 0x633   : > { %v4589_v2 = vpop.permute.xlu0 %1489 }
 0x637   : > { %v4598_v11 = vpop.permute.xlu0 %1514 }
 0x63b   : > { %v4622_v24 = vpop.permute.xlu0 %1504 }
 0x652   : > { %v1446_v8 = vpop.trf.xlu1 }
 0x653   : > { %v4601_v37 = vrot.slane %v1446_v8, %v4449_v53  ;;  %v4604_v12 = vrot.slane %v1446_v8, %v4454_v51  ;;  %v1632_v51 = vunpack.c.l.b16 %v1616_v13  ;;  %v4661_v8 = vpop.permute.xlu0 %2064 }
 0x655   : > { %v2087_v43 = vadd.f32 %v4604_v12, %v2021_v34  ;;  %v1546_v16 = vadd.f32 %v4601_v37, %v1465_v35  ;;  %v2089_v17 = vadd.f32 %v4604_v12, %v2029_v36  ;;  %v1548_v53 = vadd.f32 %v4601_v37, %v1475_v33 }
 0x656   : > { %v2090_v20 = vadd.f32 %v4604_v12, %v2033_v40  ;;  %v1552_v23 = vadd.f32 %v4601_v37, %v1495_v15  ;;  %v1549_v35 = vadd.f32 %v4601_v37, %v4561_v46  ;;  %vm4646_vm4 = vcmp.ne.s32.totalorder %v1632_v51, 0 }
 0x657   : > { %vm2103_vm9 = vcmp.gt.f32.partialorder %v2087_v43, 0.0  ;;  %v2119_v19 = vmul.f32 0.2, %v2087_v43  ;;  %vm1562_vm10 = vcmp.gt.f32.partialorder %v1546_v16, 0.0  ;;  %v1578_v21 = vmul.f32 0.2, %v1546_v16  ;;  %v4695_v27 = vpop.permute.xlu0 %1519 }
 0x658   : > { %vm2105_vm11 = vcmp.gt.f32.partialorder %v2089_v17, 0.0  ;;  %v2121_v22 = vmul.f32 0.2, %v2089_v17  ;;  %vm1564_vm12 = vcmp.gt.f32.partialorder %v1548_v53, 0.0  ;;  %v1580_v26 = vmul.f32 0.2, %v1548_v53 }
 0x659   : > { %v2135_v25 = vsel %vm2103_vm9, %v2087_v43, %v2119_v19  ;;  %v1594_v29 = vsel %vm1562_vm10, %v1546_v16, %v1578_v21  ;;  %v2122_v34 = vmul.f32 0.2, %v2090_v20  ;;  %vm2106_vm2 = vcmp.gt.f32.partialorder %v2090_v20, 0.0  ;;  %v4037_v19 = vld [vmem:[%s4360_s23 + $0x20] sm:$0xf] }
 0x65a   : > { %v4627_v28 = vsel %vm4607_vm6, %v2135_v25, -9e+15  ;;  %v4636_v32 = vsel %vm4607_vm6, %v1594_v29, -9e+15  ;;  %v2137_v33 = vsel %vm2105_vm11, %v2089_v17, %v2121_v22  ;;  %v1596_v36 = vsel %vm1564_vm12, %v1548_v53, %v1580_v26 }
 0x65b   : > { %2167 = vmax.xlane.f32.xlu0 %v4627_v28  ;;  %1674 = vmax.xlane.f32.xlu1 %v4636_v32  ;;  %v1584_v40 = vmul.f32 0.2, %v1552_v23  ;;  %vm1568_vm3 = vcmp.gt.f32.partialorder %v1552_v23, 0.0  ;;  %v1550_v1 = vadd.f32 %v4601_v37, %v4571_v48  ;;  %v1611_v46 = vsel %vm318_vm13, 65537, %v4179_v9 }
 0x65c   : > { %v4656_v4 = vsel %vm4614_vm7, %v2137_v33, -9e+15  ;;  %v4666_v48 = vsel %vm4614_vm7, %v1596_v36, -9e+15  ;;  %v2138_v10 = vsel %vm2106_vm2, %v2090_v20, %v2122_v34  ;;  %v1581_v13 = vmul.f32 0.2, %v1549_v35 }
 0x65d   : > { %v2088_v38 = vadd.f32 %v4604_v12, %v4559_v45  ;;  %v1600_v14 = vsel %vm1568_vm3, %v1552_v23, %v1584_v40  ;;  %vm1565_vm6 = vcmp.gt.f32.partialorder %v1549_v35, 0.0  ;;  %v1582_v43 = vmul.f32 0.2, %v1550_v1 }
 0x65e   : > { %v2092_v16 = vadd.f32 %v4604_v12, %v4583_v60  ;;  %vm1566_vm8 = vcmp.gt.f32.partialorder %v1550_v1, 0.0  ;;  %v1627_v17 = vunpack.c.l.b16 %v1611_v46  ;;  %v4676_v53 = vsel %vm4642_vm15, %v2138_v10, -9e+15 }
 0x65f   : > { %2171 = vmax.xlane.f32.xlu0 %v4656_v4  ;;  %1678 = vmax.xlane.f32.xlu1 %v4666_v48  ;;  %vm4678_vm7 = vcmp.ne.s32.totalorder %v1630_v5, 0  ;;  %v1620_v45 = vsel %vm327_vm5, 65537, %v4179_v9  ;;  %vm325_vm9 = vcmp.gt.bf16.partialorder %v4037_v19, 0  ;;  %v4688_v60 = vsel %vm4646_vm4, %v1600_v14, -9e+15 }
 0x660   : > { %v1597_v20 = vsel %vm1565_vm6, %v1549_v35, %v1581_v13  ;;  %v2120_v21 = vmul.f32 0.2, %v2088_v38  ;;  %v1547_v22 = vadd.f32 %v4601_v37, %v4565_v49  ;;  %v1598_v23 = vsel %vm1566_vm8, %v1550_v1, %v1582_v43  ;;  %v4040_v13 = vld [vmem:[%s4360_s23 + $0x38] sm:$0xf] }
 0x661   : > { %vm2104_vm10 = vcmp.gt.f32.partialorder %v2088_v38, 0.0  ;;  %v2124_v25 = vmul.f32 0.2, %v2092_v16  ;;  %v1556_v26 = vadd.f32 %v4601_v37, %v4598_v11  ;;  %vm4697_vm11 = vcmp.ne.s32.totalorder %v1627_v17, 0  ;;  %v4038_v11 = vld [vmem:[%s4360_s23 + $0x24] sm:$0xf] }
 0x662   : > { %vm4701_vm12 = vcmp.ne.s32.totalorder %v1631_v18, 0  ;;  %vm2108_vm13 = vcmp.gt.f32.partialorder %v2092_v16, 0.0  ;;  %v4707_v49 = vsel %vm4642_vm15, %v1597_v20, -9e+15  ;;  %v1636_v31 = vunpack.c.l.b16 %v1620_v45 }
 0x663   : > { %2173 = vmax.xlane.f32.xlu0 %v4676_v53  ;;  %1686 = vmax.xlane.f32.xlu1 %v4688_v60  ;;  %v1618_v33 = vsel %vm325_vm9, 65537, %v4179_v9  ;;  %vm326_vm14 = vcmp.gt.bf16.partialorder %v4038_v11, 0  ;;  %v4715_v34 = vsel %vm4678_vm7, %v1598_v23, -9e+15  ;;  %v2136_v35 = vsel %vm2104_vm10, %v2088_v38, %v2120_v21  ;;  %v2057_v38 = vpop.permute.xlu0 %2056 }
 0x664   : > { %v1579_v36 = vmul.f32 0.2, %v1547_v22  ;;  %v2093_v39 = vadd.f32 %v4604_v12, %v4563_v41  ;;  %v2140_v40 = vsel %vm2108_vm13, %v2092_v16, %v2124_v25  ;;  %vm1563_vm15 = vcmp.gt.f32.partialorder %v1547_v22, 0.0  ;;  %v4039_v41 = vld [vmem:[%s4360_s23 + $0x1c] sm:$0xf] }
 0x665   : > { %v1588_v1 = vmul.f32 0.2, %v1556_v26  ;;  %v1554_v46 = vadd.f32 %v4601_v37, %v4622_v24  ;;  %vm1572_vm2 = vcmp.gt.f32.partialorder %v1556_v26, 0.0  ;;  %v1634_v5 = vunpack.c.l.b16 %v1618_v33 }
 0x666   : > { %v1619_v6 = vsel %vm326_vm14, 65537, %v4179_v9  ;;  %v4725_v7 = vsel %vm4697_vm11, %v2136_v35, -9e+15  ;;  %vm4727_vm3 = vcmp.ne.s32.totalorder %v1636_v31, 0  ;;  %vm324_vm5 = vcmp.gt.bf16.partialorder %v4039_v41, 0 }
 0x667   : > { %1680 = vmax.xlane.f32.xlu0 %v4707_v49  ;;  %1682 = vmax.xlane.f32.xlu1 %v4715_v34  ;;  %vm331_vm6 = vcmp.gt.bf16.partialorder %v4040_v13, 0  ;;  %v4736_v24 = vsel %vm4701_vm12, %v2140_v40, -9e+15  ;;  %v1595_v14 = vsel %vm1563_vm15, %v1547_v22, %v1579_v36  ;;  %v2125_v43 = vmul.f32 0.2, %v2093_v39 }
 0x668   : > { %v2091_v16 = vadd.f32 %v4604_v12, %v4567_v42  ;;  %v1604_v17 = vsel %vm1572_vm2, %v1556_v26, %v1588_v1  ;;  %vm2109_vm8 = vcmp.gt.f32.partialorder %v2093_v39, 0.0  ;;  %v1586_v18 = vmul.f32 0.2, %v1554_v46  ;;  %v4043_v36 = vld [vmem:[%s4360_s23 + $0x3c] sm:$0xf] }
 0x669   : > { %v2096_v45 = vadd.f32 %v4604_v12, %v2057_v38  ;;  %vm1570_vm9 = vcmp.gt.f32.partialorder %v1554_v46, 0.0  ;;  %v1635_v19 = vunpack.c.l.b16 %v1619_v6  ;;  %v4745_v20 = vsel %vm4697_vm11, %v1595_v14, -9e+15 }
 0x66a   : > { %vm4747_vm10 = vcmp.ne.s32.totalorder %v1634_v5, 0  ;;  %v1617_v42 = vsel %vm324_vm5, 65537, %v4179_v9  ;;  %v1624_v22 = vsel %vm331_vm6, 65537, %v4179_v9  ;;  %v4758_v23 = vsel %vm4727_vm3, %v1604_v17, -9e+15 }
 0x66b   : > { %2169 = vmax.xlane.f32.xlu0 %v4725_v7  ;;  %2177 = vmax.xlane.f32.xlu1 %v4736_v24  ;;  %v2141_v25 = vsel %vm2109_vm8, %v2093_v39, %v2125_v43  ;;  %v2123_v26 = vmul.f32 0.2, %v2091_v16  ;;  %v2094_v29 = vadd.f32 %v4604_v12, %v4575_v57  ;;  %v1602_v31 = vsel %vm1570_vm9, %v1554_v46, %v1586_v18  ;;  %v1535_v57 = vpop.permute.xlu0 %1534 }
 0x66c   : > { %vm2107_vm11 = vcmp.gt.f32.partialorder %v2091_v16, 0.0  ;;  %v2128_v33 = vmul.f32 0.2, %v2096_v45  ;;  %v2101_v11 = vadd.f32 %v4604_v12, %v4581_v59  ;;  %vm2112_vm13 = vcmp.gt.f32.partialorder %v2096_v45, 0.0 }
 0x66d   : > { %v4767_v35 = vsel %vm4646_vm4, %v2141_v25, -9e+15  ;;  %vm4769_vm14 = vcmp.ne.s32.totalorder %v1635_v19, 0  ;;  %v1633_v39 = vunpack.c.l.b16 %v1617_v42  ;;  %v1640_v40 = vunpack.c.l.b16 %v1624_v22 }
 0x66e   : > { %v4776_v1 = vsel %vm4747_vm10, %v1602_v31, -9e+15  ;;  %v2139_v59 = vsel %vm2107_vm11, %v2091_v16, %v2123_v26  ;;  %v2126_v46 = vmul.f32 0.2, %v2094_v29  ;;  %v1553_v15 = vadd.f32 %v4601_v37, %v4579_v56  ;;  %v4041_v56 = vld [vmem:[%s4360_s23 + $0x30] sm:$0xf] }
 0x66f   : > { %1676 = vmax.xlane.f32.xlu0 %v4745_v20  ;;  %1694 = vmax.xlane.f32.xlu1 %v4758_v23  ;;  %v2144_v5 = vsel %vm2112_vm13, %v2096_v45, %v2128_v33  ;;  %vm2110_vm4 = vcmp.gt.f32.partialorder %v2094_v29, 0.0  ;;  %v2133_v6 = vmul.f32 0.2, %v2101_v11  ;;  %v1560_v41 = vadd.f32 %v4601_v37, %v1535_v57 }
 0x670   : > { %vm2117_vm15 = vcmp.gt.f32.partialorder %v2101_v11, 0.0  ;;  %v4784_v13 = vsel %vm4678_vm7, %v2139_v59, -9e+15  ;;  %vm4786_vm2 = vcmp.ne.s32.totalorder %v1633_v39, 0  ;;  %vm4790_vm5 = vcmp.ne.s32.totalorder %v1640_v40, 0 }
 0x671   : > { %vm329_vm6 = vcmp.gt.bf16.partialorder %v4041_v56, 0  ;;  %v4798_v43 = vsel %vm4769_vm14, %v2144_v5, -9e+15  ;;  %v2142_v16 = vsel %vm2110_vm4, %v2094_v29, %v2126_v46  ;;  %v1585_v51 = vmul.f32 0.2, %v1553_v15 }
 0x672   : > { %v1551_v17 = vadd.f32 %v4601_v37, %v4589_v2  ;;  %v2149_v18 = vsel %vm2117_vm15, %v2101_v11, %v2133_v6  ;;  %vm1569_vm7 = vcmp.gt.f32.partialorder %v1553_v15, 0.0  ;;  %v1592_v45 = vmul.f32 0.2, %v1560_v41 }
 0x673   : > { %2179 = vmax.xlane.f32.xlu0 %v4767_v35  ;;  %1690 = vmax.xlane.f32.xlu1 %v4776_v1  ;;  %v2099_v19 = vadd.f32 %v4604_v12, %v4585_v0  ;;  %vm1576_vm8 = vcmp.gt.f32.partialorder %v1560_v41, 0.0  ;;  %v1622_v42 = vsel %vm329_vm6, 65537, %v4179_v9  ;;  %v4808_v22 = vsel %vm4786_vm2, %v2142_v16, -9e+15 }
 0x674   : > { %v4813_v2 = vsel %vm4790_vm5, %v2149_v18, -9e+15  ;;  %v1601_v25 = vsel %vm1569_vm7, %v1553_v15, %v1585_v51  ;;  %v1583_v26 = vmul.f32 0.2, %v1551_v17  ;;  %v2097_v29 = vadd.f32 %v4604_v12, %v4569_v47  ;;  %v4042_v15 = vld [vmem:[%s4360_s23 + $0x2c] sm:$0xf] }
 0x675   : > { %v1608_v0 = vsel %vm1576_vm8, %v1560_v41, %v1592_v45  ;;  %vm1567_vm9 = vcmp.gt.f32.partialorder %v1551_v17, 0.0  ;;  %v1638_v31 = vunpack.c.l.b16 %v1622_v42  ;;  %v2131_v33 = vmul.f32 0.2, %v2099_v19 }
 0x676   : > { %vm2115_vm11 = vcmp.gt.f32.partialorder %v2099_v19, 0.0  ;;  %v4820_v11 = vsel %vm4786_vm2, %v1601_v25, -9e+15  ;;  %v4825_v39 = vsel %vm4790_vm5, %v1608_v0, -9e+15  ;;  %v1599_v40 = vsel %vm1567_vm9, %v1551_v17, %v1583_v26  ;;  %v1525_v26 = vpop.permute.xlu0 %1524 }
 0x677   : > { %2175 = vmax.xlane.f32.xlu0 %v4784_v13  ;;  %2185 = vmax.xlane.f32.xlu1 %v4798_v43  ;;  %v2129_v47 = vmul.f32 0.2, %v2097_v29  ;;  %v2095_v57 = vadd.f32 %v4604_v12, %v4573_v54  ;;  %vm4830_vm13 = vcmp.ne.s32.totalorder %v1638_v31, 0  ;;  %v2147_v46 = vsel %vm2115_vm11, %v2099_v19, %v2131_v33 }
 0x678   : > { %vm2113_vm4 = vcmp.gt.f32.partialorder %v2097_v29, 0.0  ;;  %vm328_vm15 = vcmp.gt.bf16.partialorder %v4042_v15, 0  ;;  %v4837_v5 = vsel %vm4701_vm12, %v1599_v40, -9e+15  ;;  %v4842_v6 = vsel %vm4830_vm13, %v2147_v46, -9e+15 }
 0x679   : > { %v2145_v54 = vsel %vm2113_vm4, %v2097_v29, %v2129_v47  ;;  %v2127_v41 = vmul.f32 0.2, %v2095_v57  ;;  %v2098_v38 = vadd.f32 %v4604_v12, %v4661_v8  ;;  %vm2111_vm2 = vcmp.gt.f32.partialorder %v2095_v57, 0.0 }
 0x67a   : > { %v1621_v14 = vsel %vm328_vm15, 65537, %v4179_v9  ;;  %v4850_v30 = vsel %vm4727_vm3, %v2145_v54, -9e+15  ;;  %v1557_v17 = vadd.f32 %v4601_v37, %v4695_v27  ;;  %v1555_v45 = vadd.f32 %v4601_v37, %v4577_v55 }
 0x67b   : > { %2181 = vmax.xlane.f32.xlu0 %v4808_v22  ;;  %2195 = vmax.xlane.f32.xlu1 %v4813_v2  ;;  %v2143_v56 = vsel %vm2111_vm2, %v2095_v57, %v2127_v41  ;;  %v1637_v16 = vunpack.c.l.b16 %v1621_v14  ;;  %v2130_v51 = vmul.f32 0.2, %v2098_v38  ;;  %vm2114_vm12 = vcmp.gt.f32.partialorder %v2098_v38, 0.0  ;;  %v4044_v41 = vld [vmem:[%s4360_s23 + $0x34] sm:$0xf]  ;;  %s4105_s23 = scalar_lea.vmem %s4104_s15, 128 }
 0x67c   : > { %v4857_v8 = vsel %vm4747_vm10, %v2143_v56, -9e+15  ;;  %v1589_v10 = vmul.f32 0.2, %v1557_v17  ;;  %vm1573_vm3 = vcmp.gt.f32.partialorder %v1557_v17, 0.0  ;;  %vm1571_vm6 = vcmp.gt.f32.partialorder %v1555_v45, 0.0 }
 0x67d   : > { %vm1653_vm5 = vcmp.ne.s32.totalorder %v1637_v16, 0  ;;  %v2146_v18 = vsel %vm2114_vm12, %v2098_v38, %v2130_v51  ;;  %v1587_v27 = vmul.f32 0.2, %v1555_v45  ;;  %v1558_v29 = vadd.f32 %v4601_v37, %v1525_v26 }
 0x67e   : > { %v4862_v19 = vsel %vm1653_vm5, %v2146_v18, -9e+15  ;;  %v1605_v42 = vsel %vm1573_vm3, %v1557_v17, %v1589_v10  ;;  %vm330_vm8 = vcmp.gt.bf16.partialorder %v4044_v41, 0  ;;  %v1559_v41 = vadd.f32 %v4601_v37, %v4591_v3 }
 0x67f   : > { %1688 = vmax.xlane.f32.xlu0 %v4820_v11  ;;  %1702 = vmax.xlane.f32.xlu1 %v4825_v39  ;;  %v4865_v21 = vsel %vm1653_vm5, %v1605_v42, -9e+15  ;;  %v1603_v25 = vsel %vm1571_vm6, %v1555_v45, %v1587_v27  ;;  %v1590_v0 = vmul.f32 0.2, %v1558_v29  ;;  %vm1574_vm10 = vcmp.gt.f32.partialorder %v1558_v29, 0.0 }
 0x680   : > { %v4872_v55 = vsel %vm4769_vm14, %v1603_v25, -9e+15  ;;  %vm332_vm14 = vcmp.gt.bf16.partialorder %v4043_v36, 0  ;;  %v1623_v16 = vsel %vm330_vm8, 65537, %v4179_v9  ;;  %vm1575_vm15 = vcmp.gt.f32.partialorder %v1559_v41, 0.0 }
 0x681   : > { %v1606_v31 = vsel %vm1574_vm10, %v1558_v29, %v1590_v0  ;;  %v1625_v57 = vsel %vm332_vm14, 65537, %v4179_v9  ;;  %v1639_v18 = vunpack.c.l.b16 %v1623_v16 }
 0x682   : > { %v4880_v33 = vsel %vm4830_vm13, %v1606_v31, -9e+15  ;;  %v1641_v15 = vunpack.c.l.b16 %v1625_v57 }
 0x683   : > { %1684 = vmax.xlane.f32.xlu0 %v4837_v5  ;;  %2191 = vmax.xlane.f32.xlu1 %v4842_v6  ;;  %vm4898_vm4 = vcmp.ne.s32.totalorder %v1639_v18, 0 }
 0x684   : > { %vm1657_vm9 = vcmp.ne.s32.totalorder %v1641_v15, 0 }
 0x687   : > { %2187 = vmax.xlane.f32.xlu0 %v4850_v30 }
 0x68b   : > { %2183 = vmax.xlane.f32.xlu0 %v4857_v8 }
 0x68f   : > { %2189 = vmax.xlane.f32.xlu0 %v4862_v19 }
 0x693   : > { %1696 = vmax.xlane.f32.xlu0 %v4865_v21 }
 0x694   : > { %2335 = vrot.lane.b32.xlu1 %v4507_v61, %s4177_s12  ;;  %v2081_v61 = vpop.permute.xlu0 %2080 }
 0x695   : > { %v2102_v47 = vadd.f32 %v4604_v12, %v2081_v61 }
 0x697   : > { %1692 = vmax.xlane.f32.xlu0 %v4872_v55  ;;  %v2134_v46 = vmul.f32 0.2, %v2102_v47  ;;  %vm2118_vm7 = vcmp.gt.f32.partialorder %v2102_v47, 0.0 }
 0x698   : > { %v1540_v40 = vpop.permute.xlu0 %1539 }
 0x699   : > { %v2150_v14 = vsel %vm2118_vm7, %v2102_v47, %v2134_v46 }
 0x69a   : > { %v4891_v56 = vsel %vm1657_vm9, %v2150_v14, -9e+15 }
 0x69c   : > { %v2073_v54 = vpop.permute.xlu0 %2072 }
 0x69d   : > { %v2100_v38 = vadd.f32 %v4604_v12, %v2073_v54 }
 0x69f   : > { %v2132_v51 = vmul.f32 0.2, %v2100_v38  ;;  %vm2116_vm13 = vcmp.gt.f32.partialorder %v2100_v38, 0.0 }
 0x6a1   : > { %v2148_v12 = vsel %vm2116_vm13, %v2100_v38, %v2132_v51 }
 0x6ad   : > { %2333 = vrot.lane.b32.xlu0 %v4501_v63, %s4177_s12  ;;  %v1561_v63 = vadd.f32 %v4601_v37, %v1540_v40 }
 0x6af   : > { %v1593_v59 = vmul.f32 0.2, %v1561_v63  ;;  %vm1577_vm11 = vcmp.gt.f32.partialorder %v1561_v63, 0.0 }
 0x6b1   : > { %v1609_v17 = vsel %vm1577_vm11, %v1561_v63, %v1593_v59 }
 0x6b2   : > { %v4895_v10 = vsel %vm1657_vm9, %v1609_v17, -9e+15  ;;  %v1591_v17 = vmul.f32 0.2, %v1559_v41 }
 0x6b8   : > { %1698 = vmax.xlane.f32.xlu1 %v4880_v33 }
 0x6c9   : > { %2329 = vrot.lane.b32.xlu1 %v4493_v52, %s4177_s12  ;;  %v4904_v52 = vsel %vm4898_vm4, %v2148_v12, -9e+15 }
 0x6cc   : > { %2197 = vmax.xlane.f32.xlu0 %v4891_v56 }
 0x6d0   : > { %1704 = vmax.xlane.f32.xlu0 %v4895_v10 }
 0x6d4   : > { %2193 = vmax.xlane.f32.xlu0 %v4904_v52 }
 0x6e4   : > { %v2168_v9 = vpop.xlane.xlu0 %2167  ;;  %v4907_v42 = vpop.xlane.xlu1 %1674 }
 0x6e5   : > { %v2199_v40 = vsub.f32 %v4627_v28, %v2168_v9  ;;  %v1607_v9 = vsel %vm1575_vm15, %v1559_v41, %v1591_v17 }
 0x6e7   : > { %v2215_v46 = vmul.f32 1.442695, %v2199_v40  ;;  %v4939_v40 = vsel %vm4898_vm4, %v1607_v9, -9e+15 }
 0x6e8   : > { %v2172_v27 = vpop.xlane.xlu0 %2171  ;;  %v4909_v25 = vpop.xlane.xlu1 %1678 }
 0x6e9   : > { %v2201_v63 = vsub.f32 %v4656_v4, %v2172_v27  ;;  %3821 = vpow2.f32 %v2215_v46 }
 0x6ea   : > { %2331 = vrot.lane.b32.xlu0 %v4499_v62, %s4177_s12 }
 0x6eb   : > { %v2219_v59 = vmul.f32 1.442695, %v2201_v63 }
 0x6ec   : > { %v2174_v26 = vpop.xlane.xlu0 %2173  ;;  %v4913_v29 = vpop.xlane.xlu1 %1686 }
 0x6ed   : > { %v2202_v38 = vsub.f32 %v4676_v53, %v2174_v26 }
 0x6ef   : > { %v2221_v4 = vmul.f32 1.442695, %v2202_v38 }
 0x6f0   : > { %v4915_v0 = vpop.xlane.xlu0 %1680  ;;  %v4917_v31 = vpop.xlane.xlu1 %1682 }
 0x6f4   : > { %v2170_v61 = vpop.xlane.xlu0 %2169  ;;  %v2178_v36 = vpop.xlane.xlu1 %2177 }
 0x6f5   : > { %v2204_v27 = vsub.f32 %v4736_v24, %v2178_v36 }
 0x6f6   : > { %v4945_v46 = vpop.eup %3821 }
 0x6f8   : > { %v4920_v47 = vpop.xlane.xlu0 %1676  ;;  %v4922_v57 = vpop.xlane.xlu1 %1694 }
 0x6fc   : > { %v2180_v15 = vpop.xlane.xlu0 %2179  ;;  %v4926_v54 = vpop.xlane.xlu1 %1690 }
 0x6fd   : > { %v2205_v62 = vsub.f32 %v4767_v35, %v2180_v15  ;;  %v2200_v35 = vsub.f32 %v4725_v7, %v2170_v61 }
 0x6ff   : > { %v2227_v28 = vmul.f32 1.442695, %v2205_v62  ;;  %v2217_v53 = vmul.f32 1.442695, %v2200_v35 }
 0x700   : > { %v2176_v14 = vpop.xlane.xlu0 %2175  ;;  %v2186_v51 = vpop.xlane.xlu1 %2185 }
 0x701   : > { %3823 = vpow2.f32 %v2227_v28  ;;  %v2203_v16 = vsub.f32 %v4784_v13, %v2176_v14  ;;  %v2208_v61 = vsub.f32 %v4798_v43, %v2186_v51 }
 0x702   : > { %3825 = vpow2.f32 %v2219_v59 }
 0x703   : > { %v2223_v18 = vmul.f32 1.442695, %v2203_v16  ;;  %v2233_v45 = vmul.f32 1.442695, %v2208_v61 }
 0x704   : > { %v2182_v12 = vpop.xlane.xlu0 %2181  ;;  %v2196_v37 = vpop.xlane.xlu1 %2195 }
 0x705   : > { %3827 = vpow2.f32 %v2223_v18  ;;  %v2206_v3 = vsub.f32 %v4808_v22, %v2182_v12  ;;  %v2225_v22 = vmul.f32 1.442695, %v2204_v27  ;;  %v2213_v15 = vsub.f32 %v4813_v2, %v2196_v37 }
 0x706   : > { %3829 = vpow2.f32 %v2221_v4 }
 0x707   : > { %v2229_v26 = vmul.f32 1.442695, %v2206_v3  ;;  %v2243_v28 = vmul.f32 1.442695, %v2213_v15  ;;  %v1706_v15 = vsub.f32 %v4636_v32, %v4907_v42 }
 0x708   : > { %v4935_v13 = vpop.xlane.xlu0 %1688  ;;  %v4941_v7 = vpop.xlane.xlu1 %1702 }
 0x709   : > { %3831 = vpow2.f32 %v2229_v26  ;;  %1700 = vmax.xlane.f32.xlu0 %v4939_v40 }
 0x70a   : > { %3833 = vpow2.f32 %v2217_v53 }
 0x70b   : > { %3835 = vpow2.f32 %v2225_v22 }
 0x70c   : > { %v4947_v63 = vpop.xlane.xlu0 %1684  ;;  %v2192_v24 = vpop.xlane.xlu1 %2191  ;;  %3837 = vpow2.f32 %v2233_v45 }
 0x70d   : > { %2247 = vadd.xlane.f32.xlu0 %v4945_v46  ;;  %v2211_v18 = vsub.f32 %v4842_v6, %v2192_v24 }
 0x70e   : > { %v4950_v36 = vpop.eup %3823 }
 0x70f   : > { %2259 = vadd.xlane.f32.xlu1 %v4950_v36  ;;  %v4954_v62 = vpop.eup %3825  ;;  %v2239_v9 = vmul.f32 1.442695, %v2211_v18 }
 0x710   : > { %v2188_v41 = vpop.xlane.xlu0 %2187  ;;  %v2336_v59 = vpop.permute.xlu1 %2335 }
 0x711   : > { %v2209_v43 = vsub.f32 %v4850_v30, %v2188_v41  ;;  %2251 = vadd.xlane.f32.xlu0 %v4954_v62  ;;  %3654 = vmatprep.subr.bf16.mxu1 %v2336_v59 }
 0x712   : > { %v4958_v38 = vpop.eup %3827  ;;  %3655 = vmatpush3.bf16.msra.mxu1 %v2336_v59  ;;  %v1707_v59 = vsub.f32 %v4745_v20, %v4920_v47  ;;  %v1709_v20 = vsub.f32 %v4707_v49, %v4915_v0 }
 0x713   : > { %v2235_v14 = vmul.f32 1.442695, %v2209_v43  ;;  %2255 = vadd.xlane.f32.xlu1 %v4958_v38  ;;  %v4961_v2 = vpop.eup %3829 }
 0x714   : > { %v2184_v16 = vpop.xlane.xlu0 %2183 }
 0x715   : > { %3839 = vpow2.f32 %v2235_v14  ;;  %v2207_v51 = vsub.f32 %v4857_v8, %v2184_v16  ;;  %2253 = vadd.xlane.f32.xlu0 %v4961_v2  ;;  %v1722_v14 = vmul.f32 1.442695, %v1706_v15  ;;  %v1724_v16 = vmul.f32 1.442695, %v1707_v59 }
 0x716   : > { %v4965_v30 = vpop.eup %3831  ;;  %3841 = vpow2.f32 %v2243_v28  ;;  %v1716_v15 = vsub.f32 %v4758_v23, %v4922_v57 }
 0x717   : > { %v2231_v17 = vmul.f32 1.442695, %v2207_v51  ;;  %2261 = vadd.xlane.f32.xlu1 %v4965_v30  ;;  %v4968_v4 = vpop.eup %3833 }
 0x718   : > { %v2190_v35 = vpop.xlane.xlu0 %2189  ;;  %v4973_v8 = vpop.eup %3835 }
 0x719   : > { %3843 = vpow2.f32 %v2231_v17  ;;  %v2210_v12 = vsub.f32 %v4862_v19, %v2190_v35  ;;  %2249 = vadd.xlane.f32.xlu0 %v4968_v4  ;;  %v4978_v53 = vpop.eup %3837  ;;  %v1708_v35 = vsub.f32 %v4666_v48, %v4909_v25 }
 0x71b   : > { %v2237_v3 = vmul.f32 1.442695, %v2210_v12  ;;  %v1726_v42 = vmul.f32 1.442695, %v1708_v35  ;;  %v1728_v12 = vmul.f32 1.442695, %v1709_v20 }
 0x71c   : > { %v4975_v37 = vpop.xlane.xlu0 %1696 }
 0x71d   : > { %3845 = vpow2.f32 %v2237_v3  ;;  %2257 = vadd.xlane.f32.xlu0 %v4973_v8  ;;  %v1710_v3 = vsub.f32 %v4715_v34, %v4917_v31  ;;  %v1713_v34 = vsub.f32 %v4820_v11, %v4935_v13 }
 0x71e   : > { %3847 = vpow2.f32 %v2239_v9 }
 0x71f   : > { %v1730_v49 = vmul.f32 1.442695, %v1710_v3 }
 0x720   : > { %v4980_v27 = vpop.xlane.xlu0 %1692 }
 0x721   : > { %2265 = vadd.xlane.f32.xlu0 %v4978_v53  ;;  %v1715_v11 = vsub.f32 %v4872_v55, %v4980_v27 }
 0x722   : > { %v4983_v6 = vpop.eup %3839 }
 0x723   : > { %2267 = vadd.xlane.f32.xlu1 %v4983_v6  ;;  %v4986_v19 = vpop.eup %3841 }
 0x724   : > { %v2334_v26 = vpop.permute.xlu0 %2333 }
 0x725   : > { %2275 = vadd.xlane.f32.xlu0 %v4986_v19  ;;  %3656 = vmatprep.subr.bf16.mxu1 %v2334_v26 }
 0x726   : > { %v4989_v22 = vpop.eup %3843  ;;  %3657 = vmatpush3.bf16.msra.mxu1 %v2334_v26 }
 0x727   : > { %2263 = vadd.xlane.f32.xlu1 %v4989_v22 }
 0x72a   : > { %v4992_v61 = vpop.eup %3845 }
 0x72b   : > { %2269 = vadd.xlane.f32.xlu1 %v4992_v61  ;;  %v4995_v24 = vpop.eup %3847 }
 0x72f   : > { %2271 = vadd.xlane.f32.xlu1 %v4995_v24 }
 0x741   : > { %v1699_v51 = vpop.xlane.xlu1 %1698 }
 0x742   : > { %v1718_v27 = vsub.f32 %v4880_v33, %v1699_v51  ;;  %v1711_v33 = vsub.f32 %v4837_v5, %v4947_v63 }
 0x744   : > { %v1746_v57 = vmul.f32 1.442695, %v1718_v27 }
 0x745   : > { %v2330_v47 = vpop.permute.xlu1 %2329 }
 0x755   : > { %v2198_v45 = vpop.xlane.xlu0 %2197 }
 0x756   : > { %v2214_v41 = vsub.f32 %v4891_v56, %v2198_v45 }
 0x758   : > { %v2245_v43 = vmul.f32 1.442695, %v2214_v41  ;;  %v1740_v41 = vmul.f32 1.442695, %v1715_v11 }
 0x759   : > { %v5003_v28 = vpop.xlane.xlu0 %1704 }
 0x75a   : > { %3849 = vpow2.f32 %v2245_v43  ;;  %v1717_v43 = vsub.f32 %v4865_v21, %v4975_v37  ;;  %v1721_v35 = vsub.f32 %v4895_v10, %v5003_v28 }
 0x75b   : > { %3851 = vpow2.f32 %v1722_v14 }
 0x75c   : > { %3853 = vpow2.f32 %v1724_v16  ;;  %v1744_v55 = vmul.f32 1.442695, %v1717_v43  ;;  %v1720_v16 = vsub.f32 %v4825_v39, %v4941_v7 }
 0x75d   : > { %v2194_v17 = vpop.xlane.xlu0 %2193 }
 0x75e   : > { %v2212_v18 = vsub.f32 %v4904_v52, %v2194_v17  ;;  %v1712_v52 = vsub.f32 %v4688_v60, %v4913_v29  ;;  %v1714_v60 = vsub.f32 %v4776_v1, %v4926_v54  ;;  %v1736_v29 = vmul.f32 1.442695, %v1713_v34 }
 0x75f   : > { %v1742_v54 = vmul.f32 1.442695, %v1716_v15  ;;  %v1750_v5 = vmul.f32 1.442695, %v1720_v16 }
 0x760   : > { %v2241_v32 = vmul.f32 1.442695, %v2212_v18  ;;  %v1734_v9 = vmul.f32 1.442695, %v1712_v52  ;;  %v1738_v45 = vmul.f32 1.442695, %v1714_v60 }
 0x761   : > { %v2332_v56 = vpop.permute.xlu0 %2331 }
 0x762   : > { %3855 = vpow2.f32 %v2241_v32  ;;  %3658 = vmatprep.subr.bf16.mxu1 %v2332_v56 }
 0x763   : > { %3659 = vmatpush3.bf16.msra.mxu1 %v2332_v56  ;;  %3857 = vpow2.f32 %v1726_v42  ;;  %v1752_v42 = vmul.f32 1.442695, %v1721_v35 }
 0x764   : > { %3660 = vmatprep.subr.bf16.mxu1 %v2330_v47  ;;  %3859 = vpow2.f32 %v1728_v12 }
 0x765   : > { %3861 = vpow2.f32 %v1730_v49 }
 0x766   : > { %3863 = vpow2.f32 %v1734_v9 }
 0x767   : > { %v5012_v48 = vpop.eup %3849  ;;  %3661 = vmatpush3.bf16.msra.mxu1 %v2330_v47  ;;  %3865 = vpow2.f32 %v1736_v29 }
 0x768   : > { %2277 = vadd.xlane.f32.xlu1 %v5012_v48  ;;  %v5017_v25 = vpop.eup %3851  ;;  %3867 = vpow2.f32 %v1738_v45 }
 0x769   : > { %v5020_v0 = vpop.eup %3853  ;;  %3869 = vpow2.f32 %v1740_v41 }
 0x76a   : > { %3871 = vpow2.f32 %v1742_v54 }
 0x76b   : > { %3873 = vpow2.f32 %v1744_v55 }
 0x76c   : > { %1754 = vadd.xlane.f32.xlu1 %v5017_v25  ;;  %3875 = vpow2.f32 %v1746_v57 }
 0x76f   : > { %v5024_v31 = vpop.eup %3855 }
 0x770   : > { %2273 = vadd.xlane.f32.xlu0 %v5024_v31  ;;  %1756 = vadd.xlane.f32.xlu1 %v5020_v0  ;;  %v5030_v26 = vpop.eup %3857 }
 0x771   : > { %v5035_v13 = vpop.eup %3859 }
 0x772   : > { %v5040_v1 = vpop.eup %3861 }
 0x773   : > { %v5045_v59 = vpop.eup %3863 }
 0x774   : > { %1758 = vadd.xlane.f32.xlu1 %v5030_v26  ;;  %v5049_v23 = vpop.eup %3865 }
 0x775   : > { %v5054_v14 = vpop.eup %3867 }
 0x776   : > { %v5057_v21 = vpop.eup %3869 }
 0x777   : > { %v5062_v37 = vpop.eup %3871 }
 0x778   : > { %1760 = vadd.xlane.f32.xlu1 %v5035_v13  ;;  %v5067_v17 = vpop.eup %3873 }
 0x779   : > { %v5073_v56 = vpop.eup %3875 }
 0x77c   : > { %1762 = vadd.xlane.f32.xlu1 %v5040_v1 }
 0x780   : > { %1766 = vadd.xlane.f32.xlu1 %v5045_v59 }
 0x784   : > { %1768 = vadd.xlane.f32.xlu1 %v5049_v23 }
 0x786   : > { %2327 = vrot.lane.b32.xlu0 %v4491_v50, %s4177_s12  ;;  %v1732_v50 = vmul.f32 1.442695, %v1711_v33 }
 0x788   : > { %1770 = vadd.xlane.f32.xlu1 %v5054_v14  ;;  %3877 = vpow2.f32 %v1732_v50 }
 0x78c   : > { %1772 = vadd.xlane.f32.xlu1 %v5057_v21 }
 0x790   : > { %1774 = vadd.xlane.f32.xlu1 %v5062_v37 }
 0x792   : > { %v1701_v51 = vpop.xlane.xlu0 %1700 }
 0x793   : > { %v1719_v18 = vsub.f32 %v4939_v40, %v1701_v51 }
 0x794   : > { %1776 = vadd.xlane.f32.xlu1 %v5067_v17 }
 0x795   : > { %v1748_v32 = vmul.f32 1.442695, %v1719_v18  ;;  %v5076_v40 = vpop.eup %3877 }
 0x796   : > { %v2248_v63 = vpop.xlane.xlu0 %2247 }
 0x797   : > { %3879 = vpow2.f32 %v1748_v32 }
 0x798   : > { %1778 = vadd.xlane.f32.xlu1 %v5073_v56  ;;  %3881 = vpow2.f32 %v1750_v5  ;;  %v2260_v15 = vpop.xlane.xlu1 %2259 }
 0x799   : > { %3883 = vpow2.f32 %v1752_v42 }
 0x79a   : > { %v2252_v39 = vpop.xlane.xlu0 %2251 }
 0x79b   : > { %3885 = vrcp.f32 %v2252_v39 }
 0x79c   : > { %v2256_v41 = vpop.xlane.xlu1 %2255 }
 0x79e   : > { %v2254_v7 = vpop.xlane.xlu0 %2253 }
 0x79f   : > { %3887 = vrcp.f32 %v2254_v7 }
 0x7a0   : > { %3889 = vrcp.f32 %v2248_v63  ;;  %v2262_v54 = vpop.xlane.xlu1 %2261 }
 0x7a2   : > { %v2250_v10 = vpop.xlane.xlu0 %2249 }
 0x7a3   : > { %3891 = vrcp.f32 %v2250_v10 }
 0x7a4   : > { %v5078_v28 = vpop.eup %3879 }
 0x7a5   : > { %1764 = vadd.xlane.f32.xlu0 %v5076_v40  ;;  %1780 = vadd.xlane.f32.xlu1 %v5078_v28  ;;  %v5082_v20 = vpop.eup %3881 }
 0x7a6   : > { %v5084_v47 = vpop.eup %3883  ;;  %v2258_v57 = vpop.xlane.xlu0 %2257 }
 0x7a7   : > { %3893 = vrcp.f32 %v2258_v57 }
 0x7a8   : > { %v3886_v12 = vpop.eup %3885  ;;  %3895 = vrcp.f32 %v2256_v41 }
 0x7a9   : > { %1782 = vadd.xlane.f32.xlu0 %v5082_v20  ;;  %1784 = vadd.xlane.f32.xlu1 %v5084_v47  ;;  %v2297_v52 = vmul.f32 %v3886_v12, %v4954_v62  ;;  %3897 = vrcp.f32 %v2262_v54 }
 0x7ac   : > { %v3888_v3 = vpop.eup %3887  ;;  %v2268_v43 = vpop.xlane.xlu1 %2267 }
 0x7ad   : > { %v2298_v49 = vmul.f32 %v3888_v3, %v4961_v2  ;;  %v3890_v9 = vpop.eup %3889  ;;  %v2266_v2 = vpop.xlane.xlu0 %2265 }
 0x7ae   : > { %v2295_v29 = vmul.f32 %v3890_v9, %v4945_v46 }
 0x7af   : > { %v2312_v34 = vpack.c.bf16 %v2298_v49, %v2297_v52 }
 0x7b0   : > { %v3892_v60 = vpop.eup %3891  ;;  %v2264_v55 = vpop.xlane.xlu1 %2263 }
 0x7b1   : > { %v2296_v45 = vmul.f32 %v3892_v60, %v4968_v4  ;;  %v2276_v16 = vpop.xlane.xlu0 %2275  ;;  %3899 = vrcp.f32 %v2264_v55 }
 0x7b2   : > { %3901 = vrcp.f32 %v2260_v15 }
 0x7b3   : > { %v2311_v11 = vpack.c.bf16 %v2296_v45, %v2295_v29  ;;  %3903 = vrcp.f32 %v2266_v2 }
 0x7b4   : > { %v2270_v27 = vpop.xlane.xlu1 %2269  ;;  %v3894_v51 = vpop.eup %3893 }
 0x7b5   : > { %3664 = vmatprep.mubr.bf16.mxu1 %v2311_v11  ;;  %v3896_v35 = vpop.eup %3895  ;;  %v2300_v5 = vmul.f32 %v3894_v51, %v4973_v8 }
 0x7b6   : > { %v2299_v63 = vmul.f32 %v3896_v35, %v4958_v38  ;;  %v3898_v42 = vpop.eup %3897 }
 0x7b7   : > { %v2302_v52 = vmul.f32 %v3898_v42, %v4965_v30 }
 0x7b8   : > { %v2272_v62 = vpop.xlane.xlu1 %2271  ;;  %v2313_v7 = vpack.c.bf16 %v2300_v5, %v2299_v63 }
 0x7be   : > { %v3900_v10 = vpop.eup %3899 }
 0x7bf   : > { %v3902_v12 = vpop.eup %3901  ;;  %v2303_v49 = vmul.f32 %v3900_v10, %v4989_v22 }
 0x7c0   : > { %v3904_v3 = vpop.eup %3903  ;;  %v2301_v38 = vmul.f32 %v3902_v12, %v4950_v36 }
 0x7c1   : > { %v2304_v60 = vmul.f32 %v3904_v3, %v4978_v53 }
 0x7c2   : > { %v2314_v45 = vpack.c.bf16 %v2302_v52, %v2301_v38 }
 0x7c3   : > { %v2315_v15 = vpack.c.bf16 %v2304_v60, %v2303_v49 }
 0x7f1   : > { %v2278_v33 = vpop.xlane.xlu1 %2277 }
 0x7f5   : > { %v1755_v46 = vpop.xlane.xlu1 %1754 }
 0x7f6   : > { %3905 = vrcp.f32 %v1755_v46 }
 0x7f9   : > { %v2274_v4 = vpop.xlane.xlu0 %2273  ;;  %v1757_v50 = vpop.xlane.xlu1 %1756 }
 0x7fa   : > { %3907 = vrcp.f32 %v1757_v50 }
 0x7fb   : > { %3909 = vrcp.f32 %v2270_v27 }
 0x7fc   : > { %3911 = vrcp.f32 %v2274_v4 }
 0x7fd   : > { %v2328_v18 = vpop.permute.xlu0 %2327  ;;  %v1759_v32 = vpop.xlane.xlu1 %1758  ;;  %3913 = vrcp.f32 %v2268_v43 }
 0x7fe   : > { %3662 = vmatprep.subr.bf16.mxu1 %v2328_v18  ;;  %3915 = vrcp.f32 %v2272_v62 }
 0x7ff   : > { %3663 = vmatpush3.bf16.msra.mxu1 %v2328_v18  ;;  %3917 = vrcp.f32 %v1759_v32 }
 0x801   : > { %v1761_v39 = vpop.xlane.xlu1 %1760 }
 0x802   : > { %3919 = vrcp.f32 %v1761_v39  ;;  %3665 = vmatmul.mubr.bf16.vlgmr.msra.gmra.mxu1 %v2312_v34 }
 0x803   : > { %3668 = vmatprep.mubr.bf16.mxu1 %v2313_v7  ;;  %3921 = vrcp.f32 %v2278_v33  ;;  %v3906_v9 = vpop.eup %3905 }
 0x804   : > { %3923 = vrcp.f32 %v2276_v16  ;;  %v1802_v34 = vmul.f32 %v3906_v9, %v5017_v25 }
 0x805   : > { %v1763_v8 = vpop.xlane.xlu1 %1762 }
 0x806   : > { %3925 = vrcp.f32 %v1763_v8 }
 0x807   : > { %v3908_v29 = vpop.eup %3907 }
 0x808   : > { %v3910_v11 = vpop.eup %3909  ;;  %v1803_v41 = vmul.f32 %v3908_v29, %v5020_v0 }
 0x809   : > { %v3912_v54 = vpop.eup %3911  ;;  %v1767_v43 = vpop.xlane.xlu1 %1766  ;;  %v2306_v27 = vmul.f32 %v3910_v11, %v4992_v61 }
 0x80a   : > { %3669 = vmatmul.mubr.bf16.gmra.mxu1 %v2314_v45  ;;  %v3914_v30 = vpop.eup %3913  ;;  %v1818_v22 = vpack.c.bf16 %v1803_v41, %v1802_v34  ;;  %v2308_v53 = vmul.f32 %v3912_v54, %v5024_v31  ;;  %3927 = vrcp.f32 %v1767_v43 }
 0x80b   : > { %3672 = vmatprep.mubr.bf16.mxu1 %v2315_v15  ;;  %v3916_v55 = vpop.eup %3915  ;;  %v2305_v57 = vmul.f32 %v3914_v30, %v4983_v6 }
 0x80c   : > { %v3918_v36 = vpop.eup %3917  ;;  %3632 = vmatprep.mubr.bf16.mxu0 %v1818_v22  ;;  %v2307_v25 = vmul.f32 %v3916_v55, %v4995_v24 }
 0x80d   : > { %v1769_v2 = vpop.xlane.xlu1 %1768  ;;  %v2316_v0 = vpack.c.bf16 %v2306_v27, %v2305_v57  ;;  %v1804_v33 = vmul.f32 %v3918_v36, %v5030_v26 }
 0x80e   : > { %v2317_v4 = vpack.c.bf16 %v2308_v53, %v2307_v25  ;;  %3929 = vrcp.f32 %v1769_v2 }
 0x80f   : > { %v3920_v62 = vpop.eup %3919 }
 0x810   : > { %v1805_v16 = vmul.f32 %v3920_v62, %v5035_v13  ;;  %v3922_v46 = vpop.eup %3921 }
 0x811   : > { %v3924_v61 = vpop.eup %3923  ;;  %v2310_v31 = vmul.f32 %v3922_v46, %v5012_v48  ;;  %v1771_v51 = vpop.xlane.xlu1 %1770 }
 0x812   : > { %3673 = vmatmul.mubr.bf16.gmra.mxu1 %v2316_v0  ;;  %v1819_v50 = vpack.c.bf16 %v1805_v16, %v1804_v33  ;;  %v2309_v6 = vmul.f32 %v3924_v61, %v4986_v19 }
 0x813   : > { %3676 = vmatprep.mubr.bf16.mxu1 %v2317_v4  ;;  %v3926_v48 = vpop.eup %3925 }
 0x814   : > { %3633 = vmatmul.mubr.bf16.vlgmr.msra.gmra.mxu0 %v1819_v50  ;;  %v2318_v35 = vpack.c.bf16 %v2310_v31, %v2309_v6  ;;  %v1806_v52 = vmul.f32 %v3926_v48, %v5040_v1 }
 0x815   : > { %v1773_v24 = vpop.xlane.xlu1 %1772 }
 0x816   : > { %3931 = vrcp.f32 %v1773_v24 }
 0x817   : > { %3933 = vrcp.f32 %v1771_v51  ;;  %v3928_v19 = vpop.eup %3927 }
 0x818   : > { %v1808_v9 = vmul.f32 %v3928_v19, %v5045_v59 }
 0x819   : > { %v1775_v18 = vpop.xlane.xlu1 %1774 }
 0x81a   : > { %3677 = vmatmul.mubr.bf16.gmra.mxu1 %v2318_v35 }
 0x81b   : > { %v3930_v42 = vpop.eup %3929 }
 0x81c   : > { %v1809_v3 = vmul.f32 %v3930_v42, %v5049_v23 }
 0x81d   : > { %v1777_v32 = vpop.xlane.xlu1 %1776 }
 0x81e   : > { %v1821_v29 = vpack.c.bf16 %v1809_v3, %v1808_v9 }
 0x821   : > { %v1779_v26 = vpop.xlane.xlu1 %1778 }
 0x823   : > { %v3932_v7 = vpop.eup %3931 }
 0x824   : > { %v3934_v10 = vpop.eup %3933  ;;  %v1811_v49 = vmul.f32 %v3932_v7, %v5057_v21 }
 0x825   : > { %v1810_v60 = vmul.f32 %v3934_v10, %v5054_v14 }
 0x827   : > { %v1822_v11 = vpack.c.bf16 %v1811_v49, %v1810_v60 }
 0x82e   : > { %v1765_v13 = vpop.xlane.xlu0 %1764  ;;  %v1781_v5 = vpop.xlane.xlu1 %1780 }
 0x82f   : > { %3935 = vrcp.f32 %v1765_v13 }
 0x830   : > { %3937 = vrcp.f32 %v1777_v32 }
 0x831   : > { %3939 = vrcp.f32 %v1781_v5 }
 0x832   : > { %3941 = vrcp.f32 %v1775_v18  ;;  %v1783_v63 = vpop.xlane.xlu0 %1782  ;;  %v1785_v39 = vpop.xlane.xlu1 %1784 }
 0x833   : > { %3943 = vrcp.f32 %v1779_v26 }
 0x834   : > { %3945 = vrcp.f32 %v1783_v63 }
 0x835   : > { %3947 = vrcp.f32 %v1785_v39 }
 0x83c   : > { %v3936_v12 = vpop.eup %3935 }
 0x83d   : > { %v1807_v8 = vmul.f32 %v3936_v12, %v5076_v40  ;;  %v3938_v45 = vpop.eup %3937 }
 0x83e   : > { %v3940_v15 = vpop.eup %3939  ;;  %v1813_v1 = vmul.f32 %v3938_v45, %v5067_v17 }
 0x83f   : > { %v1820_v38 = vpack.c.bf16 %v1807_v8, %v1806_v52  ;;  %v3942_v34 = vpop.eup %3941  ;;  %v1815_v40 = vmul.f32 %v3940_v15, %v5078_v28 }
 0x840   : > { %v3944_v23 = vpop.eup %3943  ;;  %v1812_v21 = vmul.f32 %v3942_v34, %v5062_v37 }
 0x841   : > { %3636 = vmatprep.mubr.bf16.mxu0 %v1820_v38  ;;  %v1814_v59 = vmul.f32 %v3944_v23, %v5073_v56  ;;  %v3946_v41 = vpop.eup %3945 }
 0x842   : > { %3637 = vmatmul.mubr.bf16.gmra.mxu0 %v1821_v29  ;;  %v1823_v54 = vpack.c.bf16 %v1813_v1, %v1812_v21  ;;  %v3948_v14 = vpop.eup %3947  ;;  %v1816_v30 = vmul.f32 %v3946_v41, %v5082_v20 }
 0x843   : > { %3640 = vmatprep.mubr.bf16.mxu0 %v1822_v11  ;;  %v1824_v43 = vpack.c.bf16 %v1815_v40, %v1814_v59  ;;  %v1817_v22 = vmul.f32 %v3948_v14, %v5084_v47 }
 0x845   : > { %v1825_v55 = vpack.c.bf16 %v1817_v22, %v1816_v30 }
 0x84a   : > { %3641 = vmatmul.mubr.bf16.gmra.mxu0 %v1823_v54 }
 0x84b   : > { %3644 = vmatprep.mubr.bf16.mxu0 %v1824_v43 }
 0x852   : > { %3645 = vmatmul.mubr.bf16.gmra.mxu0 %v1825_v55 }
 0x853   : > { %3684 = vmatprep.mubr.msk.bf16.mxu0 %vm5485_vm1, %v4175_v58 }
 0x8c2   : > { %v3666_v17 = vpop.f32.mrf.mxu1 }
 0x8c3   : > { %v2466_v28 = vmin.f32 %v3666_v17, 0.0  ;;  %vm2450_vm2 = vcmp.gt.f32.partialorder %v3666_v17, 0.0 }
 0x8c4   : > { %v2385_v37 = vpop.f32.mrf.mxu1 }
 0x8c5   : > { %v2484_v27 = vmul.f32 1.442695, %v2466_v28  ;;  %v2464_v56 = vmin.f32 %v2385_v37, 0.0  ;;  %vm2448_vm12 = vcmp.gt.f32.partialorder %v2385_v37, 0.0 }
 0x8c6   : > { %v5122_v36 = vpop.f32.mrf.mxu1 }
 0x8c7   : > { %3949 = vpow2.f32 %v2484_v27  ;;  %v2480_v53 = vmul.f32 1.442695, %v2464_v56  ;;  %v2467_v57 = vmin.f32 %v5122_v36, 0.0  ;;  %vm2451_vm5 = vcmp.gt.f32.partialorder %v5122_v36, 0.0 }
 0x8c8   : > { %v5125_v62 = vpop.f32.mrf.mxu1 }
 0x8c9   : > { %v2465_v20 = vmin.f32 %v5125_v62, 0.0  ;;  %v2486_v47 = vmul.f32 1.442695, %v2467_v57  ;;  %3951 = vpow2.f32 %v2480_v53  ;;  %vm2449_vm3 = vcmp.gt.f32.partialorder %v5125_v62, 0.0 }
 0x8ca   : > { %v5128_v25 = vpop.f32.mrf.mxu1 }
 0x8cb   : > { %v2482_v2 = vmul.f32 1.442695, %v2465_v20  ;;  %v2470_v0 = vmin.f32 %v5128_v25, 0.0  ;;  %3953 = vpow2.f32 %v2486_v47  ;;  %vm2454_vm6 = vcmp.gt.f32.partialorder %v5128_v25, 0.0 }
 0x8cc   : > { %v5131_v33 = vpop.f32.mrf.mxu1 }
 0x8cd   : > { %v2492_v16 = vmul.f32 1.442695, %v2470_v0  ;;  %v2468_v46 = vmin.f32 %v5131_v33, 0.0  ;;  %3955 = vpow2.f32 %v2482_v2  ;;  %vm2452_vm14 = vcmp.gt.f32.partialorder %v5131_v33, 0.0 }
 0x8ce   : > { %v5134_v4 = vpop.f32.mrf.mxu1 }
 0x8cf   : > { %3957 = vpow2.f32 %v2492_v16  ;;  %v2488_v61 = vmul.f32 1.442695, %v2468_v46  ;;  %v2471_v49 = vmin.f32 %v5134_v4, 0.0  ;;  %vm2455_vm15 = vcmp.gt.f32.partialorder %v5134_v4, 0.0 }
 0x8d0   : > { %v5136_v50 = vpop.f32.mrf.mxu1 }
 0x8d1   : > { %v2469_v31 = vmin.f32 %v5136_v50, 0.0  ;;  %3959 = vpow2.f32 %v2488_v61  ;;  %v2494_v40 = vmul.f32 1.442695, %v2471_v49  ;;  %vm2453_vm8 = vcmp.gt.f32.partialorder %v5136_v50, 0.0 }
 0x8d2   : > { %v5139_v51 = vpop.f32.mrf.mxu1 }
 0x8d3   : > { %v2474_v6 = vmin.f32 %v5139_v51, 0.0  ;;  %v2490_v18 = vmul.f32 1.442695, %v2469_v31  ;;  %vm2458_vm10 = vcmp.gt.f32.partialorder %v5139_v51, 0.0 }
 0x8d4   : > { %v3950_v35 = vpop.eup %3949  ;;  %v5142_v24 = vpop.f32.mrf.mxu1 }
 0x8d5   : > { %v2500_v32 = vmul.f32 1.442695, %v2474_v6  ;;  %v2472_v26 = vmin.f32 %v5142_v24, 0.0  ;;  %v3328_v5 = vadd.f32 -1.0, %v3950_v35  ;;  %vm2456_vm9 = vcmp.gt.f32.partialorder %v5142_v24, 0.0 }
 0x8d6   : > { %v5145_v13 = vpop.f32.mrf.mxu1  ;;  %v3952_v48 = vpop.eup %3951 }
 0x8d7   : > { %3961 = vpow2.f32 %v2500_v32  ;;  %v2475_v19 = vmin.f32 %v5145_v13, 0.0  ;;  %v2530_v63 = vsel %vm2450_vm2, %v3666_v17, %v3328_v5  ;;  %v2496_v39 = vmul.f32 1.442695, %v2472_v26 }
 0x8d8   : > { %v5148_v42 = vpop.f32.mrf.mxu1  ;;  %3963 = vpow2.f32 %v2490_v18  ;;  %2564 = vrot.lane.b32.xlu1 %v2530_v63, %s4180_s26  ;;  %v3954_v3 = vpop.eup %3953  ;;  %v3326_v52 = vadd.f32 -1.0, %v3952_v48  ;;  %vm2459_vm7 = vcmp.gt.f32.partialorder %v5145_v13, 0.0  ;;  %v3816_v63 = vld [vmem:[#allocation5 + $0x28] sm:$0xff]  }
 0x8d9   : > { %v2502_v7 = vmul.f32 1.442695, %v2475_v19  ;;  %v2473_v10 = vmin.f32 %v5148_v42, 0.0  ;;  %v3329_v15 = vadd.f32 -1.0, %v3954_v3  ;;  %vm2457_vm13 = vcmp.gt.f32.partialorder %v5148_v42, 0.0 }
 0x8da   : > { %v5152_v12 = vpop.f32.mrf.mxu1  ;;  %v3956_v8 = vpop.eup %3955  ;;  %v2528_v60 = vsel %vm2448_vm12, %v2385_v37, %v3326_v52 }
 0x8db   : > { %3965 = vpow2.f32 %v2502_v7  ;;  %v2498_v9 = vmul.f32 1.442695, %v2473_v10  ;;  %v2478_v29 = vmin.f32 %v5152_v12, 0.0  ;;  %2560 = vrot.lane.b32.xlu0 %v2528_v60, %s4180_s26  ;;  %v3327_v1 = vadd.f32 -1.0, %v3956_v8 }
 0x8dc   : > { %v5155_v38 = vpop.f32.mrf.mxu1  ;;  %3967 = vpow2.f32 %v2496_v39  ;;  %v3958_v45 = vpop.eup %3957  ;;  %v2531_v54 = vsel %vm2451_vm5, %v5122_v36, %v3329_v15  ;;  %vm2462_vm11 = vcmp.gt.f32.partialorder %v5152_v12, 0.0  ;;  %vm2608_vm5 = vcmask 64512  }
 0x8dd   : > { %v2476_v11 = vmin.f32 %v5155_v38, 0.0  ;;  %v2508_v23 = vmul.f32 1.442695, %v2478_v29  ;;  %3969 = vpow2.f32 %v2498_v9  ;;  %v2529_v14 = vsel %vm2449_vm3, %v5125_v62, %v3327_v1 }
 0x8de   : > { %v5160_v34 = vpop.f32.mrf.mxu1  ;;  %v3332_v43 = vadd.f32 -1.0, %v3958_v45  ;;  %v3960_v30 = vpop.eup %3959  ;;  %2562 = vrot.lane.b32.xlu1 %v2529_v14, %s4180_s26  ;;  %vm2460_vm4 = vcmp.gt.f32.partialorder %v5155_v38, 0.0 }
 0x8df   : > { %v2504_v21 = vmul.f32 1.442695, %v2476_v11  ;;  %v2479_v59 = vmin.f32 %v5160_v34, 0.0  ;;  %3971 = vpow2.f32 %v2508_v23  ;;  %2566 = vrot.lane.b32.xlu0 %v2531_v54, %s4180_s26  ;;  %v3330_v27 = vadd.f32 -1.0, %v3960_v30 }
 0x8e0   : > { %v5165_v41 = vpop.f32.mrf.mxu1  ;;  %v2534_v37 = vsel %vm2454_vm6, %v5128_v25, %v3332_v43  ;;  %vm2463_vm12 = vcmp.gt.f32.partialorder %v5160_v34, 0.0 }
 0x8e1   : > { %3973 = vpow2.f32 %v2504_v21  ;;  %v2477_v22 = vmin.f32 %v5165_v41, 0.0  ;;  %v2510_v28 = vmul.f32 1.442695, %v2479_v59  ;;  %v2532_v62 = vsel %vm2452_vm14, %v5131_v33, %v3330_v27 }
 0x8e2   : > { %3975 = vpow2.f32 %v2494_v40  ;;  %2572 = vrot.lane.b32.xlu1 %v2534_v37, %s4180_s26  ;;  %vm2461_vm2 = vcmp.gt.f32.partialorder %v5165_v41, 0.0 }
 0x8e3   : > { %v2506_v17 = vmul.f32 1.442695, %v2477_v22 }
 0x8e4   : > { %v3962_v55 = vpop.eup %3961 }
 0x8e5   : > { %v3336_v56 = vadd.f32 -1.0, %v3962_v55  ;;  %v3964_v36 = vpop.eup %3963  ;;  %3977 = vpow2.f32 %v2506_v17 }
 0x8e6   : > { %3979 = vpow2.f32 %v2510_v28  ;;  %v3331_v20 = vadd.f32 -1.0, %v3964_v36  ;;  %2568 = vrot.lane.b32.xlu1 %v2532_v62, %s4180_s26 }
 0x8e7   : > { %v2538_v53 = vsel %vm2458_vm10, %v5139_v51, %v3336_v56 }
 0x8e8   : > { %2580 = vrot.lane.b32.xlu0 %v2538_v53, %s4180_s26  ;;  %v3966_v57 = vpop.eup %3965  ;;  %v2533_v16 = vsel %vm2453_vm8, %v5136_v50, %v3331_v20  ;;  %vm2645_vm8 = vcmask 1042434  }
 0x8e9   : > { %v3968_v47 = vpop.eup %3967  ;;  %v3337_v25 = vadd.f32 -1.0, %v3966_v57 }
 0x8ea   : > { %v3970_v0 = vpop.eup %3969  ;;  %v3334_v46 = vadd.f32 -1.0, %v3968_v47  ;;  %2570 = vrot.lane.b32.xlu1 %v2533_v16, %s4180_s26 }
 0x8eb   : > { %v2539_v2 = vsel %vm2459_vm7, %v5145_v13, %v3337_v25  ;;  %v3335_v18 = vadd.f32 -1.0, %v3970_v0  ;;  %vm2642_vm7 = vcmask 1041409  }
 0x8ec   : > { %2582 = vrot.lane.b32.xlu0 %v2539_v2, %s4180_s26  ;;  %v3972_v61 = vpop.eup %3971  ;;  %v2536_v6 = vsel %vm2456_vm9, %v5142_v24, %v3334_v46  ;;  %v3815_v24 = vld [vmem:[#allocation5 + $0x30] sm:$0xff]   ;;  %vm5488_vm9 = vcmask 1043459  }
 0x8ed   : > { %v3340_v31 = vadd.f32 -1.0, %v3972_v61  ;;  %v2537_v13 = vsel %vm2457_vm13, %v5148_v42, %v3335_v18  ;;  %3681 = vmatpush3.bf16.msra.mxu0 %v3815_v24  ;;  %vm2654_vm13 = vcmask 1045509  }
 0x8ee   : > { %v3974_v33 = vpop.eup %3973  ;;  %2576 = vrot.lane.b32.xlu1 %v2536_v6, %s4180_s26  ;;  %3682 = vmatprep.subr.bf16.mxu0 %v4175_v58 }
 0x8ef   : > { %v3976_v51 = vpop.eup %3975  ;;  %v2542_v35 = vsel %vm2462_vm11, %v5152_v12, %v3340_v31  ;;  %v3338_v32 = vadd.f32 -1.0, %v3974_v33  ;;  %v5210_v12 = vpop.f32.mrf.mxu0  ;;  %vm2651_vm11 = vcmask 1044484  }
 0x8f0   : > { %2588 = vrot.lane.b32.xlu0 %v2542_v35, %s4180_s26  ;;  %v3333_v48 = vadd.f32 -1.0, %v3976_v51  ;;  %v1941_v11 = vmin.f32 %v5210_v12, 0.0  ;;  %vm1925_vm3 = vcmp.gt.f32.partialorder %v5210_v12, 0.0 }
 0x8f1   : > { %v2540_v5 = vsel %vm2460_vm4, %v5155_v38, %v3338_v32  ;;  %3683 = vmatpush3.bf16.msra.mxu0 %v3816_v63  ;;  %v5212_v3 = vpop.f32.mrf.mxu0 }
 0x8f2   : > { %v3978_v50 = vpop.eup %3977  ;;  %2578 = vrot.lane.b32.xlu1 %v2537_v13, %s4180_s26  ;;  %v2535_v42 = vsel %vm2455_vm15, %v5134_v4, %v3333_v48  ;;  %3688 = vmatprep.subr.bf16.mxu0 %v4175_v58  ;;  %v1959_v1 = vmul.f32 1.442695, %v1941_v11  ;;  %v1939_v40 = vmin.f32 %v5212_v3, 0.0  ;;  %vm1923_vm14 = vcmp.gt.f32.partialorder %v5212_v3, 0.0 }
 0x8f3   : > { %v3339_v26 = vadd.f32 -1.0, %v3978_v50  ;;  %v3980_v19 = vpop.eup %3979  ;;  %v5214_v52 = vpop.f32.mrf.mxu0 }
 0x8f4   : > { %2584 = vrot.lane.b32.xlu0 %v2540_v5, %s4180_s26  ;;  %v3341_v7 = vadd.f32 -1.0, %v3980_v19  ;;  %v1942_v15 = vmin.f32 %v5214_v52, 0.0  ;;  %3981 = vpow2.f32 %v1959_v1  ;;  %v1955_v54 = vmul.f32 1.442695, %v1939_v40 }
 0x8f5   : > { %v2541_v39 = vsel %vm2461_vm2, %v5165_v41, %v3339_v26  ;;  %v5216_v4 = vpop.f32.mrf.mxu0  ;;  %vm1926_vm6 = vcmp.gt.f32.partialorder %v5214_v52, 0.0  ;;  %vm2657_vm2 = vcmask 1046534  }
 0x8f6   : > { %2574 = vrot.lane.b32.xlu1 %v2535_v42, %s4180_s26  ;;  %v2543_v10 = vsel %vm2463_vm12, %v5160_v34, %v3341_v7  ;;  %v1940_v34 = vmin.f32 %v5216_v4, 0.0  ;;  %v1961_v21 = vmul.f32 1.442695, %v1942_v15  ;;  %vm1924_vm10 = vcmp.gt.f32.partialorder %v5216_v4, 0.0 }
 0x8f8   : > { %2586 = vrot.lane.b32.xlu0 %v2541_v39, %s4180_s26  ;;  %v1957_v59 = vmul.f32 1.442695, %v1940_v34  ;;  %3983 = vpow2.f32 %v1961_v21 }
 0x8fa   : > { %3985 = vpow2.f32 %v1957_v59 }
 0x8fb   : > { %3987 = vpow2.f32 %v1955_v54 }
 0x8fc   : > { %2590 = vrot.lane.b32.xlu0 %v2543_v10, %s4180_s26  ;;  %s3134_s26 = sshll.u32 %s287_s17, 4  ;;  %s5434_s26 = int_to_ptr.vmem [resolvable:$true] %s3134_s26 }
 0x8fd   : > { %s4099_s24 = scalar_lea.vmem %s5434_s26, 64  ;;  %p4106_p2 = scmp.lt.s32.totalorder %s5434_s26, %s4104_s15 }
 0x8fe   : > { %p4100_p11 = scmp.ne.s32.totalorder %s5434_s26, %s4099_s24  ;;  %p4107_p13 = scmp.lt.s32.totalorder %s4105_s23, %s4099_s24 }
 0x900   : > { %p4101_p12 = pnand %p4100_p11, %p5538_p7  ;;  %p4108_p0 = por %p4107_p13, %p4106_p2 }
 0x901   : > { %v3982_v61 = vpop.eup %3981 }
 0x902   : > { %v5218_v8 = vpop.f32.mrf.mxu0  ;;  %v3312_v26 = vadd.f32 -1.0, %v3982_v61  ;;  %p4102_p10 = pneg %p4101_p12 }
 0x903   : > { %v1945_v30 = vmin.f32 %v5218_v8, 0.0  ;;  %vm1929_vm4 = vcmp.gt.f32.partialorder %v5218_v8, 0.0 }
 0x904   : > { %v5220_v49 = vpop.f32.mrf.mxu0  ;;  %v2005_v39 = vsel %vm1925_vm3, %v5210_v12, %v3312_v26  ;;  %p4109_p5 = pnand %p4108_p0, %p4102_p10 }
 0x905   : > { %v1943_v14 = vmin.f32 %v5220_v49, 0.0  ;;  %v1967_v27 = vmul.f32 1.442695, %v1945_v30  ;;  %v3984_v51 = vpop.eup %3983  ;;  %vm1927_vm15 = vcmp.gt.f32.partialorder %v5220_v49, 0.0 }
 0x906   : > { %v5222_v9 = vpop.f32.mrf.mxu0  ;;  %v3313_v5 = vadd.f32 -1.0, %v3984_v51 }
 0x907   : > { %v1946_v22 = vmin.f32 %v5222_v9, 0.0  ;;  %v1963_v17 = vmul.f32 1.442695, %v1943_v14  ;;  %v3986_v35 = vpop.eup %3985  ;;  %vm1930_vm12 = vcmp.gt.f32.partialorder %v5222_v9, 0.0 }
 0x908   : > { %v5224_v38 = vpop.f32.mrf.mxu0  ;;  %v3988_v50 = vpop.eup %3987  ;;  %v3311_v48 = vadd.f32 -1.0, %v3986_v35  ;;  %v2006_v42 = vsel %vm1926_vm6, %v5214_v52, %v3313_v5 }
 0x909   : > { %v1944_v55 = vmin.f32 %v5224_v38, 0.0  ;;  %v1969_v36 = vmul.f32 1.442695, %v1946_v22  ;;  %3989 = vpow2.f32 %v1963_v17  ;;  %v3310_v63 = vadd.f32 -1.0, %v3988_v50 }
 0x90a   : > { %v5226_v60 = vpop.f32.mrf.mxu0  ;;  %3991 = vpow2.f32 %v1967_v27  ;;  %v2004_v7 = vsel %vm1924_vm10, %v5216_v4, %v3311_v48  ;;  %vm1928_vm3 = vcmp.gt.f32.partialorder %v5224_v38, 0.0 }
 0x90b   : > { %v1949_v28 = vmin.f32 %v5226_v60, 0.0  ;;  %v1965_v57 = vmul.f32 1.442695, %v1944_v55  ;;  %3993 = vpow2.f32 %v1969_v36  ;;  %v2003_v21 = vsel %vm1923_vm14, %v5212_v3, %v3310_v63 }
 0x90c   : > { %v5228_v29 = vpop.f32.mrf.mxu0  ;;  %vm1933_vm6 = vcmp.gt.f32.partialorder %v5226_v60, 0.0 }
 0x90d   : > { %v1947_v56 = vmin.f32 %v5228_v29, 0.0  ;;  %v1975_v20 = vmul.f32 1.442695, %v1949_v28  ;;  %3995 = vpow2.f32 %v1965_v57  ;;  %vm1931_vm10 = vcmp.gt.f32.partialorder %v5228_v29, 0.0 }
 0x90e   : > { %v5230_v45 = vpop.f32.mrf.mxu0 }
 0x90f   : > { %v1950_v53 = vmin.f32 %v5230_v45, 0.0  ;;  %v1971_v2 = vmul.f32 1.442695, %v1947_v56  ;;  %3997 = vpow2.f32 %v1975_v20  ;;  %vm1934_vm14 = vcmp.gt.f32.partialorder %v5230_v45, 0.0 }
 0x910   : > { %v5235_v23 = vpop.f32.mrf.mxu0 }
 0x911   : > { %v1948_v62 = vmin.f32 %v5235_v23, 0.0  ;;  %v1977_v16 = vmul.f32 1.442695, %v1950_v53  ;;  %3999 = vpow2.f32 %v1971_v2 }
 0x912   : > { %v5238_v41 = vpop.f32.mrf.mxu0 }
 0x913   : > { %v1953_v47 = vmin.f32 %v5238_v41, 0.0  ;;  %v1973_v33 = vmul.f32 1.442695, %v1948_v62  ;;  %4001 = vpow2.f32 %v1977_v16 }
 0x914   : > { %v5241_v43 = vpop.f32.mrf.mxu0 }
 0x915   : > { %v1951_v0 = vmin.f32 %v5241_v43, 0.0  ;;  %v1983_v6 = vmul.f32 1.442695, %v1953_v47  ;;  %4003 = vpow2.f32 %v1973_v33  ;;  %vm1935_vm0 = vcmp.gt.f32.partialorder %v5241_v43, 0.0 }
 0x916   : > { %v5247_v37 = vpop.f32.mrf.mxu0  ;;  %v3990_v34 = vpop.eup %3989 }
 0x917   : > { %v1954_v46 = vmin.f32 %v5247_v37, 0.0  ;;  %v1979_v18 = vmul.f32 1.442695, %v1951_v0  ;;  %4005 = vpow2.f32 %v1983_v6  ;;  %v3992_v40 = vpop.eup %3991  ;;  %v3314_v30 = vadd.f32 -1.0, %v3990_v34 }
 0x918   : > { %v5253_v25 = vpop.f32.mrf.mxu0  ;;  %v3994_v4 = vpop.eup %3993  ;;  %v3316_v56 = vadd.f32 -1.0, %v3992_v40 }
 0x919   : > { %v1952_v31 = vmin.f32 %v5253_v25, 0.0  ;;  %v1985_v32 = vmul.f32 1.442695, %v1954_v46  ;;  %4007 = vpow2.f32 %v1979_v18  ;;  %v2007_v47 = vsel %vm1927_vm15, %v5220_v49, %v3314_v30 }
 0x91a   : > { %v3996_v14 = vpop.eup %3995  ;;  %v2009_v49 = vsel %vm1929_vm4, %v5218_v8, %v3316_v56  ;;  %vm1937_vm15 = vcmp.gt.f32.partialorder %v5238_v41, 0.0  ;;  %vm1936_vm1 = vcmp.gt.f32.partialorder %v5253_v25, 0.0  ;;  %vm2660_vm4 = vcmask 1047559  }
 0x91b   : > { %v1981_v13 = vmul.f32 1.442695, %v1952_v31  ;;  %4009 = vpow2.f32 %v1985_v32  ;;  %v3315_v62 = vadd.f32 -1.0, %v3996_v14  ;;  %v3317_v31 = vadd.f32 -1.0, %v3994_v4 }
 0x91c   : > { %v3998_v28 = vpop.eup %3997 }
 0x91d   : > { %4011 = vpow2.f32 %v1981_v13  ;;  %v2008_v51 = vsel %vm1928_vm3, %v5224_v38, %v3315_v62  ;;  %v3320_v13 = vadd.f32 -1.0, %v3998_v28  ;;  %v2010_v34 = vsel %vm1930_vm12, %v5222_v9, %v3317_v31 }
 0x91e   : > { %v4000_v27 = vpop.eup %3999  ;;  %vm5528_vm12 = vcmp.gt.f32.partialorder %v5235_v23, 0.0  ;;  %vm5529_vm3 = vcmask 1043459  }
 0x91f   : > { %v3318_v18 = vadd.f32 -1.0, %v4000_v27 }
 0x920   : > { %v4002_v57 = vpop.eup %4001 }
 0x921   : > { %v3321_v5 = vadd.f32 -1.0, %v4002_v57  ;;  %v2011_v40 = vsel %vm1931_vm10, %v5228_v29, %v3318_v18  ;;  %vm2809_vm10 = vcmask 3072  }
 0x922   : > { %v4004_v20 = vpop.eup %4003 }
 0x923   : > { %v3319_v48 = vadd.f32 -1.0, %v4004_v20  ;;  %v2014_v29 = vsel %vm1934_vm14, %v5230_v45, %v3321_v5  ;;  %vm2944_vm14 = vcmask 257024  }
 0x924   : > { %v4006_v0 = vpop.eup %4005 }
 0x925   : > { %v3324_v38 = vadd.f32 -1.0, %v4006_v0 }
 0x926   : > { %v4008_v46 = vpop.eup %4007 }
 0x928   : > { %v4010_v33 = vpop.eup %4009 }
 0x92a   : > { %v4012_v35 = vpop.eup %4011 }
 0x94a   : > { %v2565_v24 = vpop.permute.xlu1 %2564 }
 0x94b   : > { %v5265_v10 = vsel %vm2608_vm5, %v2005_v39, %v2565_v24 }
 0x94c   : > { %v2644_v59 = vrot.slane %v5265_v10, 6 }
 0x94d   : > { %v2561_v19 = vpop.permute.xlu0 %2560 }
 0x94e   : > { %v2609_v54 = vsel %vm2608_vm5, %v2003_v21, %v2561_v19  ;;  %v3322_v19 = vadd.f32 -1.0, %v4008_v46 }
 0x94f   : > { %v2678_v32 = vrot.slane %v2609_v54, 1 }
 0x950   : > { %v2563_v15 = vpop.permute.xlu1 %2562 }
 0x951   : > { %v2567_v11 = vpop.permute.xlu0 %2566  ;;  %v5272_v12 = vsel %vm2608_vm5, %v2004_v7, %v2563_v15  ;;  %v3323_v7 = vadd.f32 -1.0, %v4012_v35 }
 0x952   : > { %v5269_v1 = vsel %vm2608_vm5, %v2006_v42, %v2567_v11  ;;  %v2641_v52 = vrot.slane %v5272_v12, 7  ;;  %v2679_v63 = vsel %vm2642_vm7, %v5272_v12, %v2678_v32  ;;  %v3325_v42 = vadd.f32 -1.0, %v4010_v33 }
 0x953   : > { %v2647_v22 = vrot.slane %v5269_v1, 5  ;;  %v2680_v11 = vrot.slane %v5265_v10, 7  ;;  %v2682_v21 = vrot.slane %v5269_v1, 6  ;;  %v2013_v10 = vsel %vm1933_vm6, %v5226_v60, %v3320_v13 }
 0x954   : > { %v2643_v55 = vsel %vm2642_vm7, %v2641_v52, %v2609_v54  ;;  %v2573_v17 = vpop.permute.xlu1 %2572  ;;  %v2012_v1 = vsel %vm5528_vm12, %v5235_v23, %v3319_v48  ;;  %v2017_v60 = vsel %vm1937_vm15, %v5238_v41, %v3324_v38  ;;  %v2016_v45 = vsel %vm1936_vm1, %v5253_v25, %v3323_v7 }
 0x955   : > { %v2646_v3 = vsel %vm2645_vm8, %v2644_v59, %v2643_v55  ;;  %v5301_v50 = vsel %vm2608_vm5, %v2009_v49, %v2573_v17  ;;  %v2681_v59 = vsel %vm2645_vm8, %v2680_v11, %v2679_v63 }
 0x956   : > { %v2649_v36 = vsel %vm5488_vm9, %v2647_v22, %v2646_v3  ;;  %vm1938_vm9 = vcmp.gt.f32.partialorder %v5247_v37, 0.0  ;;  %v2656_v15 = vrot.slane %v5301_v50, 2  ;;  %v2015_v22 = vsel %vm1935_vm0, %v5241_v43, %v3322_v19  ;;  %vm5530_vm0 = vmmov %vm5529_vm3 }
 0x957   : > { %v2018_v55 = vsel %vm1938_vm9, %v5247_v37, %v3325_v42  ;;  %v2683_v23 = vsel %vm5529_vm3, %v2682_v21, %v2681_v59  ;;  %v2688_v56 = vrot.slane %v5301_v50, 3  ;;  %vm5531_vm1 = vmmov %vm5530_vm0  ;;  %vm5532_vm9 = vcmask 130048  }
 0x958   : > { %v2569_v2 = vpop.permute.xlu1 %2568  ;;  %vm5537_vm15 = vmmov %vm5530_vm0 }
 0x959   : > { %v2613_v16 = vsel %vm2608_vm5, %v2007_v47, %v2569_v2 }
 0x95a   : > { %v2581_v53 = vpop.permute.xlu0 %2580  ;;  %v2650_v61 = vrot.slane %v2613_v16, 4  ;;  %v2684_v14 = vrot.slane %v2613_v16, 5 }
 0x95b   : > { %v2619_v30 = vsel %vm2608_vm5, %v2013_v10, %v2581_v53 }
 0x95c   : > { %v2652_v8 = vsel %vm2651_vm11, %v2650_v61, %v2649_v36  ;;  %v2571_v26 = vpop.permute.xlu1 %2570  ;;  %v2694_v36 = vrot.slane %v2619_v30, 7  ;;  %v2685_v37 = vsel %vm2651_vm11, %v2684_v14, %v2683_v23  ;;  %v2664_v57 = vrot.slane %v2619_v30, 6  ;;  %v3346_v23 = vld [vmem:[%s5479_s4 + $0x4] ss:$0 sm:$0xff] }
 0x95d   : > { %v2614_v24 = vsel %vm2608_vm5, %v2008_v51, %v2571_v26 }
 0x95e   : > { %v2583_v6 = vpop.permute.xlu0 %2582  ;;  %v2653_v39 = vrot.slane %v2614_v24, 3  ;;  %v2686_v17 = vrot.slane %v2614_v24, 4 }
 0x95f   : > { %v2620_v28 = vsel %vm2608_vm5, %v2014_v29, %v2583_v6 }
 0x960   : > { %v2655_v52 = vsel %vm2654_vm13, %v2653_v39, %v2652_v8  ;;  %v2577_v12 = vpop.permute.xlu1 %2576  ;;  %v2666_v20 = vrot.slane %v2620_v28, 5  ;;  %v2696_v47 = vrot.slane %v2620_v28, 6  ;;  %v2687_v16 = vsel %vm2654_vm13, %v2686_v17, %v2685_v37 }
 0x961   : > { %v2617_v54 = vsel %vm2608_vm5, %v2011_v40, %v2577_v12  ;;  %v2658_v9 = vsel %vm2657_vm2, %v2656_v15, %v2655_v52  ;;  %v2689_v24 = vsel %vm2657_vm2, %v2688_v56, %v2687_v16 }
 0x962   : > { %v2589_v4 = vpop.permute.xlu0 %2588  ;;  %v2692_v3 = vrot.slane %v2617_v54, 1 }
 0x963   : > { %v2623_v46 = vsel %vm2608_vm5, %v2017_v60, %v2589_v4 }
 0x964   : > { %v2579_v27 = vpop.permute.xlu1 %2578  ;;  %v2672_v13 = vrot.slane %v2623_v46, 2  ;;  %v2702_v7 = vrot.slane %v2623_v46, 3 }
 0x965   : > { %v2618_v43 = vsel %vm2608_vm5, %v2012_v1, %v2579_v27  ;;  %v3342_v1 = vld [vmem:[%s5479_s4 + $0x3] ss:$0 sm:$0xff] }
 0x966   : > { %v2585_v41 = vpop.permute.xlu0 %2584  ;;  %v2662_v62 = vrot.slane %v2618_v43, 7  ;;  %v2693_v25 = vsel %vm2642_vm7, %v2618_v43, %v2692_v3 }
 0x967   : > { %v2621_v53 = vsel %vm2608_vm5, %v2015_v22, %v2585_v41  ;;  %v2695_v2 = vsel %vm2645_vm8, %v2694_v36, %v2693_v25  ;;  %v3347_v36 = vld [vmem:[%s5479_s4 + $0x5] ss:$0 sm:$0xff] }
 0x968   : > { %v2668_v0 = vrot.slane %v2621_v53, 4  ;;  %v2663_v49 = vsel %vm2642_vm7, %v2662_v62, %v2617_v54  ;;  %v2698_v61 = vrot.slane %v2621_v53, 5  ;;  %v2575_v33 = vpop.permute.xlu1 %2574  ;;  %v2697_v6 = vsel %vm5530_vm0, %v2696_v47, %v2695_v2 }
 0x969   : > { %v2665_v51 = vsel %vm2645_vm8, %v2664_v57, %v2663_v49  ;;  %v2616_v35 = vsel %vm2608_vm5, %v2010_v34, %v2575_v33 }
 0x96a   : > { %v2587_v31 = vpop.permute.xlu0 %2586  ;;  %v2667_v32 = vsel %vm5531_vm1, %v2666_v20, %v2665_v51  ;;  %v2659_v50 = vrot.slane %v2616_v35, 1  ;;  %v2690_v8 = vrot.slane %v2616_v35, 2  ;;  %v2699_v38 = vsel %vm2651_vm11, %v2698_v61, %v2697_v6 }
 0x96b   : > { %v2622_v18 = vsel %vm2608_vm5, %v2016_v45, %v2587_v31  ;;  %v2669_v5 = vsel %vm2651_vm11, %v2668_v0, %v2667_v32  ;;  %vm5533_vm11 = vmmov %vm5532_vm9 }
 0x96c   : > { %v2670_v26 = vrot.slane %v2622_v18, 3  ;;  %v2700_v48 = vrot.slane %v2622_v18, 4  ;;  %v2691_v63 = vsel %vm2660_vm4, %v2690_v8, %v2689_v24  ;;  %v2661_v42 = vsel %vm2660_vm4, %v2659_v50, %v2658_v9 }
 0x96d   : > { %2706 = vrot.lane.b32.xlu1 %v2691_v63, %s4181_s29 }
 0x96e   : > { %v2671_v19 = vsel %vm2654_vm13, %v2670_v26, %v2669_v5  ;;  %v2591_v39 = vpop.permute.xlu0 %2590  ;;  %v2701_v11 = vsel %vm2654_vm13, %v2700_v48, %v2699_v38  ;;  %vm5534_vm13 = vmmov 0  }
 0x96f   : > { %v2624_v15 = vsel %vm2608_vm5, %v2018_v55, %v2591_v39  ;;  %v2673_v34 = vsel %vm2657_vm2, %v2672_v13, %v2671_v19  ;;  %v2703_v52 = vsel %vm2657_vm2, %v2702_v7, %v2701_v11  ;;  %vm2736_vm5 = vcmask 261120   ;;  %vm5535_vm2 = vmmov %vm5532_vm9 }
 0x970   : > { %v2674_v40 = vrot.slane %v2624_v15, 1  ;;  %v2704_v21 = vrot.slane %v2624_v15, 2  ;;  %vm5536_vm6 = vmmov %vm5535_vm2 }
 0x972   : > { %v2705_v12 = vsel %vm2660_vm4, %v2704_v21, %v2703_v52  ;;  %v2675_v4 = vsel %vm2660_vm4, %v2674_v40, %v2673_v34 }
 0x973   : > { %2708 = vrot.lane.b32.xlu0 %v2705_v12, %s4181_s29 }
 0x9df   : > { %v2707_v10 = vpop.permute.xlu1 %2706 }
 0x9e0   : > { %v5371_v54 = vsel %vm5532_vm9, %v2661_v42, %v2707_v10 }
 0x9e5   : > { %v2709_v59 = vpop.permute.xlu0 %2708 }
 0x9e6   : > { %v5374_v9 = vsel %vm5533_vm11, %v2675_v4, %v2709_v59 }
 0x9e7   : > { %v2714_v29 = vpack.c.bf16 %v5374_v9, %v5371_v54 }
 0x9e9   : > { %3685 = vmatmul.mubr.msk.bf16.vlgmr.msra.gmra.mxu0 %vm2736_vm5, %v2714_v29 }
 0x9ea   : > { %3692 = vmatprep.mubr.msk.bf16.mxu0 %vm5534_vm13, %v4175_v58 }
 0xaa9   : > { %v2774_v14 = vpop.f32.mrf.mxu0 }
 0xaaa   : > { %v2775_v30 = vadd.f32 %v3342_v1, %v2774_v14 }
 0xaab   : > { %v3686_v60 = vpop.f32.mrf.mxu0 }
 0xaac   : > { %4013 = vtanh.f32 %v2775_v30 }
 0xaad   : > { %v2777_v22 = vpop.f32.mrf.mxu0 }
 0xaae   : > { %v2778_v55 = vadd.f32 %v3342_v1, %v2777_v22 }
 0xaaf   : > { %v3687_v45 = vpop.f32.mrf.mxu0 }
 0xab0   : > { %4015 = vtanh.f32 %v2778_v55 }
 0xab9   : > { %v4014_v17 = vpop.eup %4013 }
 0xaba   : > { %v2788_v28 = vmul.f32 %v4014_v17, %v3346_v23 }
 0xabc   : > { %v2790_v3 = vsel %vm5535_vm2, %v2788_v28, 0.0 }
 0xabd   : > { %v4016_v27 = vpop.eup %4015  ;;  %2791 = vadd.xlane.f32.xlu1 %v2790_v3 }
 0xabe   : > { %v2789_v41 = vmul.f32 %v4016_v27, %v3346_v23 }
 0xac0   : > { %v2793_v56 = vsel %vm5536_vm6, %v2789_v41, 0.0 }
 0xac1   : > { %2794 = vadd.xlane.f32.xlu0 %v2793_v56 }
 0xb46   : > { %v2792_v43 = vpop.xlane.xlu1 %2791 }
 0xb47   : > { %v2801_v53 = vadd.f32 %v3347_v36, %v2792_v43 }
 0xb49   : > { %v2805_v37 = vcombine.high %v2801_v53, %v2801_v53  ;;  %v2810_v57 = vsel %vm2809_vm10, %v2801_v53, -inf }
 0xb4a   : > { %v2811_v62 = vrot.slane %v2810_v57, 4  ;;  %v2795_v25 = vpop.xlane.xlu0 %2794 }
 0xb4b   : > { %v2817_v20 = vsel %vm2809_vm10, %v2805_v37, -inf  ;;  %v2802_v47 = vadd.f32 %v3347_v36, %v2795_v25 }
 0xb4c   : > { %v2812_v2 = vmax.f32 %v2810_v57, %v2811_v62  ;;  %v2818_v0 = vrot.slane %v2817_v20, 4 }
 0xb4d   : > { %v2806_v16 = vcombine.high %v2802_v47, %v2802_v47  ;;  %v2824_v46 = vsel %vm2809_vm10, %v2802_v47, -inf }
 0xb4e   : > { %v2813_v49 = vrot.slane %v2812_v2, 2  ;;  %v2819_v61 = vmax.f32 %v2817_v20, %v2818_v0  ;;  %v2825_v33 = vrot.slane %v2824_v46, 4 }
 0xb4f   : > { %v2831_v31 = vsel %vm2809_vm10, %v2806_v16, -inf }
 0xb50   : > { %v2814_v51 = vmax.f32 %v2812_v2, %v2813_v49  ;;  %v2820_v6 = vrot.slane %v2819_v61, 2  ;;  %v2826_v35 = vmax.f32 %v2824_v46, %v2825_v33  ;;  %v2832_v18 = vrot.slane %v2831_v31, 4 }
 0xb52   : > { %v2815_v32 = vrot.slane %v2814_v51, 1  ;;  %v2821_v50 = vmax.f32 %v2819_v61, %v2820_v6  ;;  %v2827_v8 = vrot.slane %v2826_v35, 2  ;;  %v2833_v26 = vmax.f32 %v2831_v31, %v2832_v18 }
 0xb54   : > { %v2816_v13 = vmax.f32 %v2814_v51, %v2815_v32  ;;  %v2822_v5 = vrot.slane %v2821_v50, 1  ;;  %v2828_v48 = vmax.f32 %v2826_v35, %v2827_v8  ;;  %v2834_v24 = vrot.slane %v2833_v26, 2  ;;  %v3817_v8 = vld [vmem:[#allocation5 + $0x40] sm:$0xff]  }
 0xb55   : > { %3689 = vmatpush3.bf16.msra.mxu0 %v3817_v8 }
 0xb56   : > { %v2823_v38 = vmax.f32 %v2821_v50, %v2822_v5  ;;  %v2838_v19 = vsub.f32 %v2801_v53, %v2816_v13  ;;  %v2829_v63 = vrot.slane %v2828_v48, 1  ;;  %v2835_v39 = vmax.f32 %v2833_v26, %v2834_v24  ;;  %v3818_v26 = vld [vmem:[#allocation5 + $0x38] sm:$0xff]   ;;  %3690 = vmatprep.subr.bf16.mxu0 %v4175_v58 }
 0xb57   : > { %v4182_v13 = vmov 839922192  }
 0xb58   : > { %v2839_v42 = vsub.f32 %v2805_v37, %v2823_v38  ;;  %v2842_v7 = vmul.f32 1.442695, %v2838_v19  ;;  %v2830_v11 = vmax.f32 %v2828_v48, %v2829_v63  ;;  %v2836_v15 = vrot.slane %v2835_v39, 1 }
 0xb59   : > { %3691 = vmatpush3.bf16.msra.mxu0 %v3818_v26  ;;  %v2898_v5 = vunpack.c.l.s4 %v4182_v13 }
 0xb5a   : > { %4017 = vpow2.f32 %v2842_v7  ;;  %v2844_v34 = vmul.f32 1.442695, %v2839_v42  ;;  %v2837_v40 = vmax.f32 %v2835_v39, %v2836_v15  ;;  %v2840_v21 = vsub.f32 %v2802_v47, %v2830_v11  ;;  %3696 = vmatprep.subr.bf16.mxu0 %v4175_v58 }
 0xb5b   : > { %v2899_v48 = vunpack.c.0.s8 %v2898_v5  ;;  %v2888_v39 = vcombine.high %v5371_v54, %v5371_v54 }
 0xb5c   : > { %4019 = vpow2.f32 %v2844_v34  ;;  %v2841_v52 = vsub.f32 %v2806_v16, %v2837_v40  ;;  %v2846_v12 = vmul.f32 1.442695, %v2840_v21 }
 0xb5d   : > { %v2902_v24 = vsub.s32 %v2899_v48, %v4444_v44 }
 0xb5e   : > { %4021 = vpow2.f32 %v2846_v12  ;;  %v2848_v4 = vmul.f32 1.442695, %v2841_v52  ;;  %v2889_v52 = vcombine.high %v5374_v9, %v5374_v9 }
 0xb60   : > { %4023 = vpow2.f32 %v2848_v4 }
 0xb67   : > { %v4018_v10 = vpop.eup %4017 }
 0xb68   : > { %v2850_v59 = vsel %vm2809_vm10, %v4018_v10, 0.0 }
 0xb69   : > { %v4020_v29 = vpop.eup %4019  ;;  %v2851_v1 = vrot.slane %v2850_v59, 4 }
 0xb6a   : > { %v2857_v14 = vsel %vm2809_vm10, %v4020_v29, 0.0 }
 0xb6b   : > { %v4022_v30 = vpop.eup %4021  ;;  %v2852_v60 = vadd.f32 %v2851_v1, %v2850_v59  ;;  %v2858_v22 = vrot.slane %v2857_v14, 4 }
 0xb6c   : > { %v2864_v55 = vsel %vm2809_vm10, %v4022_v30, 0.0 }
 0xb6d   : > { %v4024_v45 = vpop.eup %4023  ;;  %v2853_v23 = vrot.slane %v2852_v60, 2  ;;  %v2859_v17 = vadd.f32 %v2858_v22, %v2857_v14  ;;  %v2865_v28 = vrot.slane %v2864_v55, 4 }
 0xb6e   : > { %v2871_v3 = vsel %vm2809_vm10, %v4024_v45, 0.0 }
 0xb6f   : > { %v2854_v27 = vadd.f32 %v2853_v23, %v2852_v60  ;;  %v2860_v41 = vrot.slane %v2859_v17, 2  ;;  %v2866_v56 = vadd.f32 %v2865_v28, %v2864_v55  ;;  %v2872_v36 = vrot.slane %v2871_v3, 4 }
 0xb71   : > { %v2867_v43 = vrot.slane %v2866_v56, 2  ;;  %v2873_v53 = vadd.f32 %v2872_v36, %v2871_v3  ;;  %v2855_v37 = vrot.slane %v2854_v27, 1  ;;  %v2861_v57 = vadd.f32 %v2860_v41, %v2859_v17 }
 0xb73   : > { %v2868_v62 = vadd.f32 %v2867_v43, %v2866_v56  ;;  %v2874_v25 = vrot.slane %v2873_v53, 2  ;;  %v2856_v20 = vadd.f32 %v2855_v37, %v2854_v27  ;;  %v2862_v47 = vrot.slane %v2861_v57, 1 }
 0xb75   : > { %4025 = vrcp.f32 %v2856_v20  ;;  %v2863_v2 = vadd.f32 %v2862_v47, %v2861_v57  ;;  %v2869_v0 = vrot.slane %v2868_v62, 1  ;;  %v2875_v16 = vadd.f32 %v2874_v25, %v2873_v53 }
 0xb77   : > { %4027 = vrcp.f32 %v2863_v2  ;;  %v2870_v46 = vadd.f32 %v2869_v0, %v2868_v62  ;;  %v2876_v49 = vrot.slane %v2875_v16, 1 }
 0xb79   : > { %4029 = vrcp.f32 %v2870_v46  ;;  %v2877_v61 = vadd.f32 %v2876_v49, %v2875_v16 }
 0xb7b   : > { %4031 = vrcp.f32 %v2877_v61 }
 0xb82   : > { %v4026_v33 = vpop.eup %4025 }
 0xb83   : > { %v2882_v31 = vmul.f32 %v4026_v33, %v4018_v10 }
 0xb84   : > { %v4028_v51 = vpop.eup %4027 }
 0xb85   : > { %2894 = vperm.xlu0 %3793, %v2882_v31   ;;  %v2883_v6 = vmul.f32 %v4028_v51, %v4020_v29 }
 0xb86   : > { %v4030_v35 = vpop.eup %4029 }
 0xb87   : > { %2906 = vperm.xlu1 %3792, %v2883_v6   ;;  %v2884_v32 = vmul.f32 %v4030_v35, %v4022_v30 }
 0xb88   : > { %v4032_v18 = vpop.eup %4031 }
 0xb89   : > { %v2885_v50 = vmul.f32 %v4032_v18, %v4024_v45  ;;  %v3819_v18 = vld [vmem:[#allocation5 + $0x50] sm:$0xff]  }
 0xb8b   : > { %2918 = vperm.xlu1 %3792, %v2884_v32   ;;  %2930 = vperm.xlu0 %3793, %v2885_v50   ;;  %v3820_v32 = vld [vmem:[#allocation5 + $0x48] sm:$0xff]   ;;  %v3348_v50 = vld [vmem:[%s5479_s4 + $0x6] ss:$0 sm:$0xff] }
 0xc00   : > { %v2895_v38 = vpop.permute.xlu0 %2894 }
 0xc01   : > { %v2903_v19 = vrot.slane %v2895_v38, %v2902_v24 }
 0xc02   : > { %v2907_v63 = vpop.permute.xlu1 %2906 }
 0xc03   : > { %v2940_v42 = vmul.f32 %v2903_v19, %v5371_v54  ;;  %v2915_v7 = vrot.slane %v2907_v63, %v2902_v24 }
 0xc05   : > { %v2945_v11 = vsel %vm2944_vm14, %v2940_v42, 0.0  ;;  %v2941_v15 = vmul.f32 %v2915_v7, %v2888_v39 }
 0xc06   : > { %v2946_v34 = vrot.slane %v2945_v11, 4  ;;  %v2919_v40 = vpop.permute.xlu1 %2918  ;;  %v2931_v21 = vpop.permute.xlu0 %2930 }
 0xc07   : > { %v2952_v44 = vsel %vm2944_vm14, %v2941_v15, 0.0  ;;  %v2927_v12 = vrot.slane %v2919_v40, %v2902_v24  ;;  %v2939_v4 = vrot.slane %v2931_v21, %v2902_v24 }
 0xc08   : > { %v2947_v10 = vadd.f32 %v2946_v34, %v2945_v11  ;;  %v2953_v59 = vrot.slane %v2952_v44, 4 }
 0xc09   : > { %v2942_v29 = vmul.f32 %v2927_v12, %v5374_v9  ;;  %v2943_v1 = vmul.f32 %v2939_v4, %v2889_v52 }
 0xc0a   : > { %v2948_v54 = vrot.slane %v2947_v10, 2  ;;  %v2954_v14 = vadd.f32 %v2953_v59, %v2952_v44 }
 0xc0b   : > { %v2959_v30 = vsel %vm2944_vm14, %v2942_v29, 0.0  ;;  %v2966_v60 = vsel %vm2944_vm14, %v2943_v1, 0.0 }
 0xc0c   : > { %v2949_v22 = vadd.f32 %v2948_v54, %v2947_v10  ;;  %v2955_v55 = vrot.slane %v2954_v14, 2  ;;  %v2960_v45 = vrot.slane %v2959_v30, 4  ;;  %v2967_v23 = vrot.slane %v2966_v60, 4 }
 0xc0e   : > { %v2950_v17 = vrot.slane %v2949_v22, 1  ;;  %v2956_v28 = vadd.f32 %v2955_v55, %v2954_v14  ;;  %v2961_v3 = vadd.f32 %v2960_v45, %v2959_v30  ;;  %v2968_v27 = vadd.f32 %v2967_v23, %v2966_v60 }
 0xc10   : > { %v2957_v41 = vrot.slane %v2956_v28, 1  ;;  %v2962_v56 = vrot.slane %v2961_v3, 2  ;;  %v2969_v36 = vrot.slane %v2968_v27, 2  ;;  %v2951_v43 = vadd.f32 %v2950_v17, %v2949_v22 }
 0xc12   : > { %v2958_v9 = vadd.f32 %v2957_v41, %v2956_v28  ;;  %v2963_v53 = vadd.f32 %v2962_v56, %v2961_v3  ;;  %v2970_v37 = vadd.f32 %v2969_v36, %v2968_v27  ;;  %v2973_v20 = vpack.c.bf16 %v2951_v43, %v2951_v43 }
 0xc14   : > { %v2974_v57 = vpack.c.bf16 %v2958_v9, %v2958_v9  ;;  %v2964_v62 = vrot.slane %v2963_v53, 1  ;;  %v2971_v25 = vrot.slane %v2970_v37, 1  ;;  %v2990_v49 = vunpack.c.l.b16 %v2973_v20 }
 0xc16   : > { %v2965_v47 = vadd.f32 %v2964_v62, %v2963_v53  ;;  %v2972_v2 = vadd.f32 %v2971_v25, %v2970_v37  ;;  %v2991_v0 = vunpack.c.l.b16 %v2974_v57 }
 0xc18   : > { %v2975_v16 = vpack.c.bf16 %v2965_v47, %v2965_v47  ;;  %v2976_v46 = vpack.c.bf16 %v2972_v2, %v2972_v2  ;;  %v2994_v31 = vsel %vm2642_vm7, %v2991_v0, %v2990_v49 }
 0xc1a   : > { %v2992_v61 = vunpack.c.l.b16 %v2975_v16  ;;  %v2993_v33 = vunpack.c.l.b16 %v2976_v46 }
 0xc1c   : > { %v2995_v51 = vsel %vm2645_vm8, %v2992_v61, %v2994_v31 }
 0xc1d   : > { %v2996_v6 = vsel %vm5537_vm15, %v2993_v33, %v2995_v51 }
 0xc1e   : > { %v2997_v35 = vpack.c.b16 %v2996_v6, %v2996_v6 }
 0xc20   : > { %3693 = vmatmul.mubr.msk.bf16.vlgmr.msra.gmra.mxu0 %vm2736_vm5, %v2997_v35 }
 0xc21   : > { %3700 = vmatprep.mubr.msk.bf16.mxu0 %vm5534_vm13, %v4175_v58  ;;  %3697 = vmatpush3.bf16.msra.mxu0 %v3819_v18 }
 0xc22   : > { %3698 = vmatprep.subr.bf16.mxu0 %v4175_v58  ;;  %v3352_v58 = vld [vmem:[%s5479_s4 + $0x7] ss:$0 sm:$0xff] }
 0xc25   : > { %3699 = vmatpush3.bf16.msra.mxu0 %v3820_v32 }
 0xce0   : > { %v3047_v8 = vpop.f32.mrf.mxu0 }
 0xce1   : > { %v3048_v26 = vadd.f32 %v3348_v50, %v3047_v8 }
 0xce2   : > { %v3694_v13 = vpop.f32.mrf.mxu0 }
 0xce3   : > { %v3053_v5 = vmax.f32 %v3048_v26, 0.0 }
 0xce4   : > { %v3050_v48 = vpop.f32.mrf.mxu0 }
 0xce5   : > { %v3054_v24 = vpack.c.bf16 %v3053_v5, %v3053_v5 }
 0xce6   : > { %v3695_v38 = vpop.f32.mrf.mxu0 }
 0xce7   : > { %3701 = vmatmul.mubr.msk.bf16.vlgmr.msra.gmra.mxu0 %vm2736_vm5, %v3054_v24 }
 0xda7   : > { %v3113_v19 = vpop.f32.mrf.mxu0 }
 0xda8   : > { %v3114_v63 = vadd.f32 %v3352_v58, %v3113_v19 }
 0xda9   : > { %v3702_v39 = vpop.f32.mrf.mxu0 }
 0xdaa   : > { %3119 = vst [vmem:[%s287_s17] sm:$0xf] %v3114_v63 }
 0xdab   : > { %v3116_v42 = vpop.f32.mrf.mxu0 }
 0xdac   : > { %4112 = shalt.err (!%p4109_p5)
}
 0xdad   : > { %s4113_s27 = scalar_lea.hbm %s5432_s7, 64  ;;  %s4117_s9 = scalar_lea.hbm %s5480_s5, 128 }
 0xdae   : > { %p4114_p9 = scmp.ne.s32.totalorder %s5432_s7, %s4113_s27  ;;  %p4118_p6 = scmp.lt.s32.totalorder %s5432_s7, %s5480_s5 }
 0xdaf   : > { %p4119_p8 = scmp.lt.s32.totalorder %s4117_s9, %s4113_s27 }
 0xdb0   : > { %p4115_p1 = pnand %p4114_p9, %p5538_p7 }
 0xdb1   : > { %p4120_p3 = por %p4119_p8, %p4118_p6 }
 0xdb2   : > { %p4116_p4 = pneg %p4115_p1 }
 0xdb4   : > { %p4121_p11 = pnand %p4120_p3, %p4116_p4 }
 0xdb6   : > { %4124 = shalt.err (!%p4121_p11)
}
 0xdb7   : > { %3710 = dma.vmem_to_hbm [thread:$0]  (%p5538_p7), %s5434_s26, 64, %s5432_s7, %s3121_s8   ;;  %v3703_v7 = vpop.f32.mrf.mxu0 }
 0xdb8 PF: > { %s3146_s16 = sand.u32 1, %s4155_s18   ;;  %p5539_p12 = scmp.ne.s32.totalorder %s5490_s25, 0 }
 0xdb9   : > { %p5540_p10 = scmp.ge.s32.totalorder %s4167_s21, 2  ;;  %s3147_s17 = scalar_lea.sflag [#allocation4], %s3146_s16 }
 0xdbb   : > { %p3721_p2 = pnand %p5540_p10, %p5539_p12 }
 0xdbd   : > { %p3722_p13 = pneg %p3721_p2 }
 0xdbf   : > { %4150 = dma.done.wait (%p3722_p13), %s3147_s17, 64  }
 0xdc0   : > { %4152 = vsyncadd (%p3722_p13), %s3147_s17, 4294967232  ;;  %p19_p0 = scmp.ge.s32.totalorder %s4268_s30, 4   ;;  %s5541_s18 = smov %s4159_s19 }
 0xdc1   : > { %s5542_s19 = smov %s4163_s20  ;;  %s5543_s20 = smov %s4285_s13 }
 0xdc2   : > { %s5544_s21 = smov %s4268_s30  ;;  %21 = sbr.rel (!%p19_p0) target bundleno = 6 (0x6), region = 95 }
 0xdc7   :  { %3152 = vsyncpa [#allocation3], 1 }
 0xdc8   :  { %3154 = vsyncpa [#allocation3 + $0x1], 1 }
 0xdc9   :  { %3155 = vsyncpa [#allocation6], 1 }
 0xdca   :  { %3156 = vsyncpa [#allocation4], 1 }
 0xdcb   :  { %3158 = vsyncpa [#allocation4 + $0x1], 1 }

</bundles_post_ra>
